<compile_context>
chip_gen: v5e
topology: v5e:2x2
jax: 0.10.0
libtpu: 0.0.40
codegen_flags: <defaults>
</compile_context>

<pallas_src>
import jax
import jax.numpy as jnp
from jax import lax
from jax.experimental import pallas as pl
from jax.experimental.pallas import tpu as pltpu


# ----------------------------- Pallas kernels -----------------------------

def _conv_pool_kernel(x_ref, w_ref, b_ref, o_ref):
    """Fused conv-as-matmul + bias + tanh + 2x2 average pool.

    x_ref: (4, rows, F)  -- the 4 pooling phases of im2col patches
    w_ref: (F, C), b_ref: (1, C), o_ref: (rows, C)
    """
    w = w_ref[...]
    b = b_ref[...]
    acc = jnp.tanh(jnp.dot(x_ref[0], w, preferred_element_type=jnp.float32) + b)
    for k in range(1, 4):  # static unroll over the 4 pooling phases
        acc = acc + jnp.tanh(
            jnp.dot(x_ref[k], w, preferred_element_type=jnp.float32) + b)
    o_ref[...] = (acc * 0.25).astype(o_ref.dtype)


def _head_kernel(x_ref, w3_ref, b3_ref, w4_ref, b4_ref, w5_ref, b5_ref, o_ref):
    """Fused conv3 (as FC) + tanh + fc1 + tanh + fc2 + log_softmax."""
    h = jnp.tanh(jnp.dot(x_ref[...], w3_ref[...],
                         preferred_element_type=jnp.float32) + b3_ref[...])
    h = jnp.tanh(jnp.dot(h, w4_ref[...],
                         preferred_element_type=jnp.float32) + b4_ref[...])
    logits = jnp.dot(h, w5_ref[...],
                     preferred_element_type=jnp.float32) + b5_ref[...]
    m = jnp.max(logits, axis=-1, keepdims=True)
    s = logits - m
    lse = jnp.log(jnp.sum(jnp.exp(s), axis=-1, keepdims=True))
    o_ref[...] = (s - lse).astype(o_ref.dtype)


# --------------------------- pallas_call wrappers ---------------------------

def _rows_block(p):
    """Row-tile size: full block when tiny, else a lane-friendly divisor."""
    if p <= 1024:
        return p
    for cand in (1024, 512, 256, 128):
        if p % cand == 0:
            return cand
    return p


def conv_tanh_pool(phased_patches, w, b):
    """phased_patches: (4, P, F) f32; w: (F, C); b: (1, C) -> (P, C) f32."""
    _, p_rows, f = phased_patches.shape
    c = w.shape[1]
    bp = _rows_block(p_rows)
    return pl.pallas_call(
        _conv_pool_kernel,
        out_shape=jax.ShapeDtypeStruct((p_rows, c), jnp.float32),
        grid=(p_rows // bp,),
        in_specs=[pl.BlockSpec((4, bp, f), lambda i: (0, i, 0)),
                  pl.BlockSpec((f, c), lambda i: (0, 0)),
                  pl.BlockSpec((1, c), lambda i: (0, 0))],
        out_specs=pl.BlockSpec((bp, c), lambda i: (i, 0)),
        compiler_params=pltpu.CompilerParams(
            dimension_semantics=("parallel",)),
    )(phased_patches, w, b)


def head_fused(x, w3, b3, w4, b4, w5, b5):
    """x: (N, 400) -> log_softmax(fc2(tanh(fc1(tanh(conv3(x)))))) : (N, 10)."""
    n = x.shape[0]
    args = (x, w3, b3, w4, b4, w5, b5)
    in_specs = [pl.BlockSpec(a.shape, lambda: (0, 0)) for a in args]
    return pl.pallas_call(
        _head_kernel,
        out_shape=jax.ShapeDtypeStruct((n, w5.shape[1]), jnp.float32),
        in_specs=in_specs,
        out_specs=pl.BlockSpec((n, w5.shape[1]), lambda: (0, 0)),
    )(*args)


# ------------------------------ JAX glue -----------------------------------

def _pool_phased_patches(x_nhwc, k, padding):
    """Extract 5x5 patches (single XLA op) and group them by 2x2 pool phase.

    Returns (4, N*OHp*OWp, C*k*k) with feature order (c, kh, kw) -- matching
    PyTorch's Conv2d weight flattening -- plus the pooled output geometry.
    """
    n, h, w, c = x_nhwc.shape
    oh = h + 2 * padding - k + 1
    ow = w + 2 * padding - k + 1
    f = c * k * k
    patches = lax.conv_general_dilated_patches(
        x_nhwc, (k, k), (1, 1), [(padding, padding), (padding, padding)],
        dimension_numbers=("NHWC", "HWIO", "NHWC"))          # (n, oh, ow, f)
    ohp, owp = oh // 2, ow // 2
    p = patches.reshape(n, ohp, 2, owp, 2, f)
    p = p.transpose(2, 4, 0, 1, 3, 5)                         # (2, 2, n, ohp, owp, f)
    return p.reshape(4, n * ohp * owp, f), (ohp, owp)


def lenet5_forward(kp, x):
    """x: (N, 1, 28, 28) NCHW float32 -> (N, 10) log-probabilities."""
    n = x.shape[0]
    x = jnp.transpose(x, (0, 2, 3, 1)).astype(jnp.float32)    # NCHW -> NHWC (once)

    # conv1 (pad 2) + tanh + 2x2 avg-pool, fused in one kernel.
    p1, (oh1, ow1) = _pool_phased_patches(x, 5, 2)             # (4, N*196, 25)
    h1 = conv_tanh_pool(p1, kp["w1"], kp["b1"])                # (N*196, 6)
    h1 = h1.reshape(n, oh1, ow1, 6)                            # channel-last

    # conv2 + tanh + 2x2 avg-pool, fused in one kernel.
    p2, (oh2, ow2) = _pool_phased_patches(h1, 5, 0)            # (4, N*25, 150)
    h2 = conv_tanh_pool(p2, kp["w2"], kp["b2"])                # (N*25, 16)

    # conv3 is a plain FC on the flattened 5x5x16 map (no im2col needed);
    # fused with fc1 + fc2 + log_softmax in a single kernel.
    x3 = h2.reshape(n, oh2 * ow2 * 16)                         # (N, 400), (h,w,c) order
    return head_fused(x3, kp["w3"], kp["b3"], kp["w4"], kp["b4"],
                      kp["w5"], kp["b5"])


# ---------------------- parameters (PyTorch layout) -------------------------

def init_params(key):
    def uniform(k, shape, fan_in):
        bound = 1.0 / jnp.sqrt(jnp.float32(fan_in))
        return jax.random.uniform(k, shape, jnp.float32, -bound, bound)

    ks = jax.random.split(key, 10)
    return {
        "conv1_w": uniform(ks[0], (6, 1, 5, 5), 1 * 5 * 5),
        "conv1_b": uniform(ks[1], (6,), 1 * 5 * 5),
        "conv2_w": uniform(ks[2], (16, 6, 5, 5), 6 * 5 * 5),
        "conv2_b": uniform(ks[3], (16,), 6 * 5 * 5),
        "conv3_w": uniform(ks[4], (120, 16, 5, 5), 16 * 5 * 5),
        "conv3_b": uniform(ks[5], (120,), 16 * 5 * 5),
        "fc1_w": uniform(ks[6], (84, 120), 120),   # PyTorch Linear layout (out, in)
        "fc1_b": uniform(ks[7], (84,), 120),
        "fc2_w": uniform(ks[8], (10, 84), 84),
        "fc2_b": uniform(ks[9], (10,), 84),
    }


def prepare_params(params):
    """One-time conversion of PyTorch-layout params into matmul-ready layout."""
    f32 = jnp.float32
    return {
        # conv weights as (C_in*k*k, C_out) with (c, kh, kw) feature order.
        "w1": params["conv1_w"].reshape(6, 25).T.astype(f32),        # (25, 6)
        "b1": params["conv1_b"].reshape(1, 6).astype(f32),
        "w2": params["conv2_w"].reshape(16, 150).T.astype(f32),      # (150, 16)
        "b2": params["conv2_b"].reshape(1, 16).astype(f32),
        # conv3 weight permuted to (h, w, c_in) feature order so that the
        # channel-last (N, 5, 5, 16) activation flattens directly to (N, 400).
        "w3": params["conv3_w"].transpose(2, 3, 1, 0).reshape(400, 120).astype(f32),
        "b3": params["conv3_b"].reshape(1, 120).astype(f32),
        # FC weights pre-transposed to (in, out).
        "w4": params["fc1_w"].T.astype(f32),                         # (120, 84)
        "b4": params["fc1_b"].reshape(1, 84).astype(f32),
        "w5": params["fc2_w"].T.astype(f32),                         # (84, 10)
        "b5": params["fc2_b"].reshape(1, 10).astype(f32),
    }


# ----------------------------- reference (JAX) ------------------------------

def lenet5_reference(params, x):
    def conv(x, w, b, pad):
        y = lax.conv_general_dilated(
            x, w, window_strides=(1, 1),
            padding=[(pad, pad), (pad, pad)],
            dimension_numbers=("NCHW", "OIHW", "NCHW"))
        return jnp.tanh(y + b[None, :, None, None])

    def pool(x):
        n, c, h, w = x.shape
        return x.reshape(n, c, h // 2, 2, w // 2, 2).mean(axis=(3, 5))

    x = pool(conv(x, params["conv1_w"], params["conv1_b"], 2))
    x = pool(conv(x, params["conv2_w"], params["conv2_b"], 0))
    x = conv(x, params["conv3_w"], params["conv3_b"], 0)
    x = x.reshape(-1, 120)
    x = jnp.tanh(x @ params["fc1_w"].T + params["fc1_b"])
    x = x @ params["fc2_w"].T + params["fc2_b"]
    return jax.nn.log_softmax(x, axis=1)


# --------------------------------- main -------------------------------------

if __name__ == "__main__":
    key = jax.random.PRNGKey(0)
    pkey, xkey = jax.random.split(key)
    params = init_params(pkey)
    kparams = prepare_params(params)   # weights pre-transposed once, outside jit

    # LeNet-5 requires 28x28 single-channel input (conv3 reduces 5x5 -> 1x1).
    x = jax.random.normal(xkey, (2, 1, 28, 28), dtype=jnp.float32)

    out = jax.jit(lenet5_forward)(kparams, x)
    out = jax.block_until_ready(out)

    ref = lenet5_reference(params, x)
    assert out.shape == (2, 10) and out.dtype == jnp.float32
    assert jnp.allclose(out, ref, atol=2e-2, rtol=2e-2), "mismatch vs reference"

    print("KERNEL_OK")
</pallas_src>

<mosaic_0001>
module attributes {stable_mosaic.version = 11 : i64} {
  func.func @_conv_pool_kernel(%arg0: i32, %arg1: memref<4x392x25xf32, #tpu.memory_space<vmem>>, %arg2: memref<25x6xf32, #tpu.memory_space<vmem>>, %arg3: memref<1x6xf32, #tpu.memory_space<vmem>>, %arg4: memref<392x6xf32, #tpu.memory_space<vmem>>) attributes {dimension_semantics = [#tpu.dimension_semantics<parallel>], iteration_bounds = array<i64: 1>, scalar_prefetch = 0 : i64, scratch_operands = 0 : i64, tpu.core_type = #tpu.core_type<tc>, window_params = [{transform_indices = @transform_0, window_bounds = array<i64: 4, 392, 25>}, {pipeline_mode = #tpu.pipeline_mode<synchronous>, transform_indices = @transform_1, window_bounds = array<i64: 25, 6>}, {pipeline_mode = #tpu.pipeline_mode<synchronous>, transform_indices = @transform_2, window_bounds = array<i64: 1, 6>}, {transform_indices = @transform_3, window_bounds = array<i64: 392, 6>}]} {
    %c0 = arith.constant 0 : index
    %c0_0 = arith.constant 0 : index
    %0 = vector.load %arg2[%c0, %c0_0] : memref<25x6xf32, #tpu.memory_space<vmem>>, vector<25x6xf32>
    %c0_1 = arith.constant 0 : index
    %c0_2 = arith.constant 0 : index
    %1 = vector.load %arg3[%c0_1, %c0_2] : memref<1x6xf32, #tpu.memory_space<vmem>>, vector<1x6xf32>
    %c0_3 = arith.constant 0 : index
    %c0_4 = arith.constant 0 : index
    %c0_5 = arith.constant 0 : index
    %2 = vector.load %arg1[%c0_3, %c0_4, %c0_5] : memref<4x392x25xf32, #tpu.memory_space<vmem>>, vector<1x392x25xf32>
    %3 = vector.shape_cast %2 : vector<1x392x25xf32> to vector<392x25xf32>
    %cst = arith.constant dense<0.000000e+00> : vector<392x6xf32>
    %4 = tpu.matmul %3, %0, %cst {dimension_numbers = #tpu.dot_dimension_numbers<[1], [0], [0], [1], [0, 0, 1, 1], [], []>} : vector<392x25xf32>, vector<25x6xf32>, vector<392x6xf32> -> vector<392x6xf32>
    %5 = vector.broadcast %1 : vector<1x6xf32> to vector<392x6xf32>
    %6 = arith.addf %4, %5 : vector<392x6xf32>
    %7 = math.tanh %6 : vector<392x6xf32>
    %c1 = arith.constant 1 : index
    %c0_6 = arith.constant 0 : index
    %c0_7 = arith.constant 0 : index
    %8 = vector.load %arg1[%c1, %c0_6, %c0_7] : memref<4x392x25xf32, #tpu.memory_space<vmem>>, vector<1x392x25xf32>
    %9 = vector.shape_cast %8 : vector<1x392x25xf32> to vector<392x25xf32>
    %cst_8 = arith.constant dense<0.000000e+00> : vector<392x6xf32>
    %10 = tpu.matmul %9, %0, %cst_8 {dimension_numbers = #tpu.dot_dimension_numbers<[1], [0], [0], [1], [0, 0, 1, 1], [], []>} : vector<392x25xf32>, vector<25x6xf32>, vector<392x6xf32> -> vector<392x6xf32>
    %11 = vector.broadcast %1 : vector<1x6xf32> to vector<392x6xf32>
    %12 = arith.addf %10, %11 : vector<392x6xf32>
    %13 = math.tanh %12 : vector<392x6xf32>
    %14 = arith.addf %7, %13 : vector<392x6xf32>
    %c2 = arith.constant 2 : index
    %c0_9 = arith.constant 0 : index
    %c0_10 = arith.constant 0 : index
    %15 = vector.load %arg1[%c2, %c0_9, %c0_10] : memref<4x392x25xf32, #tpu.memory_space<vmem>>, vector<1x392x25xf32>
    %16 = vector.shape_cast %15 : vector<1x392x25xf32> to vector<392x25xf32>
    %cst_11 = arith.constant dense<0.000000e+00> : vector<392x6xf32>
    %17 = tpu.matmul %16, %0, %cst_11 {dimension_numbers = #tpu.dot_dimension_numbers<[1], [0], [0], [1], [0, 0, 1, 1], [], []>} : vector<392x25xf32>, vector<25x6xf32>, vector<392x6xf32> -> vector<392x6xf32>
    %18 = vector.broadcast %1 : vector<1x6xf32> to vector<392x6xf32>
    %19 = arith.addf %17, %18 : vector<392x6xf32>
    %20 = math.tanh %19 : vector<392x6xf32>
    %21 = arith.addf %14, %20 : vector<392x6xf32>
    %c3 = arith.constant 3 : index
    %c0_12 = arith.constant 0 : index
    %c0_13 = arith.constant 0 : index
    %22 = vector.load %arg1[%c3, %c0_12, %c0_13] : memref<4x392x25xf32, #tpu.memory_space<vmem>>, vector<1x392x25xf32>
    %23 = vector.shape_cast %22 : vector<1x392x25xf32> to vector<392x25xf32>
    %cst_14 = arith.constant dense<0.000000e+00> : vector<392x6xf32>
    %24 = tpu.matmul %23, %0, %cst_14 {dimension_numbers = #tpu.dot_dimension_numbers<[1], [0], [0], [1], [0, 0, 1, 1], [], []>} : vector<392x25xf32>, vector<25x6xf32>, vector<392x6xf32> -> vector<392x6xf32>
    %25 = vector.broadcast %1 : vector<1x6xf32> to vector<392x6xf32>
    %26 = arith.addf %24, %25 : vector<392x6xf32>
    %27 = math.tanh %26 : vector<392x6xf32>
    %28 = arith.addf %21, %27 : vector<392x6xf32>
    %cst_15 = arith.constant 2.500000e-01 : f32
    %29 = vector.broadcast %cst_15 : f32 to vector<392x6xf32>
    %30 = arith.mulf %28, %29 : vector<392x6xf32>
    %c0_16 = arith.constant 0 : index
    %c0_17 = arith.constant 0 : index
    %31 = vector.load %arg4[%c0_16, %c0_17] : memref<392x6xf32, #tpu.memory_space<vmem>>, vector<392x6xf32>
    tpu.vector_store %arg4[%c0_16, %c0_17], %30 {strides = array<i32>} : memref<392x6xf32, #tpu.memory_space<vmem>>, vector<392x6xf32>,
    return
  }
  func.func @transform_0(%arg0: i32) -> (i32, i32, i32) {
    %c0_i32 = arith.constant 0 : i32
    %c0_i32_0 = arith.constant 0 : i32
    %c0_i32_1 = arith.constant 0 : i32
    return %c0_i32, %arg0, %c0_i32_0 : i32, i32, i32
  }
  func.func @transform_1(%arg0: i32) -> (i32, i32) {
    %c0_i32 = arith.constant 0 : i32
    %c0_i32_0 = arith.constant 0 : i32
    %c0_i32_1 = arith.constant 0 : i32
    return %c0_i32, %c0_i32_0 : i32, i32
  }
  func.func @transform_2(%arg0: i32) -> (i32, i32) {
    %c0_i32 = arith.constant 0 : i32
    %c0_i32_0 = arith.constant 0 : i32
    %c0_i32_1 = arith.constant 0 : i32
    return %c0_i32, %c0_i32_0 : i32, i32
  }
  func.func @transform_3(%arg0: i32) -> (i32, i32) {
    %c0_i32 = arith.constant 0 : i32
    %c0_i32_0 = arith.constant 0 : i32
    return %arg0, %c0_i32 : i32, i32
  }
}

module attributes {stable_mosaic.version = 11 : i64} {
  func.func @_conv_pool_kernel(%arg0: i32, %arg1: memref<4x50x150xf32, #tpu.memory_space<vmem>>, %arg2: memref<150x16xf32, #tpu.memory_space<vmem>>, %arg3: memref<1x16xf32, #tpu.memory_space<vmem>>, %arg4: memref<50x16xf32, #tpu.memory_space<vmem>>) attributes {dimension_semantics = [#tpu.dimension_semantics<parallel>], iteration_bounds = array<i64: 1>, scalar_prefetch = 0 : i64, scratch_operands = 0 : i64, tpu.core_type = #tpu.core_type<tc>, window_params = [{transform_indices = @transform_0, window_bounds = array<i64: 4, 50, 150>}, {pipeline_mode = #tpu.pipeline_mode<synchronous>, transform_indices = @transform_1, window_bounds = array<i64: 150, 16>}, {pipeline_mode = #tpu.pipeline_mode<synchronous>, transform_indices = @transform_2, window_bounds = array<i64: 1, 16>}, {transform_indices = @transform_3, window_bounds = array<i64: 50, 16>}]} {
    %c0 = arith.constant 0 : index
    %c0_0 = arith.constant 0 : index
    %0 = vector.load %arg2[%c0, %c0_0] : memref<150x16xf32, #tpu.memory_space<vmem>>, vector<150x16xf32>
    %c0_1 = arith.constant 0 : index
    %c0_2 = arith.constant 0 : index
    %1 = vector.load %arg3[%c0_1, %c0_2] : memref<1x16xf32, #tpu.memory_space<vmem>>, vector<1x16xf32>
    %c0_3 = arith.constant 0 : index
    %c0_4 = arith.constant 0 : index
    %c0_5 = arith.constant 0 : index
    %2 = vector.load %arg1[%c0_3, %c0_4, %c0_5] : memref<4x50x150xf32, #tpu.memory_space<vmem>>, vector<1x50x150xf32>
    %3 = vector.shape_cast %2 : vector<1x50x150xf32> to vector<50x150xf32>
    %cst = arith.constant dense<0.000000e+00> : vector<50x16xf32>
    %4 = tpu.matmul %3, %0, %cst {dimension_numbers = #tpu.dot_dimension_numbers<[1], [0], [0], [1], [0, 0, 1, 1], [], []>} : vector<50x150xf32>, vector<150x16xf32>, vector<50x16xf32> -> vector<50x16xf32>
    %5 = vector.broadcast %1 : vector<1x16xf32> to vector<50x16xf32>
    %6 = arith.addf %4, %5 : vector<50x16xf32>
    %7 = math.tanh %6 : vector<50x16xf32>
    %c1 = arith.constant 1 : index
    %c0_6 = arith.constant 0 : index
    %c0_7 = arith.constant 0 : index
    %8 = vector.load %arg1[%c1, %c0_6, %c0_7] : memref<4x50x150xf32, #tpu.memory_space<vmem>>, vector<1x50x150xf32>
    %9 = vector.shape_cast %8 : vector<1x50x150xf32> to vector<50x150xf32>
    %cst_8 = arith.constant dense<0.000000e+00> : vector<50x16xf32>
    %10 = tpu.matmul %9, %0, %cst_8 {dimension_numbers = #tpu.dot_dimension_numbers<[1], [0], [0], [1], [0, 0, 1, 1], [], []>} : vector<50x150xf32>, vector<150x16xf32>, vector<50x16xf32> -> vector<50x16xf32>
    %11 = vector.broadcast %1 : vector<1x16xf32> to vector<50x16xf32>
    %12 = arith.addf %10, %11 : vector<50x16xf32>
    %13 = math.tanh %12 : vector<50x16xf32>
    %14 = arith.addf %7, %13 : vector<50x16xf32>
    %c2 = arith.constant 2 : index
    %c0_9 = arith.constant 0 : index
    %c0_10 = arith.constant 0 : index
    %15 = vector.load %arg1[%c2, %c0_9, %c0_10] : memref<4x50x150xf32, #tpu.memory_space<vmem>>, vector<1x50x150xf32>
    %16 = vector.shape_cast %15 : vector<1x50x150xf32> to vector<50x150xf32>
    %cst_11 = arith.constant dense<0.000000e+00> : vector<50x16xf32>
    %17 = tpu.matmul %16, %0, %cst_11 {dimension_numbers = #tpu.dot_dimension_numbers<[1], [0], [0], [1], [0, 0, 1, 1], [], []>} : vector<50x150xf32>, vector<150x16xf32>, vector<50x16xf32> -> vector<50x16xf32>
    %18 = vector.broadcast %1 : vector<1x16xf32> to vector<50x16xf32>
    %19 = arith.addf %17, %18 : vector<50x16xf32>
    %20 = math.tanh %19 : vector<50x16xf32>
    %21 = arith.addf %14, %20 : vector<50x16xf32>
    %c3 = arith.constant 3 : index
    %c0_12 = arith.constant 0 : index
    %c0_13 = arith.constant 0 : index
    %22 = vector.load %arg1[%c3, %c0_12, %c0_13] : memref<4x50x150xf32, #tpu.memory_space<vmem>>, vector<1x50x150xf32>
    %23 = vector.shape_cast %22 : vector<1x50x150xf32> to vector<50x150xf32>
    %cst_14 = arith.constant dense<0.000000e+00> : vector<50x16xf32>
    %24 = tpu.matmul %23, %0, %cst_14 {dimension_numbers = #tpu.dot_dimension_numbers<[1], [0], [0], [1], [0, 0, 1, 1], [], []>} : vector<50x150xf32>, vector<150x16xf32>, vector<50x16xf32> -> vector<50x16xf32>
    %25 = vector.broadcast %1 : vector<1x16xf32> to vector<50x16xf32>
    %26 = arith.addf %24, %25 : vector<50x16xf32>
    %27 = math.tanh %26 : vector<50x16xf32>
    %28 = arith.addf %21, %27 : vector<50x16xf32>
    %cst_15 = arith.constant 2.500000e-01 : f32
    %29 = vector.broadcast %cst_15 : f32 to vector<50x16xf32>
    %30 = arith.mulf %28, %29 : vector<50x16xf32>
    %c0_16 = arith.constant 0 : index
    %c0_17 = arith.constant 0 : index
    %31 = vector.load %arg4[%c0_16, %c0_17] : memref<50x16xf32, #tpu.memory_space<vmem>>, vector<50x16xf32>
    tpu.vector_store %arg4[%c0_16, %c0_17], %30 {strides = array<i32>} : memref<50x16xf32, #tpu.memory_space<vmem>>, vector<50x16xf32>,
    return
  }
  func.func @transform_0(%arg0: i32) -> (i32, i32, i32) {
    %c0_i32 = arith.constant 0 : i32
    %c0_i32_0 = arith.constant 0 : i32
    %c0_i32_1 = arith.constant 0 : i32
    return %c0_i32, %arg0, %c0_i32_0 : i32, i32, i32
  }
  func.func @transform_1(%arg0: i32) -> (i32, i32) {
    %c0_i32 = arith.constant 0 : i32
    %c0_i32_0 = arith.constant 0 : i32
    %c0_i32_1 = arith.constant 0 : i32
    return %c0_i32, %c0_i32_0 : i32, i32
  }
  func.func @transform_2(%arg0: i32) -> (i32, i32) {
    %c0_i32 = arith.constant 0 : i32
    %c0_i32_0 = arith.constant 0 : i32
    %c0_i32_1 = arith.constant 0 : i32
    return %c0_i32, %c0_i32_0 : i32, i32
  }
  func.func @transform_3(%arg0: i32) -> (i32, i32) {
    %c0_i32 = arith.constant 0 : i32
    %c0_i32_0 = arith.constant 0 : i32
    return %arg0, %c0_i32 : i32, i32
  }
}

module attributes {stable_mosaic.version = 11 : i64} {
  func.func @_head_kernel(%arg0: memref<2x400xf32, #tpu.memory_space<vmem>>, %arg1: memref<400x120xf32, #tpu.memory_space<vmem>>, %arg2: memref<1x120xf32, #tpu.memory_space<vmem>>, %arg3: memref<120x84xf32, #tpu.memory_space<vmem>>, %arg4: memref<1x84xf32, #tpu.memory_space<vmem>>, %arg5: memref<84x10xf32, #tpu.memory_space<vmem>>, %arg6: memref<1x10xf32, #tpu.memory_space<vmem>>, %arg7: memref<2x10xf32, #tpu.memory_space<vmem>>) attributes {dimension_semantics = [], scalar_prefetch = 0 : i64, scratch_operands = 0 : i64, tpu.core_type = #tpu.core_type<tc>} {
    %c0 = arith.constant 0 : index
    %c0_0 = arith.constant 0 : index
    %0 = vector.load %arg0[%c0, %c0_0] : memref<2x400xf32, #tpu.memory_space<vmem>>, vector<2x400xf32>
    %c0_1 = arith.constant 0 : index
    %c0_2 = arith.constant 0 : index
    %1 = vector.load %arg1[%c0_1, %c0_2] : memref<400x120xf32, #tpu.memory_space<vmem>>, vector<400x120xf32>
    %cst = arith.constant dense<0.000000e+00> : vector<2x120xf32>
    %2 = tpu.matmul %0, %1, %cst {dimension_numbers = #tpu.dot_dimension_numbers<[1], [0], [0], [1], [0, 0, 1, 1], [], []>} : vector<2x400xf32>, vector<400x120xf32>, vector<2x120xf32> -> vector<2x120xf32>
    %c0_3 = arith.constant 0 : index
    %c0_4 = arith.constant 0 : index
    %3 = vector.load %arg2[%c0_3, %c0_4] : memref<1x120xf32, #tpu.memory_space<vmem>>, vector<1x120xf32>
    %4 = vector.broadcast %3 : vector<1x120xf32> to vector<2x120xf32>
    %5 = arith.addf %2, %4 : vector<2x120xf32>
    %6 = math.tanh %5 : vector<2x120xf32>
    %c0_5 = arith.constant 0 : index
    %c0_6 = arith.constant 0 : index
    %7 = vector.load %arg3[%c0_5, %c0_6] : memref<120x84xf32, #tpu.memory_space<vmem>>, vector<120x84xf32>
    %cst_7 = arith.constant dense<0.000000e+00> : vector<2x84xf32>
    %8 = tpu.matmul %6, %7, %cst_7 {dimension_numbers = #tpu.dot_dimension_numbers<[1], [0], [0], [1], [0, 0, 1, 1], [], []>} : vector<2x120xf32>, vector<120x84xf32>, vector<2x84xf32> -> vector<2x84xf32>
    %c0_8 = arith.constant 0 : index
    %c0_9 = arith.constant 0 : index
    %9 = vector.load %arg4[%c0_8, %c0_9] : memref<1x84xf32, #tpu.memory_space<vmem>>, vector<1x84xf32>
    %10 = vector.broadcast %9 : vector<1x84xf32> to vector<2x84xf32>
    %11 = arith.addf %8, %10 : vector<2x84xf32>
    %12 = math.tanh %11 : vector<2x84xf32>
    %c0_10 = arith.constant 0 : index
    %c0_11 = arith.constant 0 : index
    %13 = vector.load %arg5[%c0_10, %c0_11] : memref<84x10xf32, #tpu.memory_space<vmem>>, vector<84x10xf32>
    %cst_12 = arith.constant dense<0.000000e+00> : vector<2x10xf32>
    %14 = tpu.matmul %12, %13, %cst_12 {dimension_numbers = #tpu.dot_dimension_numbers<[1], [0], [0], [1], [0, 0, 1, 1], [], []>} : vector<2x84xf32>, vector<84x10xf32>, vector<2x10xf32> -> vector<2x10xf32>
    %c0_13 = arith.constant 0 : index
    %c0_14 = arith.constant 0 : index
    %15 = vector.load %arg6[%c0_13, %c0_14] : memref<1x10xf32, #tpu.memory_space<vmem>>, vector<1x10xf32>
    %16 = vector.broadcast %15 : vector<1x10xf32> to vector<2x10xf32>
    %17 = arith.addf %14, %16 : vector<2x10xf32>
    %cst_15 = arith.constant dense<0xFF800000> : vector<2xf32>
    %18 = vector.multi_reduction <maximumf>, %17, %cst_15 [1] : vector<2x10xf32> to vector<2xf32>
    %19 = vector.shape_cast %18 : vector<2xf32> to vector<2x1xf32>
    %20 = vector.broadcast %19 : vector<2x1xf32> to vector<2x10xf32>
    %21 = arith.subf %17, %20 : vector<2x10xf32>
    %22 = math.exp %21 : vector<2x10xf32>
    %cst_16 = arith.constant dense<0.000000e+00> : vector<2xf32>
    %23 = vector.multi_reduction <add>, %22, %cst_16 [1] : vector<2x10xf32> to vector<2xf32>
    %24 = vector.shape_cast %23 : vector<2xf32> to vector<2x1xf32>
    %25 = math.log %24 : vector<2x1xf32>
    %26 = vector.broadcast %25 : vector<2x1xf32> to vector<2x10xf32>
    %27 = arith.subf %21, %26 : vector<2x10xf32>
    %c0_17 = arith.constant 0 : index
    %c0_18 = arith.constant 0 : index
    %28 = vector.load %arg7[%c0_17, %c0_18] : memref<2x10xf32, #tpu.memory_space<vmem>>, vector<2x10xf32>
    tpu.vector_store %arg7[%c0_17, %c0_18], %27 {strides = array<i32>} : memref<2x10xf32, #tpu.memory_space<vmem>>, vector<2x10xf32>,
    return
  }
}

</mosaic_0001>

<bundles_post_ra>
// kernel: lenet5_forward.3
= control target key start
LH: loop header
LB: loop body
LE: loop exit
PB: predicated region body
PF: predicated region fallthrough
CT: control target
= control target key end

     0   :  { %vm219_vm0 = vcmask 1040384   ;;  %vm71_vm1 = vcmask 203776   ;;  %vm1862_vm2 = vcmask 48128   ;;  %s3881_s1 = inlined_call_operand.vmem [shape: f32[25,6], index: 1, kind: input, shape index: {}]   ;;  %s3882_s0 = inlined_call_operand.vmem [shape: f32[4,392,25], index: 0, kind: input, shape index: {}]   ;;  %s3883_s2 = inlined_call_operand.vmem [shape: f32[1,6], index: 2, kind: input, shape index: {}]   ;;  %s3884_s3 = inlined_call_operand.vmem [shape: f32[392,6], index: 3, kind: output, shape index: {}]  }
   0x1   :  { %v17_v0 = vld [vmem:[%s3881_s1 + $0x18] sm:$0x1]  ;;  %v16_v1 = vld [vmem:[%s3881_s1 + $0x10] sm:$0xff]  ;;  %v15_v2 = vld [vmem:[%s3881_s1 + $0x8] sm:$0xff] }
   0x2   :  { %2114 = vmatpush.msk.msra.mxu2 %vm219_vm0, %v17_v0  ;;  %2213 = vmatpush.msk.msra.mxu3 %vm219_vm0, %v17_v0  ;;  %v14_v3 = vld [vmem:[%s3881_s1] sm:$0xff]  ;;  %v2065_v4 = vld [vmem:[%s3882_s0 + $0x310] sm:$0xff]  ;;  %v2164_v5 = vld [vmem:[%s3882_s0 + $0x498] sm:$0xff] }
   0x3   :  { %1916 = vmatpush.msk.msra.mxu0 %vm219_vm0, %v17_v0  ;;  %2015 = vmatpush.msk.msra.mxu1 %vm219_vm0, %v17_v0  ;;  %v19_v6 = vld [vmem:[%s3882_s0] sm:$0xff]  ;;  %v1966_v7 = vld [vmem:[%s3882_s0 + $0x188] sm:$0xff]  ;;  %v2066_v8 = vld [vmem:[%s3882_s0 + $0x318] sm:$0xff] }
   0x4   :  { %1105 = vmatpush.msra.mxu2 %v16_v1  ;;  %1564 = vmatpush.msra.mxu3 %v16_v1  ;;  %v2165_v9 = vld [vmem:[%s3882_s0 + $0x4a0] sm:$0xff]  ;;  %v20_v10 = vld [vmem:[%s3882_s0 + $0x8] sm:$0xff]  ;;  %v1967_v11 = vld [vmem:[%s3882_s0 + $0x190] sm:$0xff] }
   0x5   :  { %236 = vmatpush.msra.mxu0 %v16_v1  ;;  %646 = vmatpush.msra.mxu1 %v16_v1  ;;  %v2067_v12 = vld [vmem:[%s3882_s0 + $0x320] sm:$0xff]  ;;  %v2166_v13 = vld [vmem:[%s3882_s0 + $0x4a8] sm:$0xff]  ;;  %v21_v14 = vld [vmem:[%s3882_s0 + $0x10] sm:$0xff] }
   0x6   :  { %1106 = vmatpush.msra.mxu2 %v15_v2  ;;  %1565 = vmatpush.msra.mxu3 %v15_v2  ;;  %v1968_v15 = vld [vmem:[%s3882_s0 + $0x198] sm:$0xff]  ;;  %v2068_v16 = vld [vmem:[%s3882_s0 + $0x328] sm:$0xff]  ;;  %v2167_v17 = vld [vmem:[%s3882_s0 + $0x4b0] sm:$0xff] }
   0x7   :  { %237 = vmatpush.msra.mxu0 %v15_v2  ;;  %647 = vmatpush.msra.mxu1 %v15_v2  ;;  %v22_v18 = vld [vmem:[%s3882_s0 + $0x18] sm:$0xff]  ;;  %v1969_v19 = vld [vmem:[%s3882_s0 + $0x1a0] sm:$0xff]  ;;  %v2069_v20 = vld [vmem:[%s3882_s0 + $0x330] sm:$0xff] }
   0x8   :  { %1107 = vmatpush.msra.mxu2 %v14_v3  ;;  %1566 = vmatpush.msra.mxu3 %v14_v3  ;;  %v2168_v21 = vld [vmem:[%s3882_s0 + $0x4b8] sm:$0xff]  ;;  %v23_v22 = vld [vmem:[%s3882_s0 + $0x20] sm:$0xff]  ;;  %v1970_v23 = vld [vmem:[%s3882_s0 + $0x1a8] sm:$0xff] }
   0x9   :  { %2115 = vmatmul.msk.f32.vlgmr.msra.gmra.mxu2 %vm71_vm1, %v2065_v4  ;;  %2214 = vmatmul.msk.f32.vlgmr.msra.gmra.mxu3 %vm71_vm1, %v2164_v5  ;;  %v2070_v24 = vld [vmem:[%s3882_s0 + $0x338] sm:$0xff]  ;;  %v2169_v25 = vld [vmem:[%s3882_s0 + $0x4c0] sm:$0xff]  ;;  %v24_v26 = vld [vmem:[%s3882_s0 + $0x28] sm:$0xff] }
   0xa   :  { %238 = vmatpush.msra.mxu0 %v14_v3  ;;  %648 = vmatpush.msra.mxu1 %v14_v3  ;;  %v1971_v27 = vld [vmem:[%s3882_s0 + $0x1b0] sm:$0xff]  ;;  %v2071_v28 = vld [vmem:[%s3882_s0 + $0x340] sm:$0xff]  ;;  %v2170_v29 = vld [vmem:[%s3882_s0 + $0x4c8] sm:$0xff] }
   0xb   :  { %1917 = vmatmul.msk.f32.vlgmr.msra.gmra.mxu0 %vm71_vm1, %v19_v6  ;;  %2016 = vmatmul.msk.f32.vlgmr.msra.gmra.mxu1 %vm71_vm1, %v1966_v7  ;;  %v25_v30 = vld [vmem:[%s3882_s0 + $0x30] sm:$0xff]  ;;  %v1972_v31 = vld [vmem:[%s3882_s0 + $0x1b8] sm:$0xff]  ;;  %v2072_v32 = vld [vmem:[%s3882_s0 + $0x348] sm:$0xff] }
   0xc   :  { %v2171_v33 = vld [vmem:[%s3882_s0 + $0x4d0] sm:$0xff]  ;;  %v26_v34 = vld [vmem:[%s3882_s0 + $0x38] sm:$0xff]  ;;  %v1973_v35 = vld [vmem:[%s3882_s0 + $0x1c0] sm:$0xff] }
   0xd   :  { %v2073_v36 = vld [vmem:[%s3882_s0 + $0x350] sm:$0xff]  ;;  %v2172_v37 = vld [vmem:[%s3882_s0 + $0x4d8] sm:$0xff]  ;;  %v27_v38 = vld [vmem:[%s3882_s0 + $0x40] sm:$0xff] }
   0xe   :  { %v1974_v39 = vld [vmem:[%s3882_s0 + $0x1c8] sm:$0xff]  ;;  %v2074_v40 = vld [vmem:[%s3882_s0 + $0x358] sm:$0xff]  ;;  %v2173_v41 = vld [vmem:[%s3882_s0 + $0x4e0] sm:$0xff] }
   0xf   :  { %v28_v42 = vld [vmem:[%s3882_s0 + $0x48] sm:$0xff]  ;;  %v1975_v43 = vld [vmem:[%s3882_s0 + $0x1d0] sm:$0xff]  ;;  %v2075_v44 = vld [vmem:[%s3882_s0 + $0x360] sm:$0xff] }
  0x10   :  { %v2174_v45 = vld [vmem:[%s3882_s0 + $0x4e8] sm:$0xff]  ;;  %v29_v46 = vld [vmem:[%s3882_s0 + $0x50] sm:$0xff]  ;;  %v1976_v47 = vld [vmem:[%s3882_s0 + $0x1d8] sm:$0xff] }
  0x11   :  { %2116 = vmatmul.msk.f32.gmra.mxu2 %vm71_vm1, %v2066_v8  ;;  %2215 = vmatmul.msk.f32.gmra.mxu3 %vm71_vm1, %v2165_v9  ;;  %v2076_v48 = vld [vmem:[%s3882_s0 + $0x368] sm:$0xff]  ;;  %v2175_v49 = vld [vmem:[%s3882_s0 + $0x4f0] sm:$0xff]  ;;  %v30_v50 = vld [vmem:[%s3882_s0 + $0x58] sm:$0xff] }
  0x12   :  { %v1977_v51 = vld [vmem:[%s3882_s0 + $0x1e0] sm:$0xff]  ;;  %v2077_v52 = vld [vmem:[%s3882_s0 + $0x370] sm:$0xff]  ;;  %v2176_v53 = vld [vmem:[%s3882_s0 + $0x4f8] sm:$0xff] }
  0x13   :  { %1918 = vmatmul.msk.f32.gmra.mxu0 %vm71_vm1, %v20_v10  ;;  %2017 = vmatmul.msk.f32.gmra.mxu1 %vm71_vm1, %v1967_v11  ;;  %v31_v54 = vld [vmem:[%s3882_s0 + $0x60] sm:$0xff]  ;;  %v1978_v55 = vld [vmem:[%s3882_s0 + $0x1e8] sm:$0xff]  ;;  %v2078_v56 = vld [vmem:[%s3882_s0 + $0x378] sm:$0xff] }
  0x14   :  { %v2177_v57 = vld [vmem:[%s3882_s0 + $0x500] sm:$0xff]  ;;  %v32_v58 = vld [vmem:[%s3882_s0 + $0x68] sm:$0xff]  ;;  %v1979_v59 = vld [vmem:[%s3882_s0 + $0x1f0] sm:$0xff] }
  0x15   :  { %v2079_v60 = vld [vmem:[%s3882_s0 + $0x380] sm:$0xff]  ;;  %v2178_v61 = vld [vmem:[%s3882_s0 + $0x508] sm:$0xff]  ;;  %v33_v62 = vld [vmem:[%s3882_s0 + $0x70] sm:$0xff] }
  0x16   :  { %v1980_v63 = vld [vmem:[%s3882_s0 + $0x1f8] sm:$0xff]  ;;  %v2080_v0 = vld [vmem:[%s3882_s0 + $0x388] sm:$0xff]  ;;  %v2179_v1 = vld [vmem:[%s3882_s0 + $0x510] sm:$0xff] }
  0x17   :  { %v34_v2 = vld [vmem:[%s3882_s0 + $0x78] sm:$0xff]  ;;  %v1981_v3 = vld [vmem:[%s3882_s0 + $0x200] sm:$0xff]  ;;  %v2081_v5 = vld [vmem:[%s3882_s0 + $0x390] sm:$0xff] }
  0x18   :  { %v2949_v4 = vld [vmem:[%s3883_s2] ss:$0 sm:$0xff]  ;;  %v2180_v6 = vld [vmem:[%s3882_s0 + $0x518] sm:$0xff]  ;;  %v1982_v10 = vld [vmem:[%s3882_s0 + $0x208] sm:$0xff] }
  0x19   :  { %2117 = vmatmul.msk.f32.gmra.mxu2 %vm71_vm1, %v2067_v12  ;;  %2216 = vmatmul.msk.f32.gmra.mxu3 %vm71_vm1, %v2166_v13  ;;  %v35_v9 = vld [vmem:[%s3882_s0 + $0x80] sm:$0xff] }
  0x1b   :  { %1919 = vmatmul.msk.f32.gmra.mxu0 %vm71_vm1, %v21_v14  ;;  %2018 = vmatmul.msk.f32.gmra.mxu1 %vm71_vm1, %v1968_v15 }
  0x21   :  { %2118 = vmatmul.msk.f32.gmra.mxu2 %vm71_vm1, %v2068_v16  ;;  %2217 = vmatmul.msk.f32.gmra.mxu3 %vm71_vm1, %v2167_v17  ;;  %v2082_v17 = vld [vmem:[%s3882_s0 + $0x398] sm:$0xff] }
  0x23   :  { %1920 = vmatmul.msk.f32.gmra.mxu0 %vm71_vm1, %v22_v18  ;;  %2019 = vmatmul.msk.f32.gmra.mxu1 %vm71_vm1, %v1969_v19  ;;  %v2181_v18 = vld [vmem:[%s3882_s0 + $0x520] sm:$0xff] }
  0x29   :  { %2119 = vmatmul.msk.f32.gmra.mxu2 %vm71_vm1, %v2069_v20  ;;  %2218 = vmatmul.msk.f32.gmra.mxu3 %vm71_vm1, %v2168_v21  ;;  %v36_v21 = vld [vmem:[%s3882_s0 + $0x88] sm:$0xff] }
  0x2b   :  { %1921 = vmatmul.msk.f32.gmra.mxu0 %vm71_vm1, %v23_v22  ;;  %2020 = vmatmul.msk.f32.gmra.mxu1 %vm71_vm1, %v1970_v23  ;;  %v1983_v22 = vld [vmem:[%s3882_s0 + $0x210] sm:$0xff] }
  0x31   :  { %2120 = vmatmul.msk.f32.gmra.mxu2 %vm71_vm1, %v2070_v24  ;;  %2219 = vmatmul.msk.f32.gmra.mxu3 %vm71_vm1, %v2169_v25 }
  0x33   :  { %1922 = vmatmul.msk.f32.gmra.mxu0 %vm71_vm1, %v24_v26  ;;  %2021 = vmatmul.msk.f32.gmra.mxu1 %vm71_vm1, %v1971_v27 }
  0x39   :  { %2121 = vmatmul.msk.f32.gmra.mxu2 %vm71_vm1, %v2071_v28  ;;  %2220 = vmatmul.msk.f32.gmra.mxu3 %vm71_vm1, %v2170_v29 }
  0x3b   :  { %1923 = vmatmul.msk.f32.gmra.mxu0 %vm71_vm1, %v25_v30  ;;  %2022 = vmatmul.msk.f32.gmra.mxu1 %vm71_vm1, %v1972_v31 }
  0x41   :  { %2122 = vmatmul.msk.f32.gmra.mxu2 %vm71_vm1, %v2072_v32  ;;  %2221 = vmatmul.msk.f32.gmra.mxu3 %vm71_vm1, %v2171_v33 }
  0x43   :  { %1924 = vmatmul.msk.f32.gmra.mxu0 %vm71_vm1, %v26_v34  ;;  %2023 = vmatmul.msk.f32.gmra.mxu1 %vm71_vm1, %v1973_v35  ;;  %v2083_v35 = vld [vmem:[%s3882_s0 + $0x3a0] sm:$0xff] }
  0x49   :  { %2123 = vmatmul.msk.f32.gmra.mxu2 %vm71_vm1, %v2073_v36  ;;  %2222 = vmatmul.msk.f32.gmra.mxu3 %vm71_vm1, %v2172_v37  ;;  %v2182_v36 = vld [vmem:[%s3882_s0 + $0x528] sm:$0xff] }
  0x4b   :  { %1925 = vmatmul.msk.f32.gmra.mxu0 %vm71_vm1, %v27_v38  ;;  %2024 = vmatmul.msk.f32.gmra.mxu1 %vm71_vm1, %v1974_v39 }
  0x51   :  { %2124 = vmatmul.msk.f32.gmra.mxu2 %vm71_vm1, %v2074_v40  ;;  %2223 = vmatmul.msk.f32.gmra.mxu3 %vm71_vm1, %v2173_v41  ;;  %v37_v40 = vld [vmem:[%s3882_s0 + $0x90] sm:$0xff]  ;;  %v1984_v41 = vld [vmem:[%s3882_s0 + $0x218] sm:$0xff] }
  0x53   :  { %1926 = vmatmul.msk.f32.gmra.mxu0 %vm71_vm1, %v28_v42  ;;  %2025 = vmatmul.msk.f32.gmra.mxu1 %vm71_vm1, %v1975_v43 }
  0x59   :  { %2125 = vmatmul.msk.f32.gmra.mxu2 %vm71_vm1, %v2075_v44  ;;  %2224 = vmatmul.msk.f32.gmra.mxu3 %vm71_vm1, %v2174_v45 }
  0x5b   :  { %1927 = vmatmul.msk.f32.gmra.mxu0 %vm71_vm1, %v29_v46  ;;  %2026 = vmatmul.msk.f32.gmra.mxu1 %vm71_vm1, %v1976_v47 }
  0x61   :  { %2126 = vmatmul.msk.f32.gmra.mxu2 %vm71_vm1, %v2076_v48  ;;  %2225 = vmatmul.msk.f32.gmra.mxu3 %vm71_vm1, %v2175_v49 }
  0x63   :  { %1928 = vmatmul.msk.f32.gmra.mxu0 %vm71_vm1, %v30_v50  ;;  %2027 = vmatmul.msk.f32.gmra.mxu1 %vm71_vm1, %v1977_v51 }
  0x69   :  { %2127 = vmatmul.msk.f32.gmra.mxu2 %vm71_vm1, %v2077_v52  ;;  %2226 = vmatmul.msk.f32.gmra.mxu3 %vm71_vm1, %v2176_v53 }
  0x6b   :  { %1929 = vmatmul.msk.f32.gmra.mxu0 %vm71_vm1, %v31_v54  ;;  %2028 = vmatmul.msk.f32.gmra.mxu1 %vm71_vm1, %v1978_v55  ;;  %v2084_v55 = vld [vmem:[%s3882_s0 + $0x3a8] sm:$0xff] }
  0x71   :  { %2128 = vmatmul.msk.f32.gmra.mxu2 %vm71_vm1, %v2078_v56  ;;  %2227 = vmatmul.msk.f32.gmra.mxu3 %vm71_vm1, %v2177_v57  ;;  %v2183_v56 = vld [vmem:[%s3882_s0 + $0x530] sm:$0xff] }
  0x73   :  { %1930 = vmatmul.msk.f32.gmra.mxu0 %vm71_vm1, %v32_v58  ;;  %2029 = vmatmul.msk.f32.gmra.mxu1 %vm71_vm1, %v1979_v59 }
  0x79   :  { %2129 = vmatmul.msk.f32.gmra.mxu2 %vm71_vm1, %v2079_v60  ;;  %2228 = vmatmul.msk.f32.gmra.mxu3 %vm71_vm1, %v2178_v61  ;;  %v38_v60 = vld [vmem:[%s3882_s0 + $0x98] sm:$0xff]  ;;  %v1985_v61 = vld [vmem:[%s3882_s0 + $0x220] sm:$0xff] }
  0x7b   :  { %1931 = vmatmul.msk.f32.gmra.mxu0 %vm71_vm1, %v33_v62  ;;  %2030 = vmatmul.msk.f32.gmra.mxu1 %vm71_vm1, %v1980_v63 }
  0x81   :  { %2130 = vmatmul.msk.f32.gmra.mxu2 %vm71_vm1, %v2080_v0  ;;  %2229 = vmatmul.msk.f32.gmra.mxu3 %vm71_vm1, %v2179_v1 }
  0x83   :  { %1932 = vmatmul.msk.f32.gmra.mxu0 %vm71_vm1, %v34_v2  ;;  %2031 = vmatmul.msk.f32.gmra.mxu1 %vm71_vm1, %v1981_v3 }
  0x88   :  { %v240_v7 = vpop.f32.mrf.mxu0  ;;  %v650_v8 = vpop.f32.mrf.mxu1 }
  0x89   :  { %2131 = vmatmul.msk.f32.gmra.mxu2 %vm71_vm1, %v2081_v5  ;;  %v241_v11 = vadd.f32 %v2949_v4, %v240_v7  ;;  %v651_v12 = vadd.f32 %v2949_v4, %v650_v8  ;;  %2230 = vmatmul.msk.f32.gmra.mxu3 %vm71_vm1, %v2180_v6 }
  0x8b   :  { %2264 = vtanh.f32 %v241_v11  ;;  %1933 = vmatmul.msk.f32.gmra.mxu0 %vm71_vm1, %v35_v9  ;;  %2032 = vmatmul.msk.f32.gmra.mxu1 %vm71_vm1, %v1982_v10 }
  0x8c   :  { %2266 = vtanh.f32 %v651_v12  ;;  %v1109_v13 = vpop.f32.mrf.mxu2  ;;  %v1568_v14 = vpop.f32.mrf.mxu3  ;;  %v2085_v12 = vld [vmem:[%s3882_s0 + $0x3b0] sm:$0xff] }
  0x8d   :  { %v1110_v15 = vadd.f32 %v2949_v4, %v1109_v13  ;;  %v1569_v16 = vadd.f32 %v2949_v4, %v1568_v14  ;;  %v2184_v13 = vld [vmem:[%s3882_s0 + $0x538] sm:$0xff] }
  0x8f   :  { %2268 = vtanh.f32 %v1110_v15 }
  0x90   :  { %2270 = vtanh.f32 %v1569_v16  ;;  %v243_v19 = vpop.f32.mrf.mxu0  ;;  %v653_v20 = vpop.f32.mrf.mxu1 }
  0x91   :  { %v2265_v23 = vpop.eup %2264  ;;  %2132 = vmatmul.msk.f32.gmra.mxu2 %vm71_vm1, %v2082_v17  ;;  %v244_v24 = vadd.f32 %v2949_v4, %v243_v19  ;;  %v654_v25 = vadd.f32 %v2949_v4, %v653_v20  ;;  %2231 = vmatmul.msk.f32.gmra.mxu3 %vm71_vm1, %v2181_v18  ;;  %v39_v17 = vld [vmem:[%s3882_s0 + $0xa0] sm:$0xff]  ;;  %v1986_v18 = vld [vmem:[%s3882_s0 + $0x228] sm:$0xff] }
  0x92   :  { %v2267_v26 = vpop.eup %2266 }
  0x93   :  { %v846_v27 = vadd.f32 %v2267_v26, %v2265_v23  ;;  %2272 = vtanh.f32 %v244_v24  ;;  %1934 = vmatmul.msk.f32.gmra.mxu0 %vm71_vm1, %v36_v21  ;;  %2033 = vmatmul.msk.f32.gmra.mxu1 %vm71_vm1, %v1983_v22 }
  0x94   :  { %2274 = vtanh.f32 %v654_v25  ;;  %v1112_v28 = vpop.f32.mrf.mxu2  ;;  %v1571_v29 = vpop.f32.mrf.mxu3 }
  0x95   :  { %v2269_v30 = vpop.eup %2268  ;;  %v1113_v31 = vadd.f32 %v2949_v4, %v1112_v28  ;;  %v1572_v32 = vadd.f32 %v2949_v4, %v1571_v29 }
  0x96   :  { %v2271_v33 = vpop.eup %2270  ;;  %v1305_v34 = vadd.f32 %v2269_v30, %v846_v27 }
  0x97   :  { %2276 = vtanh.f32 %v1113_v31 }
  0x98   :  { %v1764_v37 = vadd.f32 %v2271_v33, %v1305_v34  ;;  %2278 = vtanh.f32 %v1572_v32  ;;  %v246_v38 = vpop.f32.mrf.mxu0  ;;  %v656_v39 = vpop.f32.mrf.mxu1  ;;  %v2086_v32 = vld [vmem:[%s3882_s0 + $0x3b8] sm:$0xff]  ;;  %v2185_v33 = vld [vmem:[%s3882_s0 + $0x540] sm:$0xff] }
  0x99   :  { %v2273_v42 = vpop.eup %2272  ;;  %2133 = vmatmul.msk.f32.gmra.mxu2 %vm71_vm1, %v2083_v35  ;;  %v247_v43 = vadd.f32 %v2949_v4, %v246_v38  ;;  %v657_v44 = vadd.f32 %v2949_v4, %v656_v39  ;;  %2232 = vmatmul.msk.f32.gmra.mxu3 %vm71_vm1, %v2182_v36  ;;  %v1987_v38 = vld [vmem:[%s3882_s0 + $0x230] sm:$0xff] }
  0x9a   :  { %v2275_v45 = vpop.eup %2274  ;;  %v1813_v46 = vmul.f32 0.25, %v1764_v37  ;;  %v40_v37 = vld [vmem:[%s3882_s0 + $0xa8] sm:$0xff] }
  0x9b   :  { %v847_v47 = vadd.f32 %v2275_v45, %v2273_v42  ;;  %2280 = vtanh.f32 %v247_v43  ;;  %1935 = vmatmul.msk.f32.gmra.mxu0 %vm71_vm1, %v37_v40  ;;  %2034 = vmatmul.msk.f32.gmra.mxu1 %vm71_vm1, %v1984_v41 }
  0x9c   :  { %1863 = vst.msk [vmem:[%s3884_s3] sm:$0xff] %vm1862_vm2, %v1813_v46  ;;  %2282 = vtanh.f32 %v657_v44  ;;  %v1115_v48 = vpop.f32.mrf.mxu2  ;;  %v1574_v49 = vpop.f32.mrf.mxu3 }
  0x9d   :  { %v2277_v50 = vpop.eup %2276  ;;  %v1116_v51 = vadd.f32 %v2949_v4, %v1115_v48  ;;  %v1575_v52 = vadd.f32 %v2949_v4, %v1574_v49 }
  0x9e   :  { %v2279_v53 = vpop.eup %2278  ;;  %v1306_v54 = vadd.f32 %v2277_v50, %v847_v47 }
  0x9f   :  { %2284 = vtanh.f32 %v1116_v51 }
  0xa0   :  { %v1765_v57 = vadd.f32 %v2279_v53, %v1306_v54  ;;  %2286 = vtanh.f32 %v1575_v52  ;;  %v249_v58 = vpop.f32.mrf.mxu0  ;;  %v659_v59 = vpop.f32.mrf.mxu1  ;;  %v2087_v52 = vld [vmem:[%s3882_s0 + $0x3c0] sm:$0xff]  ;;  %v2186_v53 = vld [vmem:[%s3882_s0 + $0x548] sm:$0xff] }
  0xa1   :  { %v2281_v62 = vpop.eup %2280  ;;  %2134 = vmatmul.msk.f32.gmra.mxu2 %vm71_vm1, %v2084_v55  ;;  %v250_v63 = vadd.f32 %v2949_v4, %v249_v58  ;;  %v660_v0 = vadd.f32 %v2949_v4, %v659_v59  ;;  %2233 = vmatmul.msk.f32.gmra.mxu3 %vm71_vm1, %v2183_v56  ;;  %v1988_v58 = vld [vmem:[%s3882_s0 + $0x238] sm:$0xff] }
  0xa2   :  { %v2283_v1 = vpop.eup %2282  ;;  %v1814_v2 = vmul.f32 0.25, %v1765_v57  ;;  %v41_v57 = vld [vmem:[%s3882_s0 + $0xb0] sm:$0xff] }
  0xa3   :  { %v848_v3 = vadd.f32 %v2283_v1, %v2281_v62  ;;  %2288 = vtanh.f32 %v250_v63  ;;  %1936 = vmatmul.msk.f32.gmra.mxu0 %vm71_vm1, %v38_v60  ;;  %2035 = vmatmul.msk.f32.gmra.mxu1 %vm71_vm1, %v1985_v61 }
  0xa4   :  { %1864 = vst.msk [vmem:[%s3884_s3 + $0x8] sm:$0xff] %vm1862_vm2, %v1814_v2  ;;  %2290 = vtanh.f32 %v660_v0  ;;  %v1118_v5 = vpop.f32.mrf.mxu2  ;;  %v1577_v6 = vpop.f32.mrf.mxu3 }
  0xa5   :  { %v2285_v7 = vpop.eup %2284  ;;  %v1119_v8 = vadd.f32 %v2949_v4, %v1118_v5  ;;  %v1578_v9 = vadd.f32 %v2949_v4, %v1577_v6 }
  0xa6   :  { %v2287_v10 = vpop.eup %2286  ;;  %v1307_v11 = vadd.f32 %v2285_v7, %v848_v3 }
  0xa7   :  { %2292 = vtanh.f32 %v1119_v8 }
  0xa8   :  { %v1766_v14 = vadd.f32 %v2287_v10, %v1307_v11  ;;  %2294 = vtanh.f32 %v1578_v9  ;;  %v252_v15 = vpop.f32.mrf.mxu0  ;;  %v662_v16 = vpop.f32.mrf.mxu1  ;;  %v2088_v9 = vld [vmem:[%s3882_s0 + $0x3c8] sm:$0xff]  ;;  %v2187_v10 = vld [vmem:[%s3882_s0 + $0x550] sm:$0xff] }
  0xa9   :  { %v2289_v19 = vpop.eup %2288  ;;  %2135 = vmatmul.msk.f32.gmra.mxu2 %vm71_vm1, %v2085_v12  ;;  %v253_v20 = vadd.f32 %v2949_v4, %v252_v15  ;;  %v663_v21 = vadd.f32 %v2949_v4, %v662_v16  ;;  %2234 = vmatmul.msk.f32.gmra.mxu3 %vm71_vm1, %v2184_v13  ;;  %v1989_v15 = vld [vmem:[%s3882_s0 + $0x240] sm:$0xff] }
  0xaa   :  { %v2291_v22 = vpop.eup %2290  ;;  %v1815_v23 = vmul.f32 0.25, %v1766_v14  ;;  %v42_v14 = vld [vmem:[%s3882_s0 + $0xb8] sm:$0xff] }
  0xab   :  { %v849_v24 = vadd.f32 %v2291_v22, %v2289_v19  ;;  %2296 = vtanh.f32 %v253_v20  ;;  %1937 = vmatmul.msk.f32.gmra.mxu0 %vm71_vm1, %v39_v17  ;;  %2036 = vmatmul.msk.f32.gmra.mxu1 %vm71_vm1, %v1986_v18 }
  0xac   :  { %1865 = vst.msk [vmem:[%s3884_s3 + $0x10] sm:$0xff] %vm1862_vm2, %v1815_v23  ;;  %2298 = vtanh.f32 %v663_v21  ;;  %v1121_v25 = vpop.f32.mrf.mxu2  ;;  %v1580_v26 = vpop.f32.mrf.mxu3 }
  0xad   :  { %v2293_v27 = vpop.eup %2292  ;;  %v1122_v28 = vadd.f32 %v2949_v4, %v1121_v25  ;;  %v1581_v29 = vadd.f32 %v2949_v4, %v1580_v26 }
  0xae   :  { %v2295_v30 = vpop.eup %2294  ;;  %v1308_v31 = vadd.f32 %v2293_v27, %v849_v24 }
  0xaf   :  { %2300 = vtanh.f32 %v1122_v28 }
  0xb0   :  { %v1767_v34 = vadd.f32 %v2295_v30, %v1308_v31  ;;  %2302 = vtanh.f32 %v1581_v29  ;;  %v255_v35 = vpop.f32.mrf.mxu0  ;;  %v665_v36 = vpop.f32.mrf.mxu1  ;;  %v2089_v29 = vld [vmem:[%s3882_s0 + $0x3d0] sm:$0xff]  ;;  %v2188_v30 = vld [vmem:[%s3882_s0 + $0x558] sm:$0xff] }
  0xb1   :  { %v2297_v39 = vpop.eup %2296  ;;  %2136 = vmatmul.msk.f32.gmra.mxu2 %vm71_vm1, %v2086_v32  ;;  %v256_v40 = vadd.f32 %v2949_v4, %v255_v35  ;;  %v666_v41 = vadd.f32 %v2949_v4, %v665_v36  ;;  %2235 = vmatmul.msk.f32.gmra.mxu3 %vm71_vm1, %v2185_v33  ;;  %v1990_v35 = vld [vmem:[%s3882_s0 + $0x248] sm:$0xff] }
  0xb2   :  { %v2299_v42 = vpop.eup %2298  ;;  %v1816_v43 = vmul.f32 0.25, %v1767_v34  ;;  %v43_v34 = vld [vmem:[%s3882_s0 + $0xc0] sm:$0xff] }
  0xb3   :  { %v850_v44 = vadd.f32 %v2299_v42, %v2297_v39  ;;  %2304 = vtanh.f32 %v256_v40  ;;  %1938 = vmatmul.msk.f32.gmra.mxu0 %vm71_vm1, %v40_v37  ;;  %2037 = vmatmul.msk.f32.gmra.mxu1 %vm71_vm1, %v1987_v38 }
  0xb4   :  { %1866 = vst.msk [vmem:[%s3884_s3 + $0x18] sm:$0xff] %vm1862_vm2, %v1816_v43  ;;  %2306 = vtanh.f32 %v666_v41  ;;  %v1124_v45 = vpop.f32.mrf.mxu2  ;;  %v1583_v46 = vpop.f32.mrf.mxu3 }
  0xb5   :  { %v2301_v47 = vpop.eup %2300  ;;  %v1125_v48 = vadd.f32 %v2949_v4, %v1124_v45  ;;  %v1584_v49 = vadd.f32 %v2949_v4, %v1583_v46 }
  0xb6   :  { %v2303_v50 = vpop.eup %2302  ;;  %v1309_v51 = vadd.f32 %v2301_v47, %v850_v44 }
  0xb7   :  { %2308 = vtanh.f32 %v1125_v48 }
  0xb8   :  { %v1768_v54 = vadd.f32 %v2303_v50, %v1309_v51  ;;  %2310 = vtanh.f32 %v1584_v49  ;;  %v258_v55 = vpop.f32.mrf.mxu0  ;;  %v668_v56 = vpop.f32.mrf.mxu1  ;;  %v2090_v49 = vld [vmem:[%s3882_s0 + $0x3d8] sm:$0xff]  ;;  %v2189_v50 = vld [vmem:[%s3882_s0 + $0x560] sm:$0xff] }
  0xb9   :  { %v2305_v59 = vpop.eup %2304  ;;  %2137 = vmatmul.msk.f32.gmra.mxu2 %vm71_vm1, %v2087_v52  ;;  %v259_v60 = vadd.f32 %v2949_v4, %v258_v55  ;;  %v669_v61 = vadd.f32 %v2949_v4, %v668_v56  ;;  %2236 = vmatmul.msk.f32.gmra.mxu3 %vm71_vm1, %v2186_v53  ;;  %v1991_v55 = vld [vmem:[%s3882_s0 + $0x250] sm:$0xff] }
  0xba   :  { %v2307_v62 = vpop.eup %2306  ;;  %v1817_v63 = vmul.f32 0.25, %v1768_v54  ;;  %v44_v54 = vld [vmem:[%s3882_s0 + $0xc8] sm:$0xff] }
  0xbb   :  { %v851_v0 = vadd.f32 %v2307_v62, %v2305_v59  ;;  %2312 = vtanh.f32 %v259_v60  ;;  %1939 = vmatmul.msk.f32.gmra.mxu0 %vm71_vm1, %v41_v57  ;;  %2038 = vmatmul.msk.f32.gmra.mxu1 %vm71_vm1, %v1988_v58 }
  0xbc   :  { %1867 = vst.msk [vmem:[%s3884_s3 + $0x20] sm:$0xff] %vm1862_vm2, %v1817_v63  ;;  %2314 = vtanh.f32 %v669_v61  ;;  %v1127_v1 = vpop.f32.mrf.mxu2  ;;  %v1586_v2 = vpop.f32.mrf.mxu3 }
  0xbd   :  { %v2309_v3 = vpop.eup %2308  ;;  %v1128_v5 = vadd.f32 %v2949_v4, %v1127_v1  ;;  %v1587_v6 = vadd.f32 %v2949_v4, %v1586_v2 }
  0xbe   :  { %v2311_v7 = vpop.eup %2310  ;;  %v1310_v8 = vadd.f32 %v2309_v3, %v851_v0 }
  0xbf   :  { %2316 = vtanh.f32 %v1128_v5 }
  0xc0   :  { %v1769_v11 = vadd.f32 %v2311_v7, %v1310_v8  ;;  %2318 = vtanh.f32 %v1587_v6  ;;  %v261_v12 = vpop.f32.mrf.mxu0  ;;  %v671_v13 = vpop.f32.mrf.mxu1  ;;  %v2091_v6 = vld [vmem:[%s3882_s0 + $0x3e0] sm:$0xff]  ;;  %v2190_v7 = vld [vmem:[%s3882_s0 + $0x568] sm:$0xff] }
  0xc1   :  { %v2313_v16 = vpop.eup %2312  ;;  %2138 = vmatmul.msk.f32.gmra.mxu2 %vm71_vm1, %v2088_v9  ;;  %v262_v17 = vadd.f32 %v2949_v4, %v261_v12  ;;  %v672_v18 = vadd.f32 %v2949_v4, %v671_v13  ;;  %2237 = vmatmul.msk.f32.gmra.mxu3 %vm71_vm1, %v2187_v10  ;;  %v1992_v12 = vld [vmem:[%s3882_s0 + $0x258] sm:$0xff] }
  0xc2   :  { %v2315_v19 = vpop.eup %2314  ;;  %v1818_v20 = vmul.f32 0.25, %v1769_v11  ;;  %v45_v11 = vld [vmem:[%s3882_s0 + $0xd0] sm:$0xff] }
  0xc3   :  { %v852_v21 = vadd.f32 %v2315_v19, %v2313_v16  ;;  %2320 = vtanh.f32 %v262_v17  ;;  %1940 = vmatmul.msk.f32.gmra.mxu0 %vm71_vm1, %v42_v14  ;;  %2039 = vmatmul.msk.f32.gmra.mxu1 %vm71_vm1, %v1989_v15 }
  0xc4   :  { %1868 = vst.msk [vmem:[%s3884_s3 + $0x28] sm:$0xff] %vm1862_vm2, %v1818_v20  ;;  %2322 = vtanh.f32 %v672_v18  ;;  %v1130_v22 = vpop.f32.mrf.mxu2  ;;  %v1589_v23 = vpop.f32.mrf.mxu3 }
  0xc5   :  { %v2317_v24 = vpop.eup %2316  ;;  %v1131_v25 = vadd.f32 %v2949_v4, %v1130_v22  ;;  %v1590_v26 = vadd.f32 %v2949_v4, %v1589_v23 }
  0xc6   :  { %v2319_v27 = vpop.eup %2318  ;;  %v1311_v28 = vadd.f32 %v2317_v24, %v852_v21 }
  0xc7   :  { %2324 = vtanh.f32 %v1131_v25 }
  0xc8   :  { %v1770_v31 = vadd.f32 %v2319_v27, %v1311_v28  ;;  %2326 = vtanh.f32 %v1590_v26  ;;  %v264_v32 = vpop.f32.mrf.mxu0  ;;  %v674_v33 = vpop.f32.mrf.mxu1  ;;  %v2092_v26 = vld [vmem:[%s3882_s0 + $0x3e8] sm:$0xff]  ;;  %v2191_v27 = vld [vmem:[%s3882_s0 + $0x570] sm:$0xff] }
  0xc9   :  { %v2321_v36 = vpop.eup %2320  ;;  %2139 = vmatmul.msk.f32.gmra.mxu2 %vm71_vm1, %v2089_v29  ;;  %v265_v37 = vadd.f32 %v2949_v4, %v264_v32  ;;  %v675_v38 = vadd.f32 %v2949_v4, %v674_v33  ;;  %2238 = vmatmul.msk.f32.gmra.mxu3 %vm71_vm1, %v2188_v30  ;;  %v1993_v32 = vld [vmem:[%s3882_s0 + $0x260] sm:$0xff] }
  0xca   :  { %v2323_v39 = vpop.eup %2322  ;;  %v1819_v40 = vmul.f32 0.25, %v1770_v31  ;;  %v46_v31 = vld [vmem:[%s3882_s0 + $0xd8] sm:$0xff] }
  0xcb   :  { %v853_v41 = vadd.f32 %v2323_v39, %v2321_v36  ;;  %2328 = vtanh.f32 %v265_v37  ;;  %1941 = vmatmul.msk.f32.gmra.mxu0 %vm71_vm1, %v43_v34  ;;  %2040 = vmatmul.msk.f32.gmra.mxu1 %vm71_vm1, %v1990_v35 }
  0xcc   :  { %1869 = vst.msk [vmem:[%s3884_s3 + $0x30] sm:$0xff] %vm1862_vm2, %v1819_v40  ;;  %2330 = vtanh.f32 %v675_v38  ;;  %v1133_v42 = vpop.f32.mrf.mxu2  ;;  %v1592_v43 = vpop.f32.mrf.mxu3 }
  0xcd   :  { %v2325_v44 = vpop.eup %2324  ;;  %v1134_v45 = vadd.f32 %v2949_v4, %v1133_v42  ;;  %v1593_v46 = vadd.f32 %v2949_v4, %v1592_v43 }
  0xce   :  { %v2327_v47 = vpop.eup %2326  ;;  %v1312_v48 = vadd.f32 %v2325_v44, %v853_v41 }
  0xcf   :  { %2332 = vtanh.f32 %v1134_v45 }
  0xd0   :  { %v1771_v51 = vadd.f32 %v2327_v47, %v1312_v48  ;;  %2334 = vtanh.f32 %v1593_v46  ;;  %v267_v52 = vpop.f32.mrf.mxu0  ;;  %v677_v53 = vpop.f32.mrf.mxu1  ;;  %v2093_v46 = vld [vmem:[%s3882_s0 + $0x3f0] sm:$0xff]  ;;  %v2192_v47 = vld [vmem:[%s3882_s0 + $0x578] sm:$0xff] }
  0xd1   :  { %v2329_v56 = vpop.eup %2328  ;;  %2140 = vmatmul.msk.f32.gmra.mxu2 %vm71_vm1, %v2090_v49  ;;  %v268_v57 = vadd.f32 %v2949_v4, %v267_v52  ;;  %v678_v58 = vadd.f32 %v2949_v4, %v677_v53  ;;  %2239 = vmatmul.msk.f32.gmra.mxu3 %vm71_vm1, %v2189_v50  ;;  %v1994_v52 = vld [vmem:[%s3882_s0 + $0x268] sm:$0xff] }
  0xd2   :  { %v2331_v59 = vpop.eup %2330  ;;  %v1820_v60 = vmul.f32 0.25, %v1771_v51  ;;  %v47_v51 = vld [vmem:[%s3882_s0 + $0xe0] sm:$0xff] }
  0xd3   :  { %v854_v61 = vadd.f32 %v2331_v59, %v2329_v56  ;;  %2336 = vtanh.f32 %v268_v57  ;;  %1942 = vmatmul.msk.f32.gmra.mxu0 %vm71_vm1, %v44_v54  ;;  %2041 = vmatmul.msk.f32.gmra.mxu1 %vm71_vm1, %v1991_v55 }
  0xd4   :  { %1870 = vst.msk [vmem:[%s3884_s3 + $0x38] sm:$0xff] %vm1862_vm2, %v1820_v60  ;;  %2338 = vtanh.f32 %v678_v58  ;;  %v1136_v62 = vpop.f32.mrf.mxu2  ;;  %v1595_v63 = vpop.f32.mrf.mxu3 }
  0xd5   :  { %v2333_v0 = vpop.eup %2332  ;;  %v1137_v1 = vadd.f32 %v2949_v4, %v1136_v62  ;;  %v1596_v2 = vadd.f32 %v2949_v4, %v1595_v63 }
  0xd6   :  { %v2335_v3 = vpop.eup %2334  ;;  %v1313_v5 = vadd.f32 %v2333_v0, %v854_v61 }
  0xd7   :  { %2340 = vtanh.f32 %v1137_v1 }
  0xd8   :  { %v1772_v8 = vadd.f32 %v2335_v3, %v1313_v5  ;;  %2342 = vtanh.f32 %v1596_v2  ;;  %v270_v9 = vpop.f32.mrf.mxu0  ;;  %v680_v10 = vpop.f32.mrf.mxu1  ;;  %v2094_v2 = vld [vmem:[%s3882_s0 + $0x3f8] sm:$0xff]  ;;  %v2193_v3 = vld [vmem:[%s3882_s0 + $0x580] sm:$0xff] }
  0xd9   :  { %v2337_v13 = vpop.eup %2336  ;;  %2141 = vmatmul.msk.f32.gmra.mxu2 %vm71_vm1, %v2091_v6  ;;  %v271_v14 = vadd.f32 %v2949_v4, %v270_v9  ;;  %v681_v15 = vadd.f32 %v2949_v4, %v680_v10  ;;  %2240 = vmatmul.msk.f32.gmra.mxu3 %vm71_vm1, %v2190_v7  ;;  %v1995_v9 = vld [vmem:[%s3882_s0 + $0x270] sm:$0xff] }
  0xda   :  { %v2339_v16 = vpop.eup %2338  ;;  %v1821_v17 = vmul.f32 0.25, %v1772_v8  ;;  %v48_v8 = vld [vmem:[%s3882_s0 + $0xe8] sm:$0xff] }
  0xdb   :  { %v855_v18 = vadd.f32 %v2339_v16, %v2337_v13  ;;  %2344 = vtanh.f32 %v271_v14  ;;  %1943 = vmatmul.msk.f32.gmra.mxu0 %vm71_vm1, %v45_v11  ;;  %2042 = vmatmul.msk.f32.gmra.mxu1 %vm71_vm1, %v1992_v12 }
  0xdc   :  { %1871 = vst.msk [vmem:[%s3884_s3 + $0x40] sm:$0xff] %vm1862_vm2, %v1821_v17  ;;  %2346 = vtanh.f32 %v681_v15  ;;  %v1139_v19 = vpop.f32.mrf.mxu2  ;;  %v1598_v20 = vpop.f32.mrf.mxu3 }
  0xdd   :  { %v2341_v21 = vpop.eup %2340  ;;  %v1140_v22 = vadd.f32 %v2949_v4, %v1139_v19  ;;  %v1599_v23 = vadd.f32 %v2949_v4, %v1598_v20 }
  0xde   :  { %v2343_v24 = vpop.eup %2342  ;;  %v1314_v25 = vadd.f32 %v2341_v21, %v855_v18 }
  0xdf   :  { %2348 = vtanh.f32 %v1140_v22 }
  0xe0   :  { %v1773_v28 = vadd.f32 %v2343_v24, %v1314_v25  ;;  %2350 = vtanh.f32 %v1599_v23  ;;  %v273_v29 = vpop.f32.mrf.mxu0  ;;  %v683_v30 = vpop.f32.mrf.mxu1  ;;  %v2095_v23 = vld [vmem:[%s3882_s0 + $0x400] sm:$0xff]  ;;  %v2194_v24 = vld [vmem:[%s3882_s0 + $0x588] sm:$0xff] }
  0xe1   :  { %v2345_v33 = vpop.eup %2344  ;;  %2142 = vmatmul.msk.f32.gmra.mxu2 %vm71_vm1, %v2092_v26  ;;  %v274_v34 = vadd.f32 %v2949_v4, %v273_v29  ;;  %v684_v35 = vadd.f32 %v2949_v4, %v683_v30  ;;  %2241 = vmatmul.msk.f32.gmra.mxu3 %vm71_vm1, %v2191_v27  ;;  %v1996_v29 = vld [vmem:[%s3882_s0 + $0x278] sm:$0xff] }
  0xe2   :  { %v2347_v36 = vpop.eup %2346  ;;  %v1822_v37 = vmul.f32 0.25, %v1773_v28  ;;  %v49_v28 = vld [vmem:[%s3882_s0 + $0xf0] sm:$0xff] }
  0xe3   :  { %v856_v38 = vadd.f32 %v2347_v36, %v2345_v33  ;;  %2352 = vtanh.f32 %v274_v34  ;;  %1944 = vmatmul.msk.f32.gmra.mxu0 %vm71_vm1, %v46_v31  ;;  %2043 = vmatmul.msk.f32.gmra.mxu1 %vm71_vm1, %v1993_v32 }
  0xe4   :  { %1872 = vst.msk [vmem:[%s3884_s3 + $0x48] sm:$0xff] %vm1862_vm2, %v1822_v37  ;;  %2354 = vtanh.f32 %v684_v35  ;;  %v1142_v39 = vpop.f32.mrf.mxu2  ;;  %v1601_v40 = vpop.f32.mrf.mxu3 }
  0xe5   :  { %v2349_v41 = vpop.eup %2348  ;;  %v1143_v42 = vadd.f32 %v2949_v4, %v1142_v39  ;;  %v1602_v43 = vadd.f32 %v2949_v4, %v1601_v40 }
  0xe6   :  { %v2351_v44 = vpop.eup %2350  ;;  %v1315_v45 = vadd.f32 %v2349_v41, %v856_v38 }
  0xe7   :  { %2356 = vtanh.f32 %v1143_v42 }
  0xe8   :  { %v1774_v48 = vadd.f32 %v2351_v44, %v1315_v45  ;;  %2358 = vtanh.f32 %v1602_v43  ;;  %v276_v49 = vpop.f32.mrf.mxu0  ;;  %v686_v50 = vpop.f32.mrf.mxu1  ;;  %v2096_v43 = vld [vmem:[%s3882_s0 + $0x408] sm:$0xff]  ;;  %v2195_v44 = vld [vmem:[%s3882_s0 + $0x590] sm:$0xff] }
  0xe9   :  { %v2353_v53 = vpop.eup %2352  ;;  %2143 = vmatmul.msk.f32.gmra.mxu2 %vm71_vm1, %v2093_v46  ;;  %v277_v54 = vadd.f32 %v2949_v4, %v276_v49  ;;  %v687_v55 = vadd.f32 %v2949_v4, %v686_v50  ;;  %2242 = vmatmul.msk.f32.gmra.mxu3 %vm71_vm1, %v2192_v47  ;;  %v1997_v49 = vld [vmem:[%s3882_s0 + $0x280] sm:$0xff] }
  0xea   :  { %v2355_v56 = vpop.eup %2354  ;;  %v1823_v57 = vmul.f32 0.25, %v1774_v48  ;;  %v50_v48 = vld [vmem:[%s3882_s0 + $0xf8] sm:$0xff] }
  0xeb   :  { %v857_v58 = vadd.f32 %v2355_v56, %v2353_v53  ;;  %2360 = vtanh.f32 %v277_v54  ;;  %1945 = vmatmul.msk.f32.gmra.mxu0 %vm71_vm1, %v47_v51  ;;  %2044 = vmatmul.msk.f32.gmra.mxu1 %vm71_vm1, %v1994_v52 }
  0xec   :  { %1873 = vst.msk [vmem:[%s3884_s3 + $0x50] sm:$0xff] %vm1862_vm2, %v1823_v57  ;;  %2362 = vtanh.f32 %v687_v55  ;;  %v1145_v59 = vpop.f32.mrf.mxu2  ;;  %v1604_v60 = vpop.f32.mrf.mxu3 }
  0xed   :  { %v2357_v61 = vpop.eup %2356  ;;  %v1146_v62 = vadd.f32 %v2949_v4, %v1145_v59  ;;  %v1605_v63 = vadd.f32 %v2949_v4, %v1604_v60 }
  0xee   :  { %v2359_v0 = vpop.eup %2358  ;;  %v1316_v1 = vadd.f32 %v2357_v61, %v857_v58 }
  0xef   :  { %2364 = vtanh.f32 %v1146_v62 }
  0xf0   :  { %v1775_v5 = vadd.f32 %v2359_v0, %v1316_v1  ;;  %2366 = vtanh.f32 %v1605_v63  ;;  %v279_v6 = vpop.f32.mrf.mxu0  ;;  %v689_v7 = vpop.f32.mrf.mxu1  ;;  %v2097_v63 = vld [vmem:[%s3882_s0 + $0x410] sm:$0xff]  ;;  %v2196_v0 = vld [vmem:[%s3882_s0 + $0x598] sm:$0xff] }
  0xf1   :  { %v2361_v10 = vpop.eup %2360  ;;  %2144 = vmatmul.msk.f32.gmra.mxu2 %vm71_vm1, %v2094_v2  ;;  %v280_v11 = vadd.f32 %v2949_v4, %v279_v6  ;;  %v690_v12 = vadd.f32 %v2949_v4, %v689_v7  ;;  %2243 = vmatmul.msk.f32.gmra.mxu3 %vm71_vm1, %v2193_v3  ;;  %v1998_v6 = vld [vmem:[%s3882_s0 + $0x288] sm:$0xff] }
  0xf2   :  { %v2363_v13 = vpop.eup %2362  ;;  %v1824_v14 = vmul.f32 0.25, %v1775_v5  ;;  %v51_v5 = vld [vmem:[%s3882_s0 + $0x100] sm:$0xff] }
  0xf3   :  { %v858_v15 = vadd.f32 %v2363_v13, %v2361_v10  ;;  %2368 = vtanh.f32 %v280_v11  ;;  %1946 = vmatmul.msk.f32.gmra.mxu0 %vm71_vm1, %v48_v8  ;;  %2045 = vmatmul.msk.f32.gmra.mxu1 %vm71_vm1, %v1995_v9 }
  0xf4   :  { %1874 = vst.msk [vmem:[%s3884_s3 + $0x58] sm:$0xff] %vm1862_vm2, %v1824_v14  ;;  %2370 = vtanh.f32 %v690_v12  ;;  %v1148_v16 = vpop.f32.mrf.mxu2  ;;  %v1607_v17 = vpop.f32.mrf.mxu3 }
  0xf5   :  { %v2365_v18 = vpop.eup %2364  ;;  %v1149_v19 = vadd.f32 %v2949_v4, %v1148_v16  ;;  %v1608_v20 = vadd.f32 %v2949_v4, %v1607_v17 }
  0xf6   :  { %v2367_v21 = vpop.eup %2366  ;;  %v1317_v22 = vadd.f32 %v2365_v18, %v858_v15 }
  0xf7   :  { %2372 = vtanh.f32 %v1149_v19 }
  0xf8   :  { %v1776_v25 = vadd.f32 %v2367_v21, %v1317_v22  ;;  %2374 = vtanh.f32 %v1608_v20  ;;  %v282_v26 = vpop.f32.mrf.mxu0  ;;  %v692_v27 = vpop.f32.mrf.mxu1  ;;  %v2098_v20 = vld [vmem:[%s3882_s0 + $0x418] sm:$0xff]  ;;  %v2197_v21 = vld [vmem:[%s3882_s0 + $0x5a0] sm:$0xff] }
  0xf9   :  { %v2369_v30 = vpop.eup %2368  ;;  %2145 = vmatmul.msk.f32.gmra.mxu2 %vm71_vm1, %v2095_v23  ;;  %v283_v31 = vadd.f32 %v2949_v4, %v282_v26  ;;  %v693_v32 = vadd.f32 %v2949_v4, %v692_v27  ;;  %2244 = vmatmul.msk.f32.gmra.mxu3 %vm71_vm1, %v2194_v24  ;;  %v1999_v26 = vld [vmem:[%s3882_s0 + $0x290] sm:$0xff] }
  0xfa   :  { %v2371_v33 = vpop.eup %2370  ;;  %v1825_v34 = vmul.f32 0.25, %v1776_v25  ;;  %v52_v25 = vld [vmem:[%s3882_s0 + $0x108] sm:$0xff] }
  0xfb   :  { %v859_v35 = vadd.f32 %v2371_v33, %v2369_v30  ;;  %2376 = vtanh.f32 %v283_v31  ;;  %1947 = vmatmul.msk.f32.gmra.mxu0 %vm71_vm1, %v49_v28  ;;  %2046 = vmatmul.msk.f32.gmra.mxu1 %vm71_vm1, %v1996_v29 }
  0xfc   :  { %1875 = vst.msk [vmem:[%s3884_s3 + $0x60] sm:$0xff] %vm1862_vm2, %v1825_v34  ;;  %2378 = vtanh.f32 %v693_v32  ;;  %v1151_v36 = vpop.f32.mrf.mxu2  ;;  %v1610_v37 = vpop.f32.mrf.mxu3 }
  0xfd   :  { %v2373_v38 = vpop.eup %2372  ;;  %v1152_v39 = vadd.f32 %v2949_v4, %v1151_v36  ;;  %v1611_v40 = vadd.f32 %v2949_v4, %v1610_v37 }
  0xfe   :  { %v2375_v41 = vpop.eup %2374  ;;  %v1318_v42 = vadd.f32 %v2373_v38, %v859_v35 }
  0xff   :  { %2380 = vtanh.f32 %v1152_v39 }
 0x100   :  { %v1777_v45 = vadd.f32 %v2375_v41, %v1318_v42  ;;  %2382 = vtanh.f32 %v1611_v40  ;;  %v285_v46 = vpop.f32.mrf.mxu0  ;;  %v695_v47 = vpop.f32.mrf.mxu1  ;;  %v2099_v40 = vld [vmem:[%s3882_s0 + $0x420] sm:$0xff]  ;;  %v2198_v41 = vld [vmem:[%s3882_s0 + $0x5a8] sm:$0xff] }
 0x101   :  { %v2377_v50 = vpop.eup %2376  ;;  %2146 = vmatmul.msk.f32.gmra.mxu2 %vm71_vm1, %v2096_v43  ;;  %v286_v51 = vadd.f32 %v2949_v4, %v285_v46  ;;  %v696_v52 = vadd.f32 %v2949_v4, %v695_v47  ;;  %2245 = vmatmul.msk.f32.gmra.mxu3 %vm71_vm1, %v2195_v44  ;;  %v3391_v47 = vld [vmem:[%s3883_s2] ss:$0 sm:$0xff] }
 0x102   :  { %v2379_v53 = vpop.eup %2378  ;;  %v1826_v54 = vmul.f32 0.25, %v1777_v45  ;;  %v53_v45 = vld [vmem:[%s3882_s0 + $0x110] sm:$0xff] }
 0x103   :  { %v860_v55 = vadd.f32 %v2379_v53, %v2377_v50  ;;  %2384 = vtanh.f32 %v286_v51  ;;  %1948 = vmatmul.msk.f32.gmra.mxu0 %vm71_vm1, %v50_v48  ;;  %2047 = vmatmul.msk.f32.gmra.mxu1 %vm71_vm1, %v1997_v49 }
 0x104   :  { %1876 = vst.msk [vmem:[%s3884_s3 + $0x68] sm:$0xff] %vm1862_vm2, %v1826_v54  ;;  %2386 = vtanh.f32 %v696_v52  ;;  %v1154_v56 = vpop.f32.mrf.mxu2  ;;  %v1613_v57 = vpop.f32.mrf.mxu3 }
 0x105   :  { %v2381_v58 = vpop.eup %2380  ;;  %v1155_v59 = vadd.f32 %v2949_v4, %v1154_v56  ;;  %v1614_v60 = vadd.f32 %v2949_v4, %v1613_v57 }
 0x106   :  { %v2383_v61 = vpop.eup %2382  ;;  %v1319_v62 = vadd.f32 %v2381_v58, %v860_v55 }
 0x107   :  { %2388 = vtanh.f32 %v1155_v59 }
 0x108   :  { %v1778_v1 = vadd.f32 %v2383_v61, %v1319_v62  ;;  %2390 = vtanh.f32 %v1614_v60  ;;  %v288_v2 = vpop.f32.mrf.mxu0  ;;  %v698_v3 = vpop.f32.mrf.mxu1  ;;  %v2100_v60 = vld [vmem:[%s3882_s0 + $0x428] sm:$0xff]  ;;  %v2199_v61 = vld [vmem:[%s3882_s0 + $0x5b0] sm:$0xff] }
 0x109   :  { %v2385_v7 = vpop.eup %2384  ;;  %2147 = vmatmul.msk.f32.gmra.mxu2 %vm71_vm1, %v2097_v63  ;;  %v289_v8 = vadd.f32 %v2949_v4, %v288_v2  ;;  %v699_v9 = vadd.f32 %v2949_v4, %v698_v3  ;;  %2246 = vmatmul.msk.f32.gmra.mxu3 %vm71_vm1, %v2196_v0  ;;  %v2001_v2 = vld [vmem:[%s3882_s0 + $0x2a0] sm:$0xff] }
 0x10a   :  { %v2387_v10 = vpop.eup %2386  ;;  %v1827_v11 = vmul.f32 0.25, %v1778_v1  ;;  %v54_v1 = vld [vmem:[%s3882_s0 + $0x118] sm:$0xff] }
 0x10b   :  { %v861_v12 = vadd.f32 %v2387_v10, %v2385_v7  ;;  %2392 = vtanh.f32 %v289_v8  ;;  %1949 = vmatmul.msk.f32.gmra.mxu0 %vm71_vm1, %v51_v5  ;;  %2048 = vmatmul.msk.f32.gmra.mxu1 %vm71_vm1, %v1998_v6 }
 0x10c   :  { %1877 = vst.msk [vmem:[%s3884_s3 + $0x70] sm:$0xff] %vm1862_vm2, %v1827_v11  ;;  %2394 = vtanh.f32 %v699_v9  ;;  %v1157_v13 = vpop.f32.mrf.mxu2  ;;  %v1616_v14 = vpop.f32.mrf.mxu3 }
 0x10d   :  { %v2389_v15 = vpop.eup %2388  ;;  %v1158_v16 = vadd.f32 %v2949_v4, %v1157_v13  ;;  %v1617_v17 = vadd.f32 %v2949_v4, %v1616_v14 }
 0x10e   :  { %v2391_v18 = vpop.eup %2390  ;;  %v1320_v19 = vadd.f32 %v2389_v15, %v861_v12 }
 0x10f   :  { %2396 = vtanh.f32 %v1158_v16 }
 0x110   :  { %v1779_v22 = vadd.f32 %v2391_v18, %v1320_v19  ;;  %2398 = vtanh.f32 %v1617_v17  ;;  %v291_v23 = vpop.f32.mrf.mxu0  ;;  %v701_v24 = vpop.f32.mrf.mxu1  ;;  %v2101_v17 = vld [vmem:[%s3882_s0 + $0x430] sm:$0xff]  ;;  %v2200_v18 = vld [vmem:[%s3882_s0 + $0x5b8] sm:$0xff] }
 0x111   :  { %v2393_v27 = vpop.eup %2392  ;;  %2148 = vmatmul.msk.f32.gmra.mxu2 %vm71_vm1, %v2098_v20  ;;  %v292_v28 = vadd.f32 %v2949_v4, %v291_v23  ;;  %v702_v29 = vadd.f32 %v2949_v4, %v701_v24  ;;  %2247 = vmatmul.msk.f32.gmra.mxu3 %vm71_vm1, %v2197_v21  ;;  %v2002_v23 = vld [vmem:[%s3882_s0 + $0x2a8] sm:$0xff] }
 0x112   :  { %v2395_v30 = vpop.eup %2394  ;;  %v1828_v31 = vmul.f32 0.25, %v1779_v22  ;;  %v55_v22 = vld [vmem:[%s3882_s0 + $0x120] sm:$0xff] }
 0x113   :  { %v862_v32 = vadd.f32 %v2395_v30, %v2393_v27  ;;  %2400 = vtanh.f32 %v292_v28  ;;  %1950 = vmatmul.msk.f32.gmra.mxu0 %vm71_vm1, %v52_v25  ;;  %2049 = vmatmul.msk.f32.gmra.mxu1 %vm71_vm1, %v1999_v26 }
 0x114   :  { %1878 = vst.msk [vmem:[%s3884_s3 + $0x78] sm:$0xff] %vm1862_vm2, %v1828_v31  ;;  %2402 = vtanh.f32 %v702_v29  ;;  %v1160_v33 = vpop.f32.mrf.mxu2  ;;  %v1619_v34 = vpop.f32.mrf.mxu3 }
 0x115   :  { %v2397_v35 = vpop.eup %2396  ;;  %v1161_v36 = vadd.f32 %v2949_v4, %v1160_v33  ;;  %v1620_v37 = vadd.f32 %v2949_v4, %v1619_v34  ;;  %v2000_v4 = vld [vmem:[%s3882_s0 + $0x298] sm:$0xff] }
 0x116   :  { %v2399_v38 = vpop.eup %2398  ;;  %v1321_v39 = vadd.f32 %v2397_v35, %v862_v32 }
 0x117   :  { %2404 = vtanh.f32 %v1161_v36 }
 0x118   :  { %v1780_v42 = vadd.f32 %v2399_v38, %v1321_v39  ;;  %2406 = vtanh.f32 %v1620_v37  ;;  %v294_v43 = vpop.f32.mrf.mxu0  ;;  %v704_v44 = vpop.f32.mrf.mxu1  ;;  %v2102_v37 = vld [vmem:[%s3882_s0 + $0x438] sm:$0xff]  ;;  %v2201_v38 = vld [vmem:[%s3882_s0 + $0x5c0] sm:$0xff] }
 0x119   :  { %v2401_v46 = vpop.eup %2400  ;;  %2149 = vmatmul.msk.f32.gmra.mxu2 %vm71_vm1, %v2099_v40  ;;  %v295_v48 = vadd.f32 %v3391_v47, %v294_v43  ;;  %v705_v49 = vadd.f32 %v3391_v47, %v704_v44  ;;  %2248 = vmatmul.msk.f32.gmra.mxu3 %vm71_vm1, %v2198_v41  ;;  %v2003_v43 = vld [vmem:[%s3882_s0 + $0x2b0] sm:$0xff] }
 0x11a   :  { %v2403_v50 = vpop.eup %2402  ;;  %v1829_v51 = vmul.f32 0.25, %v1780_v42  ;;  %v56_v42 = vld [vmem:[%s3882_s0 + $0x128] sm:$0xff] }
 0x11b   :  { %v863_v52 = vadd.f32 %v2403_v50, %v2401_v46  ;;  %2408 = vtanh.f32 %v295_v48  ;;  %1951 = vmatmul.msk.f32.gmra.mxu0 %vm71_vm1, %v53_v45  ;;  %2050 = vmatmul.msk.f32.gmra.mxu1 %vm71_vm1, %v2000_v4 }
 0x11c   :  { %1879 = vst.msk [vmem:[%s3884_s3 + $0x80] sm:$0xff] %vm1862_vm2, %v1829_v51  ;;  %2410 = vtanh.f32 %v705_v49  ;;  %v1163_v53 = vpop.f32.mrf.mxu2  ;;  %v1622_v54 = vpop.f32.mrf.mxu3 }
 0x11d   :  { %v2405_v55 = vpop.eup %2404  ;;  %v1164_v56 = vadd.f32 %v3391_v47, %v1163_v53  ;;  %v1623_v57 = vadd.f32 %v3391_v47, %v1622_v54 }
 0x11e   :  { %v2407_v58 = vpop.eup %2406  ;;  %v1322_v59 = vadd.f32 %v2405_v55, %v863_v52 }
 0x11f   :  { %2412 = vtanh.f32 %v1164_v56 }
 0x120   :  { %v1781_v62 = vadd.f32 %v2407_v58, %v1322_v59  ;;  %2414 = vtanh.f32 %v1623_v57  ;;  %v297_v63 = vpop.f32.mrf.mxu0  ;;  %v707_v0 = vpop.f32.mrf.mxu1  ;;  %v2103_v57 = vld [vmem:[%s3882_s0 + $0x440] sm:$0xff]  ;;  %v2202_v58 = vld [vmem:[%s3882_s0 + $0x5c8] sm:$0xff] }
 0x121   :  { %v2409_v3 = vpop.eup %2408  ;;  %2150 = vmatmul.msk.f32.gmra.mxu2 %vm71_vm1, %v2100_v60  ;;  %v298_v5 = vadd.f32 %v3391_v47, %v297_v63  ;;  %v708_v6 = vadd.f32 %v3391_v47, %v707_v0  ;;  %2249 = vmatmul.msk.f32.gmra.mxu3 %vm71_vm1, %v2199_v61  ;;  %v2004_v63 = vld [vmem:[%s3882_s0 + $0x2b8] sm:$0xff] }
 0x122   :  { %v2411_v7 = vpop.eup %2410  ;;  %v1830_v8 = vmul.f32 0.25, %v1781_v62  ;;  %v57_v62 = vld [vmem:[%s3882_s0 + $0x130] sm:$0xff] }
 0x123   :  { %v864_v9 = vadd.f32 %v2411_v7, %v2409_v3  ;;  %2416 = vtanh.f32 %v298_v5  ;;  %1952 = vmatmul.msk.f32.gmra.mxu0 %vm71_vm1, %v54_v1  ;;  %2051 = vmatmul.msk.f32.gmra.mxu1 %vm71_vm1, %v2001_v2 }
 0x124   :  { %1880 = vst.msk [vmem:[%s3884_s3 + $0x88] sm:$0xff] %vm1862_vm2, %v1830_v8  ;;  %2418 = vtanh.f32 %v708_v6  ;;  %v1166_v10 = vpop.f32.mrf.mxu2  ;;  %v1625_v11 = vpop.f32.mrf.mxu3 }
 0x125   :  { %v2413_v12 = vpop.eup %2412  ;;  %v1167_v13 = vadd.f32 %v3391_v47, %v1166_v10  ;;  %v1626_v14 = vadd.f32 %v3391_v47, %v1625_v11 }
 0x126   :  { %v2415_v15 = vpop.eup %2414  ;;  %v1323_v16 = vadd.f32 %v2413_v12, %v864_v9 }
 0x127   :  { %2420 = vtanh.f32 %v1167_v13 }
 0x128   :  { %v1782_v19 = vadd.f32 %v2415_v15, %v1323_v16  ;;  %2422 = vtanh.f32 %v1626_v14  ;;  %v300_v20 = vpop.f32.mrf.mxu0  ;;  %v710_v21 = vpop.f32.mrf.mxu1  ;;  %v2104_v14 = vld [vmem:[%s3882_s0 + $0x448] sm:$0xff]  ;;  %v2203_v15 = vld [vmem:[%s3882_s0 + $0x5d0] sm:$0xff] }
 0x129   :  { %v2417_v24 = vpop.eup %2416  ;;  %2151 = vmatmul.msk.f32.gmra.mxu2 %vm71_vm1, %v2101_v17  ;;  %v301_v25 = vadd.f32 %v3391_v47, %v300_v20  ;;  %v711_v26 = vadd.f32 %v3391_v47, %v710_v21  ;;  %2250 = vmatmul.msk.f32.gmra.mxu3 %vm71_vm1, %v2200_v18  ;;  %v2005_v20 = vld [vmem:[%s3882_s0 + $0x2c0] sm:$0xff] }
 0x12a   :  { %v2419_v27 = vpop.eup %2418  ;;  %v1831_v28 = vmul.f32 0.25, %v1782_v19  ;;  %v58_v19 = vld [vmem:[%s3882_s0 + $0x138] sm:$0xff] }
 0x12b   :  { %v865_v29 = vadd.f32 %v2419_v27, %v2417_v24  ;;  %2424 = vtanh.f32 %v301_v25  ;;  %1953 = vmatmul.msk.f32.gmra.mxu0 %vm71_vm1, %v55_v22  ;;  %2052 = vmatmul.msk.f32.gmra.mxu1 %vm71_vm1, %v2002_v23 }
 0x12c   :  { %1881 = vst.msk [vmem:[%s3884_s3 + $0x90] sm:$0xff] %vm1862_vm2, %v1831_v28  ;;  %2426 = vtanh.f32 %v711_v26  ;;  %v1169_v30 = vpop.f32.mrf.mxu2  ;;  %v1628_v31 = vpop.f32.mrf.mxu3 }
 0x12d   :  { %v2421_v32 = vpop.eup %2420  ;;  %v1170_v33 = vadd.f32 %v3391_v47, %v1169_v30  ;;  %v1629_v34 = vadd.f32 %v3391_v47, %v1628_v31 }
 0x12e   :  { %v2423_v35 = vpop.eup %2422  ;;  %v1324_v36 = vadd.f32 %v2421_v32, %v865_v29 }
 0x12f   :  { %2428 = vtanh.f32 %v1170_v33 }
 0x130   :  { %v1783_v39 = vadd.f32 %v2423_v35, %v1324_v36  ;;  %2430 = vtanh.f32 %v1629_v34  ;;  %v303_v40 = vpop.f32.mrf.mxu0  ;;  %v713_v41 = vpop.f32.mrf.mxu1  ;;  %v2105_v34 = vld [vmem:[%s3882_s0 + $0x450] sm:$0xff]  ;;  %v2204_v35 = vld [vmem:[%s3882_s0 + $0x5d8] sm:$0xff] }
 0x131   :  { %v2425_v44 = vpop.eup %2424  ;;  %2152 = vmatmul.msk.f32.gmra.mxu2 %vm71_vm1, %v2102_v37  ;;  %v304_v45 = vadd.f32 %v3391_v47, %v303_v40  ;;  %v714_v4 = vadd.f32 %v3391_v47, %v713_v41  ;;  %2251 = vmatmul.msk.f32.gmra.mxu3 %vm71_vm1, %v2201_v38  ;;  %v2006_v40 = vld [vmem:[%s3882_s0 + $0x2c8] sm:$0xff] }
 0x132   :  { %v2427_v46 = vpop.eup %2426  ;;  %v1832_v48 = vmul.f32 0.25, %v1783_v39  ;;  %v59_v39 = vld [vmem:[%s3882_s0 + $0x140] sm:$0xff] }
 0x133   :  { %v866_v49 = vadd.f32 %v2427_v46, %v2425_v44  ;;  %2432 = vtanh.f32 %v304_v45  ;;  %1954 = vmatmul.msk.f32.gmra.mxu0 %vm71_vm1, %v56_v42  ;;  %2053 = vmatmul.msk.f32.gmra.mxu1 %vm71_vm1, %v2003_v43 }
 0x134   :  { %1882 = vst.msk [vmem:[%s3884_s3 + $0x98] sm:$0xff] %vm1862_vm2, %v1832_v48  ;;  %2434 = vtanh.f32 %v714_v4  ;;  %v1172_v50 = vpop.f32.mrf.mxu2  ;;  %v1631_v51 = vpop.f32.mrf.mxu3 }
 0x135   :  { %v2429_v52 = vpop.eup %2428  ;;  %v1173_v53 = vadd.f32 %v3391_v47, %v1172_v50  ;;  %v1632_v54 = vadd.f32 %v3391_v47, %v1631_v51 }
 0x136   :  { %v2431_v55 = vpop.eup %2430  ;;  %v1325_v56 = vadd.f32 %v2429_v52, %v866_v49 }
 0x137   :  { %2436 = vtanh.f32 %v1173_v53 }
 0x138   :  { %v1784_v59 = vadd.f32 %v2431_v55, %v1325_v56  ;;  %2438 = vtanh.f32 %v1632_v54  ;;  %v306_v60 = vpop.f32.mrf.mxu0  ;;  %v716_v61 = vpop.f32.mrf.mxu1  ;;  %v2106_v54 = vld [vmem:[%s3882_s0 + $0x458] sm:$0xff]  ;;  %v2205_v55 = vld [vmem:[%s3882_s0 + $0x5e0] sm:$0xff] }
 0x139   :  { %v2433_v0 = vpop.eup %2432  ;;  %2153 = vmatmul.msk.f32.gmra.mxu2 %vm71_vm1, %v2103_v57  ;;  %v307_v1 = vadd.f32 %v3391_v47, %v306_v60  ;;  %v717_v2 = vadd.f32 %v3391_v47, %v716_v61  ;;  %2252 = vmatmul.msk.f32.gmra.mxu3 %vm71_vm1, %v2202_v58  ;;  %v2007_v60 = vld [vmem:[%s3882_s0 + $0x2d0] sm:$0xff] }
 0x13a   :  { %v2435_v3 = vpop.eup %2434  ;;  %v1833_v5 = vmul.f32 0.25, %v1784_v59  ;;  %v60_v59 = vld [vmem:[%s3882_s0 + $0x148] sm:$0xff] }
 0x13b   :  { %v867_v6 = vadd.f32 %v2435_v3, %v2433_v0  ;;  %2440 = vtanh.f32 %v307_v1  ;;  %1955 = vmatmul.msk.f32.gmra.mxu0 %vm71_vm1, %v57_v62  ;;  %2054 = vmatmul.msk.f32.gmra.mxu1 %vm71_vm1, %v2004_v63 }
 0x13c   :  { %1883 = vst.msk [vmem:[%s3884_s3 + $0xa0] sm:$0xff] %vm1862_vm2, %v1833_v5  ;;  %2442 = vtanh.f32 %v717_v2  ;;  %v1175_v7 = vpop.f32.mrf.mxu2  ;;  %v1634_v8 = vpop.f32.mrf.mxu3 }
 0x13d   :  { %v2437_v9 = vpop.eup %2436  ;;  %v1176_v10 = vadd.f32 %v3391_v47, %v1175_v7  ;;  %v1635_v11 = vadd.f32 %v3391_v47, %v1634_v8 }
 0x13e   :  { %v2439_v12 = vpop.eup %2438  ;;  %v1326_v13 = vadd.f32 %v2437_v9, %v867_v6 }
 0x13f   :  { %2444 = vtanh.f32 %v1176_v10 }
 0x140   :  { %v1785_v16 = vadd.f32 %v2439_v12, %v1326_v13  ;;  %2446 = vtanh.f32 %v1635_v11  ;;  %v309_v17 = vpop.f32.mrf.mxu0  ;;  %v719_v18 = vpop.f32.mrf.mxu1  ;;  %v2107_v11 = vld [vmem:[%s3882_s0 + $0x460] sm:$0xff]  ;;  %v2206_v12 = vld [vmem:[%s3882_s0 + $0x5e8] sm:$0xff] }
 0x141   :  { %v2441_v21 = vpop.eup %2440  ;;  %2154 = vmatmul.msk.f32.gmra.mxu2 %vm71_vm1, %v2104_v14  ;;  %v310_v22 = vadd.f32 %v3391_v47, %v309_v17  ;;  %v720_v23 = vadd.f32 %v3391_v47, %v719_v18  ;;  %2253 = vmatmul.msk.f32.gmra.mxu3 %vm71_vm1, %v2203_v15  ;;  %v2008_v17 = vld [vmem:[%s3882_s0 + $0x2d8] sm:$0xff] }
 0x142   :  { %v2443_v24 = vpop.eup %2442  ;;  %v1834_v25 = vmul.f32 0.25, %v1785_v16  ;;  %v61_v16 = vld [vmem:[%s3882_s0 + $0x150] sm:$0xff] }
 0x143   :  { %v868_v26 = vadd.f32 %v2443_v24, %v2441_v21  ;;  %2448 = vtanh.f32 %v310_v22  ;;  %1956 = vmatmul.msk.f32.gmra.mxu0 %vm71_vm1, %v58_v19  ;;  %2055 = vmatmul.msk.f32.gmra.mxu1 %vm71_vm1, %v2005_v20 }
 0x144   :  { %1884 = vst.msk [vmem:[%s3884_s3 + $0xa8] sm:$0xff] %vm1862_vm2, %v1834_v25  ;;  %2450 = vtanh.f32 %v720_v23  ;;  %v1178_v27 = vpop.f32.mrf.mxu2  ;;  %v1637_v28 = vpop.f32.mrf.mxu3 }
 0x145   :  { %v2445_v29 = vpop.eup %2444  ;;  %v1179_v30 = vadd.f32 %v3391_v47, %v1178_v27  ;;  %v1638_v31 = vadd.f32 %v3391_v47, %v1637_v28 }
 0x146   :  { %v2447_v32 = vpop.eup %2446  ;;  %v1327_v33 = vadd.f32 %v2445_v29, %v868_v26 }
 0x147   :  { %2452 = vtanh.f32 %v1179_v30 }
 0x148   :  { %v1786_v36 = vadd.f32 %v2447_v32, %v1327_v33  ;;  %2454 = vtanh.f32 %v1638_v31  ;;  %v312_v37 = vpop.f32.mrf.mxu0  ;;  %v722_v38 = vpop.f32.mrf.mxu1  ;;  %v2108_v31 = vld [vmem:[%s3882_s0 + $0x468] sm:$0xff]  ;;  %v2207_v32 = vld [vmem:[%s3882_s0 + $0x5f0] sm:$0xff] }
 0x149   :  { %v2449_v41 = vpop.eup %2448  ;;  %2155 = vmatmul.msk.f32.gmra.mxu2 %vm71_vm1, %v2105_v34  ;;  %v313_v42 = vadd.f32 %v3391_v47, %v312_v37  ;;  %v723_v43 = vadd.f32 %v3391_v47, %v722_v38  ;;  %2254 = vmatmul.msk.f32.gmra.mxu3 %vm71_vm1, %v2204_v35  ;;  %v2009_v37 = vld [vmem:[%s3882_s0 + $0x2e0] sm:$0xff] }
 0x14a   :  { %v2451_v44 = vpop.eup %2450  ;;  %v1835_v45 = vmul.f32 0.25, %v1786_v36  ;;  %v62_v36 = vld [vmem:[%s3882_s0 + $0x158] sm:$0xff] }
 0x14b   :  { %v869_v4 = vadd.f32 %v2451_v44, %v2449_v41  ;;  %2456 = vtanh.f32 %v313_v42  ;;  %1957 = vmatmul.msk.f32.gmra.mxu0 %vm71_vm1, %v59_v39  ;;  %2056 = vmatmul.msk.f32.gmra.mxu1 %vm71_vm1, %v2006_v40 }
 0x14c   :  { %1885 = vst.msk [vmem:[%s3884_s3 + $0xb0] sm:$0xff] %vm1862_vm2, %v1835_v45  ;;  %2458 = vtanh.f32 %v723_v43  ;;  %v1181_v46 = vpop.f32.mrf.mxu2  ;;  %v1640_v48 = vpop.f32.mrf.mxu3 }
 0x14d   :  { %v2453_v49 = vpop.eup %2452  ;;  %v1182_v50 = vadd.f32 %v3391_v47, %v1181_v46  ;;  %v1641_v51 = vadd.f32 %v3391_v47, %v1640_v48 }
 0x14e   :  { %v2455_v52 = vpop.eup %2454  ;;  %v1328_v53 = vadd.f32 %v2453_v49, %v869_v4 }
 0x14f   :  { %2460 = vtanh.f32 %v1182_v50 }
 0x150   :  { %v1787_v56 = vadd.f32 %v2455_v52, %v1328_v53  ;;  %2462 = vtanh.f32 %v1641_v51  ;;  %v315_v57 = vpop.f32.mrf.mxu0  ;;  %v725_v58 = vpop.f32.mrf.mxu1  ;;  %v2109_v51 = vld [vmem:[%s3882_s0 + $0x470] sm:$0xff]  ;;  %v2208_v52 = vld [vmem:[%s3882_s0 + $0x5f8] sm:$0xff] }
 0x151   :  { %v2457_v61 = vpop.eup %2456  ;;  %2156 = vmatmul.msk.f32.gmra.mxu2 %vm71_vm1, %v2106_v54  ;;  %v316_v62 = vadd.f32 %v3391_v47, %v315_v57  ;;  %v726_v63 = vadd.f32 %v3391_v47, %v725_v58  ;;  %2255 = vmatmul.msk.f32.gmra.mxu3 %vm71_vm1, %v2205_v55  ;;  %v2010_v57 = vld [vmem:[%s3882_s0 + $0x2e8] sm:$0xff] }
 0x152   :  { %v2459_v0 = vpop.eup %2458  ;;  %v1836_v1 = vmul.f32 0.25, %v1787_v56  ;;  %v63_v56 = vld [vmem:[%s3882_s0 + $0x160] sm:$0xff] }
 0x153   :  { %v870_v2 = vadd.f32 %v2459_v0, %v2457_v61  ;;  %2464 = vtanh.f32 %v316_v62  ;;  %1958 = vmatmul.msk.f32.gmra.mxu0 %vm71_vm1, %v60_v59  ;;  %2057 = vmatmul.msk.f32.gmra.mxu1 %vm71_vm1, %v2007_v60 }
 0x154   :  { %1886 = vst.msk [vmem:[%s3884_s3 + $0xb8] sm:$0xff] %vm1862_vm2, %v1836_v1  ;;  %2466 = vtanh.f32 %v726_v63  ;;  %v1184_v3 = vpop.f32.mrf.mxu2  ;;  %v1643_v5 = vpop.f32.mrf.mxu3 }
 0x155   :  { %v2461_v6 = vpop.eup %2460  ;;  %v1185_v7 = vadd.f32 %v3391_v47, %v1184_v3  ;;  %v1644_v8 = vadd.f32 %v3391_v47, %v1643_v5 }
 0x156   :  { %v2463_v9 = vpop.eup %2462  ;;  %v1329_v10 = vadd.f32 %v2461_v6, %v870_v2 }
 0x157   :  { %2468 = vtanh.f32 %v1185_v7 }
 0x158   :  { %v1788_v13 = vadd.f32 %v2463_v9, %v1329_v10  ;;  %2470 = vtanh.f32 %v1644_v8  ;;  %v318_v14 = vpop.f32.mrf.mxu0  ;;  %v728_v15 = vpop.f32.mrf.mxu1  ;;  %v2110_v8 = vld [vmem:[%s3882_s0 + $0x478] sm:$0xff]  ;;  %v2209_v9 = vld [vmem:[%s3882_s0 + $0x600] sm:$0xff] }
 0x159   :  { %v2465_v18 = vpop.eup %2464  ;;  %2157 = vmatmul.msk.f32.gmra.mxu2 %vm71_vm1, %v2107_v11  ;;  %v319_v19 = vadd.f32 %v3391_v47, %v318_v14  ;;  %v729_v20 = vadd.f32 %v3391_v47, %v728_v15  ;;  %2256 = vmatmul.msk.f32.gmra.mxu3 %vm71_vm1, %v2206_v12  ;;  %v2011_v14 = vld [vmem:[%s3882_s0 + $0x2f0] sm:$0xff] }
 0x15a   :  { %v2467_v21 = vpop.eup %2466  ;;  %v1837_v22 = vmul.f32 0.25, %v1788_v13  ;;  %v64_v13 = vld [vmem:[%s3882_s0 + $0x168] sm:$0xff] }
 0x15b   :  { %v871_v23 = vadd.f32 %v2467_v21, %v2465_v18  ;;  %2472 = vtanh.f32 %v319_v19  ;;  %1959 = vmatmul.msk.f32.gmra.mxu0 %vm71_vm1, %v61_v16  ;;  %2058 = vmatmul.msk.f32.gmra.mxu1 %vm71_vm1, %v2008_v17 }
 0x15c   :  { %1887 = vst.msk [vmem:[%s3884_s3 + $0xc0] sm:$0xff] %vm1862_vm2, %v1837_v22  ;;  %2474 = vtanh.f32 %v729_v20  ;;  %v1187_v24 = vpop.f32.mrf.mxu2  ;;  %v1646_v25 = vpop.f32.mrf.mxu3 }
 0x15d   :  { %v2469_v26 = vpop.eup %2468  ;;  %v1188_v27 = vadd.f32 %v3391_v47, %v1187_v24  ;;  %v1647_v28 = vadd.f32 %v3391_v47, %v1646_v25 }
 0x15e   :  { %v2471_v29 = vpop.eup %2470  ;;  %v1330_v30 = vadd.f32 %v2469_v26, %v871_v23 }
 0x15f   :  { %2476 = vtanh.f32 %v1188_v27 }
 0x160   :  { %v1789_v33 = vadd.f32 %v2471_v29, %v1330_v30  ;;  %2478 = vtanh.f32 %v1647_v28  ;;  %v321_v34 = vpop.f32.mrf.mxu0  ;;  %v731_v35 = vpop.f32.mrf.mxu1  ;;  %v2111_v28 = vld [vmem:[%s3882_s0 + $0x480] sm:$0xff]  ;;  %v2210_v29 = vld [vmem:[%s3882_s0 + $0x608] sm:$0xff] }
 0x161   :  { %v2473_v38 = vpop.eup %2472  ;;  %2158 = vmatmul.msk.f32.gmra.mxu2 %vm71_vm1, %v2108_v31  ;;  %v322_v39 = vadd.f32 %v3391_v47, %v321_v34  ;;  %v732_v40 = vadd.f32 %v3391_v47, %v731_v35  ;;  %2257 = vmatmul.msk.f32.gmra.mxu3 %vm71_vm1, %v2207_v32  ;;  %v2012_v34 = vld [vmem:[%s3882_s0 + $0x2f8] sm:$0xff] }
 0x162   :  { %v2475_v41 = vpop.eup %2474  ;;  %v1838_v42 = vmul.f32 0.25, %v1789_v33  ;;  %v65_v33 = vld [vmem:[%s3882_s0 + $0x170] sm:$0xff] }
 0x163   :  { %v872_v43 = vadd.f32 %v2475_v41, %v2473_v38  ;;  %2480 = vtanh.f32 %v322_v39  ;;  %1960 = vmatmul.msk.f32.gmra.mxu0 %vm71_vm1, %v62_v36  ;;  %2059 = vmatmul.msk.f32.gmra.mxu1 %vm71_vm1, %v2009_v37 }
 0x164   :  { %1888 = vst.msk [vmem:[%s3884_s3 + $0xc8] sm:$0xff] %vm1862_vm2, %v1838_v42  ;;  %2482 = vtanh.f32 %v732_v40  ;;  %v1190_v44 = vpop.f32.mrf.mxu2  ;;  %v1649_v45 = vpop.f32.mrf.mxu3 }
 0x165   :  { %v2477_v4 = vpop.eup %2476  ;;  %v1191_v46 = vadd.f32 %v3391_v47, %v1190_v44  ;;  %v1650_v48 = vadd.f32 %v3391_v47, %v1649_v45 }
 0x166   :  { %v2479_v49 = vpop.eup %2478  ;;  %v1331_v50 = vadd.f32 %v2477_v4, %v872_v43 }
 0x167   :  { %2484 = vtanh.f32 %v1191_v46 }
 0x168   :  { %v1790_v53 = vadd.f32 %v2479_v49, %v1331_v50  ;;  %2486 = vtanh.f32 %v1650_v48  ;;  %v324_v54 = vpop.f32.mrf.mxu0  ;;  %v734_v55 = vpop.f32.mrf.mxu1  ;;  %v2112_v48 = vld [vmem:[%s3882_s0 + $0x488] sm:$0xff]  ;;  %v2211_v49 = vld [vmem:[%s3882_s0 + $0x610] sm:$0xff] }
 0x169   :  { %v2481_v58 = vpop.eup %2480  ;;  %2159 = vmatmul.msk.f32.gmra.mxu2 %vm71_vm1, %v2109_v51  ;;  %v325_v59 = vadd.f32 %v3391_v47, %v324_v54  ;;  %v735_v60 = vadd.f32 %v3391_v47, %v734_v55  ;;  %2258 = vmatmul.msk.f32.gmra.mxu3 %vm71_vm1, %v2208_v52  ;;  %v2013_v54 = vld [vmem:[%s3882_s0 + $0x300] sm:$0xff] }
 0x16a   :  { %v2483_v61 = vpop.eup %2482  ;;  %v1839_v62 = vmul.f32 0.25, %v1790_v53  ;;  %v66_v53 = vld [vmem:[%s3882_s0 + $0x178] sm:$0xff] }
 0x16b   :  { %v873_v63 = vadd.f32 %v2483_v61, %v2481_v58  ;;  %2488 = vtanh.f32 %v325_v59  ;;  %1961 = vmatmul.msk.f32.gmra.mxu0 %vm71_vm1, %v63_v56  ;;  %2060 = vmatmul.msk.f32.gmra.mxu1 %vm71_vm1, %v2010_v57 }
 0x16c   :  { %1889 = vst.msk [vmem:[%s3884_s3 + $0xd0] sm:$0xff] %vm1862_vm2, %v1839_v62  ;;  %2490 = vtanh.f32 %v735_v60  ;;  %v1193_v0 = vpop.f32.mrf.mxu2  ;;  %v1652_v1 = vpop.f32.mrf.mxu3 }
 0x16d   :  { %v2485_v2 = vpop.eup %2484  ;;  %v1194_v3 = vadd.f32 %v3391_v47, %v1193_v0  ;;  %v1653_v5 = vadd.f32 %v3391_v47, %v1652_v1 }
 0x16e   :  { %v2487_v6 = vpop.eup %2486  ;;  %v1332_v7 = vadd.f32 %v2485_v2, %v873_v63 }
 0x16f   :  { %2492 = vtanh.f32 %v1194_v3 }
 0x170   :  { %v1791_v10 = vadd.f32 %v2487_v6, %v1332_v7  ;;  %2494 = vtanh.f32 %v1653_v5  ;;  %v327_v11 = vpop.f32.mrf.mxu0  ;;  %v737_v12 = vpop.f32.mrf.mxu1  ;;  %v2113_v5 = vld [vmem:[%s3882_s0 + $0x490] sm:$0xff]  ;;  %v2212_v6 = vld [vmem:[%s3882_s0 + $0x618] sm:$0xff] }
 0x171   :  { %v2489_v15 = vpop.eup %2488  ;;  %2160 = vmatmul.msk.f32.gmra.mxu2 %vm71_vm1, %v2110_v8  ;;  %v328_v16 = vadd.f32 %v3391_v47, %v327_v11  ;;  %v738_v17 = vadd.f32 %v3391_v47, %v737_v12  ;;  %2259 = vmatmul.msk.f32.gmra.mxu3 %vm71_vm1, %v2209_v9  ;;  %v2014_v11 = vld [vmem:[%s3882_s0 + $0x308] sm:$0xff] }
 0x172   :  { %v2491_v18 = vpop.eup %2490  ;;  %v1840_v19 = vmul.f32 0.25, %v1791_v10  ;;  %v67_v10 = vld [vmem:[%s3882_s0 + $0x180] sm:$0xff] }
 0x173   :  { %v874_v20 = vadd.f32 %v2491_v18, %v2489_v15  ;;  %2496 = vtanh.f32 %v328_v16  ;;  %1962 = vmatmul.msk.f32.gmra.mxu0 %vm71_vm1, %v64_v13  ;;  %2061 = vmatmul.msk.f32.gmra.mxu1 %vm71_vm1, %v2011_v14 }
 0x174   :  { %1890 = vst.msk [vmem:[%s3884_s3 + $0xd8] sm:$0xff] %vm1862_vm2, %v1840_v19  ;;  %2498 = vtanh.f32 %v738_v17  ;;  %v1196_v21 = vpop.f32.mrf.mxu2  ;;  %v1655_v22 = vpop.f32.mrf.mxu3 }
 0x175   :  { %v2493_v23 = vpop.eup %2492  ;;  %v1197_v24 = vadd.f32 %v3391_v47, %v1196_v21  ;;  %v1656_v25 = vadd.f32 %v3391_v47, %v1655_v22 }
 0x176   :  { %v2495_v26 = vpop.eup %2494  ;;  %v1333_v27 = vadd.f32 %v2493_v23, %v874_v20 }
 0x177   :  { %2500 = vtanh.f32 %v1197_v24 }
 0x178   :  { %v1792_v30 = vadd.f32 %v2495_v26, %v1333_v27  ;;  %2502 = vtanh.f32 %v1656_v25  ;;  %v330_v31 = vpop.f32.mrf.mxu0  ;;  %v740_v32 = vpop.f32.mrf.mxu1 }
 0x179   :  { %v2497_v35 = vpop.eup %2496  ;;  %2161 = vmatmul.msk.f32.gmra.mxu2 %vm71_vm1, %v2111_v28  ;;  %v331_v36 = vadd.f32 %v3391_v47, %v330_v31  ;;  %v741_v37 = vadd.f32 %v3391_v47, %v740_v32  ;;  %2260 = vmatmul.msk.f32.gmra.mxu3 %vm71_vm1, %v2210_v29 }
 0x17a   :  { %v2499_v38 = vpop.eup %2498  ;;  %v1841_v39 = vmul.f32 0.25, %v1792_v30 }
 0x17b   :  { %v875_v40 = vadd.f32 %v2499_v38, %v2497_v35  ;;  %2504 = vtanh.f32 %v331_v36  ;;  %1963 = vmatmul.msk.f32.gmra.mxu0 %vm71_vm1, %v65_v33  ;;  %2062 = vmatmul.msk.f32.gmra.mxu1 %vm71_vm1, %v2012_v34 }
 0x17c   :  { %1891 = vst.msk [vmem:[%s3884_s3 + $0xe0] sm:$0xff] %vm1862_vm2, %v1841_v39  ;;  %2506 = vtanh.f32 %v741_v37  ;;  %v1199_v41 = vpop.f32.mrf.mxu2  ;;  %v1658_v42 = vpop.f32.mrf.mxu3 }
 0x17d   :  { %v2501_v43 = vpop.eup %2500  ;;  %v1200_v44 = vadd.f32 %v3391_v47, %v1199_v41  ;;  %v1659_v45 = vadd.f32 %v3391_v47, %v1658_v42 }
 0x17e   :  { %v2503_v4 = vpop.eup %2502  ;;  %v1334_v46 = vadd.f32 %v2501_v43, %v875_v40 }
 0x17f   :  { %2508 = vtanh.f32 %v1200_v44 }
 0x180   :  { %v1793_v50 = vadd.f32 %v2503_v4, %v1334_v46  ;;  %2510 = vtanh.f32 %v1659_v45  ;;  %v333_v51 = vpop.f32.mrf.mxu0  ;;  %v743_v52 = vpop.f32.mrf.mxu1 }
 0x181   :  { %v2505_v55 = vpop.eup %2504  ;;  %2162 = vmatmul.msk.f32.gmra.mxu2 %vm71_vm1, %v2112_v48  ;;  %v334_v56 = vadd.f32 %v3391_v47, %v333_v51  ;;  %v744_v57 = vadd.f32 %v3391_v47, %v743_v52  ;;  %2261 = vmatmul.msk.f32.gmra.mxu3 %vm71_vm1, %v2211_v49 }
 0x182   :  { %v2507_v58 = vpop.eup %2506  ;;  %v1842_v59 = vmul.f32 0.25, %v1793_v50 }
 0x183   :  { %v876_v60 = vadd.f32 %v2507_v58, %v2505_v55  ;;  %2512 = vtanh.f32 %v334_v56  ;;  %1964 = vmatmul.msk.f32.gmra.mxu0 %vm71_vm1, %v66_v53  ;;  %2063 = vmatmul.msk.f32.gmra.mxu1 %vm71_vm1, %v2013_v54 }
 0x184   :  { %1892 = vst.msk [vmem:[%s3884_s3 + $0xe8] sm:$0xff] %vm1862_vm2, %v1842_v59  ;;  %2514 = vtanh.f32 %v744_v57  ;;  %v1202_v61 = vpop.f32.mrf.mxu2  ;;  %v1661_v62 = vpop.f32.mrf.mxu3 }
 0x185   :  { %v2509_v63 = vpop.eup %2508  ;;  %v1203_v0 = vadd.f32 %v3391_v47, %v1202_v61  ;;  %v1662_v1 = vadd.f32 %v3391_v47, %v1661_v62 }
 0x186   :  { %v2511_v2 = vpop.eup %2510  ;;  %v1335_v3 = vadd.f32 %v2509_v63, %v876_v60 }
 0x187   :  { %2516 = vtanh.f32 %v1203_v0 }
 0x188   :  { %v1794_v7 = vadd.f32 %v2511_v2, %v1335_v3  ;;  %2518 = vtanh.f32 %v1662_v1  ;;  %v336_v8 = vpop.f32.mrf.mxu0  ;;  %v746_v9 = vpop.f32.mrf.mxu1 }
 0x189   :  { %v2513_v12 = vpop.eup %2512  ;;  %2163 = vmatmul.msk.f32.gmra.mxu2 %vm71_vm1, %v2113_v5  ;;  %v337_v13 = vadd.f32 %v3391_v47, %v336_v8  ;;  %v747_v14 = vadd.f32 %v3391_v47, %v746_v9  ;;  %2262 = vmatmul.msk.f32.gmra.mxu3 %vm71_vm1, %v2212_v6 }
 0x18a   :  { %v2515_v15 = vpop.eup %2514  ;;  %v1843_v16 = vmul.f32 0.25, %v1794_v7 }
 0x18b   :  { %v877_v17 = vadd.f32 %v2515_v15, %v2513_v12  ;;  %2520 = vtanh.f32 %v337_v13  ;;  %1965 = vmatmul.msk.f32.gmra.mxu0 %vm71_vm1, %v67_v10  ;;  %2064 = vmatmul.msk.f32.gmra.mxu1 %vm71_vm1, %v2014_v11 }
 0x18c   :  { %1893 = vst.msk [vmem:[%s3884_s3 + $0xf0] sm:$0xff] %vm1862_vm2, %v1843_v16  ;;  %2522 = vtanh.f32 %v747_v14  ;;  %v1205_v18 = vpop.f32.mrf.mxu2  ;;  %v1664_v19 = vpop.f32.mrf.mxu3 }
 0x18d   :  { %v2517_v20 = vpop.eup %2516  ;;  %v1206_v21 = vadd.f32 %v3391_v47, %v1205_v18  ;;  %v1665_v22 = vadd.f32 %v3391_v47, %v1664_v19 }
 0x18e   :  { %v2519_v23 = vpop.eup %2518  ;;  %v1336_v24 = vadd.f32 %v2517_v20, %v877_v17 }
 0x18f   :  { %2524 = vtanh.f32 %v1206_v21 }
 0x190   :  { %v1795_v25 = vadd.f32 %v2519_v23, %v1336_v24  ;;  %2526 = vtanh.f32 %v1665_v22  ;;  %v339_v26 = vpop.f32.mrf.mxu0  ;;  %v749_v27 = vpop.f32.mrf.mxu1 }
 0x191   :  { %v2521_v28 = vpop.eup %2520  ;;  %v340_v29 = vadd.f32 %v3391_v47, %v339_v26  ;;  %v750_v30 = vadd.f32 %v3391_v47, %v749_v27 }
 0x192   :  { %v2523_v31 = vpop.eup %2522  ;;  %v1844_v32 = vmul.f32 0.25, %v1795_v25 }
 0x193   :  { %v878_v33 = vadd.f32 %v2523_v31, %v2521_v28  ;;  %2528 = vtanh.f32 %v340_v29 }
 0x194   :  { %1894 = vst.msk [vmem:[%s3884_s3 + $0xf8] sm:$0xff] %vm1862_vm2, %v1844_v32  ;;  %2530 = vtanh.f32 %v750_v30  ;;  %v1208_v34 = vpop.f32.mrf.mxu2  ;;  %v1667_v35 = vpop.f32.mrf.mxu3  ;;  %v3775_v30 = vld [vmem:[%s3883_s2] ss:$0 sm:$0xff] }
 0x195   :  { %v2525_v36 = vpop.eup %2524  ;;  %v1209_v37 = vadd.f32 %v3391_v47, %v1208_v34  ;;  %v1668_v38 = vadd.f32 %v3391_v47, %v1667_v35 }
 0x196   :  { %v2527_v39 = vpop.eup %2526  ;;  %v1337_v40 = vadd.f32 %v2525_v36, %v878_v33 }
 0x197   :  { %2532 = vtanh.f32 %v1209_v37 }
 0x198   :  { %v1796_v41 = vadd.f32 %v2527_v39, %v1337_v40  ;;  %2534 = vtanh.f32 %v1668_v38  ;;  %v342_v42 = vpop.f32.mrf.mxu0  ;;  %v752_v43 = vpop.f32.mrf.mxu1 }
 0x199   :  { %v2529_v44 = vpop.eup %2528  ;;  %v343_v45 = vadd.f32 %v3391_v47, %v342_v42  ;;  %v753_v4 = vadd.f32 %v3391_v47, %v752_v43 }
 0x19a   :  { %v2531_v46 = vpop.eup %2530  ;;  %v1845_v48 = vmul.f32 0.25, %v1796_v41 }
 0x19b   :  { %v879_v49 = vadd.f32 %v2531_v46, %v2529_v44  ;;  %2536 = vtanh.f32 %v343_v45 }
 0x19c   :  { %1895 = vst.msk [vmem:[%s3884_s3 + $0x100] sm:$0xff] %vm1862_vm2, %v1845_v48  ;;  %2538 = vtanh.f32 %v753_v4  ;;  %v1211_v50 = vpop.f32.mrf.mxu2  ;;  %v1670_v51 = vpop.f32.mrf.mxu3 }
 0x19d   :  { %v2533_v52 = vpop.eup %2532  ;;  %v1212_v53 = vadd.f32 %v3391_v47, %v1211_v50  ;;  %v1671_v54 = vadd.f32 %v3391_v47, %v1670_v51 }
 0x19e   :  { %v2535_v55 = vpop.eup %2534  ;;  %v1338_v56 = vadd.f32 %v2533_v52, %v879_v49 }
 0x19f   :  { %2540 = vtanh.f32 %v1212_v53 }
 0x1a0   :  { %v1797_v57 = vadd.f32 %v2535_v55, %v1338_v56  ;;  %2542 = vtanh.f32 %v1671_v54  ;;  %v345_v58 = vpop.f32.mrf.mxu0  ;;  %v755_v59 = vpop.f32.mrf.mxu1 }
 0x1a1   :  { %v2537_v60 = vpop.eup %2536  ;;  %v346_v61 = vadd.f32 %v3391_v47, %v345_v58  ;;  %v756_v62 = vadd.f32 %v3391_v47, %v755_v59 }
 0x1a2   :  { %v2539_v63 = vpop.eup %2538  ;;  %v1846_v0 = vmul.f32 0.25, %v1797_v57 }
 0x1a3   :  { %v880_v1 = vadd.f32 %v2539_v63, %v2537_v60  ;;  %2544 = vtanh.f32 %v346_v61 }
 0x1a4   :  { %1896 = vst.msk [vmem:[%s3884_s3 + $0x108] sm:$0xff] %vm1862_vm2, %v1846_v0  ;;  %2546 = vtanh.f32 %v756_v62  ;;  %v1214_v2 = vpop.f32.mrf.mxu2  ;;  %v1673_v3 = vpop.f32.mrf.mxu3 }
 0x1a5   :  { %v2541_v5 = vpop.eup %2540  ;;  %v1215_v6 = vadd.f32 %v3391_v47, %v1214_v2  ;;  %v1674_v7 = vadd.f32 %v3391_v47, %v1673_v3 }
 0x1a6   :  { %v2543_v8 = vpop.eup %2542  ;;  %v1339_v9 = vadd.f32 %v2541_v5, %v880_v1 }
 0x1a7   :  { %2548 = vtanh.f32 %v1215_v6 }
 0x1a8   :  { %v1798_v10 = vadd.f32 %v2543_v8, %v1339_v9  ;;  %2550 = vtanh.f32 %v1674_v7  ;;  %v348_v11 = vpop.f32.mrf.mxu0  ;;  %v758_v12 = vpop.f32.mrf.mxu1 }
 0x1a9   :  { %v2545_v13 = vpop.eup %2544  ;;  %v349_v14 = vadd.f32 %v3391_v47, %v348_v11  ;;  %v759_v15 = vadd.f32 %v3391_v47, %v758_v12 }
 0x1aa   :  { %v2547_v16 = vpop.eup %2546  ;;  %v1847_v17 = vmul.f32 0.25, %v1798_v10 }
 0x1ab   :  { %v881_v18 = vadd.f32 %v2547_v16, %v2545_v13  ;;  %2552 = vtanh.f32 %v349_v14 }
 0x1ac   :  { %1897 = vst.msk [vmem:[%s3884_s3 + $0x110] sm:$0xff] %vm1862_vm2, %v1847_v17  ;;  %2554 = vtanh.f32 %v759_v15  ;;  %v1217_v19 = vpop.f32.mrf.mxu2  ;;  %v1676_v20 = vpop.f32.mrf.mxu3 }
 0x1ad   :  { %v2549_v21 = vpop.eup %2548  ;;  %v1218_v22 = vadd.f32 %v3391_v47, %v1217_v19  ;;  %v1677_v23 = vadd.f32 %v3391_v47, %v1676_v20 }
 0x1ae   :  { %v2551_v24 = vpop.eup %2550  ;;  %v1340_v25 = vadd.f32 %v2549_v21, %v881_v18 }
 0x1af   :  { %2556 = vtanh.f32 %v1218_v22 }
 0x1b0   :  { %v1799_v26 = vadd.f32 %v2551_v24, %v1340_v25  ;;  %2558 = vtanh.f32 %v1677_v23  ;;  %v351_v27 = vpop.f32.mrf.mxu0  ;;  %v761_v28 = vpop.f32.mrf.mxu1 }
 0x1b1   :  { %v2553_v29 = vpop.eup %2552  ;;  %v352_v31 = vadd.f32 %v3775_v30, %v351_v27  ;;  %v762_v32 = vadd.f32 %v3775_v30, %v761_v28 }
 0x1b2   :  { %v2555_v33 = vpop.eup %2554  ;;  %v1848_v34 = vmul.f32 0.25, %v1799_v26 }
 0x1b3   :  { %v882_v47 = vadd.f32 %v2555_v33, %v2553_v29  ;;  %2560 = vtanh.f32 %v352_v31 }
 0x1b4   :  { %1898 = vst.msk [vmem:[%s3884_s3 + $0x118] sm:$0xff] %vm1862_vm2, %v1848_v34  ;;  %2562 = vtanh.f32 %v762_v32  ;;  %v1220_v35 = vpop.f32.mrf.mxu2  ;;  %v1679_v36 = vpop.f32.mrf.mxu3 }
 0x1b5   :  { %v2557_v37 = vpop.eup %2556  ;;  %v1221_v38 = vadd.f32 %v3775_v30, %v1220_v35  ;;  %v1680_v39 = vadd.f32 %v3775_v30, %v1679_v36 }
 0x1b6   :  { %v2559_v40 = vpop.eup %2558  ;;  %v1341_v41 = vadd.f32 %v2557_v37, %v882_v47 }
 0x1b7   :  { %2564 = vtanh.f32 %v1221_v38 }
 0x1b8   :  { %v1800_v42 = vadd.f32 %v2559_v40, %v1341_v41  ;;  %2566 = vtanh.f32 %v1680_v39  ;;  %v354_v43 = vpop.f32.mrf.mxu0  ;;  %v764_v44 = vpop.f32.mrf.mxu1 }
 0x1b9   :  { %v2561_v45 = vpop.eup %2560  ;;  %v355_v4 = vadd.f32 %v3775_v30, %v354_v43  ;;  %v765_v46 = vadd.f32 %v3775_v30, %v764_v44 }
 0x1ba   :  { %v2563_v48 = vpop.eup %2562  ;;  %v1849_v49 = vmul.f32 0.25, %v1800_v42 }
 0x1bb   :  { %v883_v50 = vadd.f32 %v2563_v48, %v2561_v45  ;;  %2568 = vtanh.f32 %v355_v4 }
 0x1bc   :  { %1899 = vst.msk [vmem:[%s3884_s3 + $0x120] sm:$0xff] %vm1862_vm2, %v1849_v49  ;;  %2570 = vtanh.f32 %v765_v46  ;;  %v1223_v51 = vpop.f32.mrf.mxu2  ;;  %v1682_v52 = vpop.f32.mrf.mxu3 }
 0x1bd   :  { %v2565_v53 = vpop.eup %2564  ;;  %v1224_v54 = vadd.f32 %v3775_v30, %v1223_v51  ;;  %v1683_v55 = vadd.f32 %v3775_v30, %v1682_v52 }
 0x1be   :  { %v2567_v56 = vpop.eup %2566  ;;  %v1342_v57 = vadd.f32 %v2565_v53, %v883_v50 }
 0x1bf   :  { %2572 = vtanh.f32 %v1224_v54 }
 0x1c0   :  { %v1801_v58 = vadd.f32 %v2567_v56, %v1342_v57  ;;  %2574 = vtanh.f32 %v1683_v55  ;;  %v357_v59 = vpop.f32.mrf.mxu0  ;;  %v767_v60 = vpop.f32.mrf.mxu1 }
 0x1c1   :  { %v2569_v61 = vpop.eup %2568  ;;  %v358_v62 = vadd.f32 %v3775_v30, %v357_v59  ;;  %v768_v63 = vadd.f32 %v3775_v30, %v767_v60 }
 0x1c2   :  { %v2571_v0 = vpop.eup %2570  ;;  %v1850_v1 = vmul.f32 0.25, %v1801_v58 }
 0x1c3   :  { %v884_v2 = vadd.f32 %v2571_v0, %v2569_v61  ;;  %2576 = vtanh.f32 %v358_v62 }
 0x1c4   :  { %1900 = vst.msk [vmem:[%s3884_s3 + $0x128] sm:$0xff] %vm1862_vm2, %v1850_v1  ;;  %2578 = vtanh.f32 %v768_v63  ;;  %v1226_v3 = vpop.f32.mrf.mxu2  ;;  %v1685_v5 = vpop.f32.mrf.mxu3 }
 0x1c5   :  { %v2573_v6 = vpop.eup %2572  ;;  %v1227_v7 = vadd.f32 %v3775_v30, %v1226_v3  ;;  %v1686_v8 = vadd.f32 %v3775_v30, %v1685_v5 }
 0x1c6   :  { %v2575_v9 = vpop.eup %2574  ;;  %v1343_v10 = vadd.f32 %v2573_v6, %v884_v2 }
 0x1c7   :  { %2580 = vtanh.f32 %v1227_v7 }
 0x1c8   :  { %v1802_v11 = vadd.f32 %v2575_v9, %v1343_v10  ;;  %2582 = vtanh.f32 %v1686_v8  ;;  %v360_v12 = vpop.f32.mrf.mxu0  ;;  %v770_v13 = vpop.f32.mrf.mxu1 }
 0x1c9   :  { %v2577_v14 = vpop.eup %2576  ;;  %v361_v15 = vadd.f32 %v3775_v30, %v360_v12  ;;  %v771_v16 = vadd.f32 %v3775_v30, %v770_v13 }
 0x1ca   :  { %v2579_v17 = vpop.eup %2578  ;;  %v1851_v18 = vmul.f32 0.25, %v1802_v11 }
 0x1cb   :  { %v885_v19 = vadd.f32 %v2579_v17, %v2577_v14  ;;  %2584 = vtanh.f32 %v361_v15 }
 0x1cc   :  { %1901 = vst.msk [vmem:[%s3884_s3 + $0x130] sm:$0xff] %vm1862_vm2, %v1851_v18  ;;  %2586 = vtanh.f32 %v771_v16  ;;  %v1229_v20 = vpop.f32.mrf.mxu2  ;;  %v1688_v21 = vpop.f32.mrf.mxu3 }
 0x1cd   :  { %v2581_v22 = vpop.eup %2580  ;;  %v1230_v23 = vadd.f32 %v3775_v30, %v1229_v20  ;;  %v1689_v24 = vadd.f32 %v3775_v30, %v1688_v21 }
 0x1ce   :  { %v2583_v25 = vpop.eup %2582  ;;  %v1344_v26 = vadd.f32 %v2581_v22, %v885_v19 }
 0x1cf   :  { %2588 = vtanh.f32 %v1230_v23 }
 0x1d0   :  { %v1803_v27 = vadd.f32 %v2583_v25, %v1344_v26  ;;  %2590 = vtanh.f32 %v1689_v24  ;;  %v363_v28 = vpop.f32.mrf.mxu0  ;;  %v773_v29 = vpop.f32.mrf.mxu1 }
 0x1d1   :  { %v2585_v31 = vpop.eup %2584  ;;  %v364_v32 = vadd.f32 %v3775_v30, %v363_v28  ;;  %v774_v33 = vadd.f32 %v3775_v30, %v773_v29 }
 0x1d2   :  { %v2587_v34 = vpop.eup %2586  ;;  %v1852_v47 = vmul.f32 0.25, %v1803_v27 }
 0x1d3   :  { %v886_v35 = vadd.f32 %v2587_v34, %v2585_v31  ;;  %2592 = vtanh.f32 %v364_v32 }
 0x1d4   :  { %1902 = vst.msk [vmem:[%s3884_s3 + $0x138] sm:$0xff] %vm1862_vm2, %v1852_v47  ;;  %2594 = vtanh.f32 %v774_v33  ;;  %v1232_v36 = vpop.f32.mrf.mxu2  ;;  %v1691_v37 = vpop.f32.mrf.mxu3 }
 0x1d5   :  { %v2589_v38 = vpop.eup %2588  ;;  %v1233_v39 = vadd.f32 %v3775_v30, %v1232_v36  ;;  %v1692_v40 = vadd.f32 %v3775_v30, %v1691_v37 }
 0x1d6   :  { %v2591_v41 = vpop.eup %2590  ;;  %v1345_v42 = vadd.f32 %v2589_v38, %v886_v35 }
 0x1d7   :  { %2596 = vtanh.f32 %v1233_v39 }
 0x1d8   :  { %v1804_v43 = vadd.f32 %v2591_v41, %v1345_v42  ;;  %2598 = vtanh.f32 %v1692_v40  ;;  %v366_v44 = vpop.f32.mrf.mxu0  ;;  %v776_v45 = vpop.f32.mrf.mxu1 }
 0x1d9   :  { %v2593_v4 = vpop.eup %2592  ;;  %v367_v46 = vadd.f32 %v3775_v30, %v366_v44  ;;  %v777_v48 = vadd.f32 %v3775_v30, %v776_v45 }
 0x1da   :  { %v2595_v49 = vpop.eup %2594  ;;  %v1853_v50 = vmul.f32 0.25, %v1804_v43 }
 0x1db   :  { %v887_v51 = vadd.f32 %v2595_v49, %v2593_v4  ;;  %2600 = vtanh.f32 %v367_v46 }
 0x1dc   :  { %1903 = vst.msk [vmem:[%s3884_s3 + $0x140] sm:$0xff] %vm1862_vm2, %v1853_v50  ;;  %2602 = vtanh.f32 %v777_v48  ;;  %v1235_v52 = vpop.f32.mrf.mxu2  ;;  %v1694_v53 = vpop.f32.mrf.mxu3 }
 0x1dd   :  { %v2597_v54 = vpop.eup %2596  ;;  %v1236_v55 = vadd.f32 %v3775_v30, %v1235_v52  ;;  %v1695_v56 = vadd.f32 %v3775_v30, %v1694_v53 }
 0x1de   :  { %v2599_v57 = vpop.eup %2598  ;;  %v1346_v58 = vadd.f32 %v2597_v54, %v887_v51 }
 0x1df   :  { %2604 = vtanh.f32 %v1236_v55 }
 0x1e0   :  { %v1805_v59 = vadd.f32 %v2599_v57, %v1346_v58  ;;  %2606 = vtanh.f32 %v1695_v56  ;;  %v369_v60 = vpop.f32.mrf.mxu0  ;;  %v779_v61 = vpop.f32.mrf.mxu1 }
 0x1e1   :  { %v2601_v62 = vpop.eup %2600  ;;  %v370_v63 = vadd.f32 %v3775_v30, %v369_v60  ;;  %v780_v0 = vadd.f32 %v3775_v30, %v779_v61 }
 0x1e2   :  { %v2603_v1 = vpop.eup %2602  ;;  %v1854_v2 = vmul.f32 0.25, %v1805_v59 }
 0x1e3   :  { %v888_v3 = vadd.f32 %v2603_v1, %v2601_v62  ;;  %2608 = vtanh.f32 %v370_v63 }
 0x1e4   :  { %1904 = vst.msk [vmem:[%s3884_s3 + $0x148] sm:$0xff] %vm1862_vm2, %v1854_v2  ;;  %2610 = vtanh.f32 %v780_v0  ;;  %v1238_v5 = vpop.f32.mrf.mxu2  ;;  %v1697_v6 = vpop.f32.mrf.mxu3 }
 0x1e5   :  { %v2605_v7 = vpop.eup %2604  ;;  %v1239_v8 = vadd.f32 %v3775_v30, %v1238_v5  ;;  %v1698_v9 = vadd.f32 %v3775_v30, %v1697_v6 }
 0x1e6   :  { %v2607_v10 = vpop.eup %2606  ;;  %v1347_v11 = vadd.f32 %v2605_v7, %v888_v3 }
 0x1e7   :  { %2612 = vtanh.f32 %v1239_v8 }
 0x1e8   :  { %v1806_v12 = vadd.f32 %v2607_v10, %v1347_v11  ;;  %2614 = vtanh.f32 %v1698_v9  ;;  %v372_v13 = vpop.f32.mrf.mxu0  ;;  %v782_v14 = vpop.f32.mrf.mxu1 }
 0x1e9   :  { %v2609_v15 = vpop.eup %2608  ;;  %v373_v16 = vadd.f32 %v3775_v30, %v372_v13  ;;  %v783_v17 = vadd.f32 %v3775_v30, %v782_v14 }
 0x1ea   :  { %v2611_v18 = vpop.eup %2610  ;;  %v1855_v19 = vmul.f32 0.25, %v1806_v12 }
 0x1eb   :  { %v889_v20 = vadd.f32 %v2611_v18, %v2609_v15  ;;  %2616 = vtanh.f32 %v373_v16 }
 0x1ec   :  { %1905 = vst.msk [vmem:[%s3884_s3 + $0x150] sm:$0xff] %vm1862_vm2, %v1855_v19  ;;  %2618 = vtanh.f32 %v783_v17  ;;  %v1241_v21 = vpop.f32.mrf.mxu2  ;;  %v1700_v22 = vpop.f32.mrf.mxu3 }
 0x1ed   :  { %v2613_v23 = vpop.eup %2612  ;;  %v1242_v24 = vadd.f32 %v3775_v30, %v1241_v21  ;;  %v1701_v25 = vadd.f32 %v3775_v30, %v1700_v22 }
 0x1ee   :  { %v2615_v26 = vpop.eup %2614  ;;  %v1348_v27 = vadd.f32 %v2613_v23, %v889_v20 }
 0x1ef   :  { %2620 = vtanh.f32 %v1242_v24 }
 0x1f0   :  { %v1807_v28 = vadd.f32 %v2615_v26, %v1348_v27  ;;  %2622 = vtanh.f32 %v1701_v25  ;;  %v375_v29 = vpop.f32.mrf.mxu0  ;;  %v785_v31 = vpop.f32.mrf.mxu1 }
 0x1f1   :  { %v2617_v32 = vpop.eup %2616  ;;  %v376_v33 = vadd.f32 %v3775_v30, %v375_v29  ;;  %v786_v34 = vadd.f32 %v3775_v30, %v785_v31 }
 0x1f2   :  { %v2619_v47 = vpop.eup %2618  ;;  %v1856_v35 = vmul.f32 0.25, %v1807_v28 }
 0x1f3   :  { %v890_v36 = vadd.f32 %v2619_v47, %v2617_v32  ;;  %2624 = vtanh.f32 %v376_v33 }
 0x1f4   :  { %1906 = vst.msk [vmem:[%s3884_s3 + $0x158] sm:$0xff] %vm1862_vm2, %v1856_v35  ;;  %2626 = vtanh.f32 %v786_v34  ;;  %v1244_v37 = vpop.f32.mrf.mxu2  ;;  %v1703_v38 = vpop.f32.mrf.mxu3 }
 0x1f5   :  { %v2621_v39 = vpop.eup %2620  ;;  %v1245_v40 = vadd.f32 %v3775_v30, %v1244_v37  ;;  %v1704_v41 = vadd.f32 %v3775_v30, %v1703_v38 }
 0x1f6   :  { %v2623_v42 = vpop.eup %2622  ;;  %v1349_v43 = vadd.f32 %v2621_v39, %v890_v36 }
 0x1f7   :  { %2628 = vtanh.f32 %v1245_v40 }
 0x1f8   :  { %v1808_v44 = vadd.f32 %v2623_v42, %v1349_v43  ;;  %2630 = vtanh.f32 %v1704_v41  ;;  %v378_v45 = vpop.f32.mrf.mxu0  ;;  %v788_v4 = vpop.f32.mrf.mxu1 }
 0x1f9   :  { %v2625_v46 = vpop.eup %2624  ;;  %v379_v48 = vadd.f32 %v3775_v30, %v378_v45  ;;  %v789_v49 = vadd.f32 %v3775_v30, %v788_v4 }
 0x1fa   :  { %v2627_v50 = vpop.eup %2626  ;;  %v1857_v51 = vmul.f32 0.25, %v1808_v44 }
 0x1fb   :  { %v891_v52 = vadd.f32 %v2627_v50, %v2625_v46  ;;  %2632 = vtanh.f32 %v379_v48 }
 0x1fc   :  { %1907 = vst.msk [vmem:[%s3884_s3 + $0x160] sm:$0xff] %vm1862_vm2, %v1857_v51  ;;  %2634 = vtanh.f32 %v789_v49  ;;  %v1247_v53 = vpop.f32.mrf.mxu2  ;;  %v1706_v54 = vpop.f32.mrf.mxu3 }
 0x1fd   :  { %v2629_v55 = vpop.eup %2628  ;;  %v1248_v56 = vadd.f32 %v3775_v30, %v1247_v53  ;;  %v1707_v57 = vadd.f32 %v3775_v30, %v1706_v54 }
 0x1fe   :  { %v2631_v58 = vpop.eup %2630  ;;  %v1350_v59 = vadd.f32 %v2629_v55, %v891_v52 }
 0x1ff   :  { %2636 = vtanh.f32 %v1248_v56 }
 0x200   :  { %v1809_v60 = vadd.f32 %v2631_v58, %v1350_v59  ;;  %2638 = vtanh.f32 %v1707_v57  ;;  %v381_v61 = vpop.f32.mrf.mxu0  ;;  %v791_v62 = vpop.f32.mrf.mxu1 }
 0x201   :  { %v2633_v63 = vpop.eup %2632  ;;  %v382_v0 = vadd.f32 %v3775_v30, %v381_v61  ;;  %v792_v1 = vadd.f32 %v3775_v30, %v791_v62 }
 0x202   :  { %v2635_v2 = vpop.eup %2634  ;;  %v1858_v3 = vmul.f32 0.25, %v1809_v60 }
 0x203   :  { %v892_v5 = vadd.f32 %v2635_v2, %v2633_v63  ;;  %2640 = vtanh.f32 %v382_v0 }
 0x204   :  { %1908 = vst.msk [vmem:[%s3884_s3 + $0x168] sm:$0xff] %vm1862_vm2, %v1858_v3  ;;  %2642 = vtanh.f32 %v792_v1  ;;  %v1250_v6 = vpop.f32.mrf.mxu2  ;;  %v1709_v7 = vpop.f32.mrf.mxu3 }
 0x205   :  { %v2637_v8 = vpop.eup %2636  ;;  %v1251_v9 = vadd.f32 %v3775_v30, %v1250_v6  ;;  %v1710_v10 = vadd.f32 %v3775_v30, %v1709_v7 }
 0x206   :  { %v2639_v11 = vpop.eup %2638  ;;  %v1351_v12 = vadd.f32 %v2637_v8, %v892_v5 }
 0x207   :  { %2644 = vtanh.f32 %v1251_v9 }
 0x208   :  { %v1810_v13 = vadd.f32 %v2639_v11, %v1351_v12  ;;  %2646 = vtanh.f32 %v1710_v10  ;;  %v384_v14 = vpop.f32.mrf.mxu0  ;;  %v794_v15 = vpop.f32.mrf.mxu1 }
 0x209   :  { %v2641_v16 = vpop.eup %2640  ;;  %v385_v17 = vadd.f32 %v3775_v30, %v384_v14  ;;  %v795_v18 = vadd.f32 %v3775_v30, %v794_v15 }
 0x20a   :  { %v2643_v19 = vpop.eup %2642  ;;  %v1859_v20 = vmul.f32 0.25, %v1810_v13 }
 0x20b   :  { %v893_v21 = vadd.f32 %v2643_v19, %v2641_v16  ;;  %2648 = vtanh.f32 %v385_v17 }
 0x20c   :  { %1909 = vst.msk [vmem:[%s3884_s3 + $0x170] sm:$0xff] %vm1862_vm2, %v1859_v20  ;;  %2650 = vtanh.f32 %v795_v18  ;;  %v1253_v22 = vpop.f32.mrf.mxu2  ;;  %v1712_v23 = vpop.f32.mrf.mxu3 }
 0x20d   :  { %v2645_v24 = vpop.eup %2644  ;;  %v1254_v25 = vadd.f32 %v3775_v30, %v1253_v22  ;;  %v1713_v26 = vadd.f32 %v3775_v30, %v1712_v23 }
 0x20e   :  { %v2647_v27 = vpop.eup %2646  ;;  %v1352_v28 = vadd.f32 %v2645_v24, %v893_v21 }
 0x20f   :  { %2652 = vtanh.f32 %v1254_v25 }
 0x210   :  { %v1811_v29 = vadd.f32 %v2647_v27, %v1352_v28  ;;  %2654 = vtanh.f32 %v1713_v26 }
 0x211   :  { %v2649_v31 = vpop.eup %2648 }
 0x212   :  { %v2651_v32 = vpop.eup %2650  ;;  %v1860_v33 = vmul.f32 0.25, %v1811_v29 }
 0x213   :  { %v894_v34 = vadd.f32 %v2651_v32, %v2649_v31 }
 0x214   :  { %1910 = vst.msk [vmem:[%s3884_s3 + $0x178] sm:$0xff] %vm1862_vm2, %v1860_v33 }
 0x215   :  { %v2653_v47 = vpop.eup %2652 }
 0x216   :  { %v2655_v35 = vpop.eup %2654  ;;  %v1353_v36 = vadd.f32 %v2653_v47, %v894_v34 }
 0x218   :  { %v1812_v37 = vadd.f32 %v2655_v35, %v1353_v36 }
 0x21a   :  { %v1861_v38 = vmul.f32 0.25, %v1812_v37 }
 0x21c   :  { %1911 = vst.msk [vmem:[%s3884_s3 + $0x180] sm:$0xff] %vm1862_vm2, %v1861_v38 }

// kernel: lenet5_forward.4
= control target key start
LH: loop header
LB: loop body
LE: loop exit
PB: predicated region body
PF: predicated region fallthrough
CT: control target
= control target key end

     0   :  { %vm73_vm0 = vcmask 1045504   ;;  %vm51_vm1 = vcmask 179200   ;;  %vm545_vm2 = vcmask 130048   ;;  %vm552_vm3 = vcmask 123904   ;;  %s1203_s1 = inlined_call_operand.vmem [shape: f32[150,16], index: 1, kind: input, shape index: {}]   ;;  %s1204_s0 = inlined_call_operand.vmem [shape: f32[4,50,150], index: 0, kind: input, shape index: {}]   ;;  %s1205_s2 = inlined_call_operand.vmem [shape: f32[1,16], index: 2, kind: input, shape index: {}]   ;;  %s1206_s3 = inlined_call_operand.vmem [shape: f32[50,16], index: 3, kind: output, shape index: {}]  }
   0x1   :  { %v731_v0 = vld [vmem:[%s1203_s1 + $0x78] sm:$0xff]  ;;  %v736_v1 = vld [vmem:[%s1203_s1 + $0x90] sm:$0x3f]  ;;  %v748_v3 = vld [vmem:[%s1203_s1 + $0x88] sm:$0xff] }
   0x2   :  { %v741_v2 = vld [vmem:[%s1203_s1 + $0x70] sm:$0xff]  ;;  %77 = vmatpush.msra.mxu0 %v731_v0  ;;  %196 = vmatpush.msra.mxu2 %v731_v0  ;;  %v755_v4 = vld [vmem:[%s1203_s1 + $0x68] sm:$0xff]  ;;  %v764_v5 = vld [vmem:[%s1203_s1 + $0x80] sm:$0xff] }
   0x3   :  { %580 = vmatpush.msk.msra.mxu3 %vm73_vm0, %v736_v1  ;;  %558 = vmatpush.msk.msra.mxu1 %vm73_vm0, %v736_v1  ;;  %v567_v6 = vld [vmem:[%s1204_s0 + $0x78] sm:$0xff]  ;;  %v773_v7 = vld [vmem:[%s1203_s1 + $0x60] sm:$0xff]  ;;  %v35_v8 = vld [vmem:[%s1204_s0 + $0x8] sm:$0xff] }
   0x4   :  { %78 = vmatpush.msra.mxu0 %v741_v2  ;;  %197 = vmatpush.msra.mxu2 %v741_v2  ;;  %v785_v9 = vld [vmem:[%s1203_s1 + $0x58] sm:$0xff]  ;;  %v795_v10 = vld [vmem:[%s1203_s1 + $0x50] sm:$0xff]  ;;  %v804_v11 = vld [vmem:[%s1203_s1 + $0x48] sm:$0xff] }
   0x5   :  { %248 = vmatpush.msra.mxu3 %v748_v3  ;;  %129 = vmatpush.msra.mxu1 %v748_v3  ;;  %v569_v12 = vld [vmem:[%s1204_s0 + $0x88] sm:$0xff]  ;;  %v816_v13 = vld [vmem:[%s1203_s1 + $0x40] sm:$0xff]  ;;  %v37_v14 = vld [vmem:[%s1204_s0 + $0x18] sm:$0xff] }
   0x6   :  { %79 = vmatpush.msra.mxu0 %v755_v4  ;;  %198 = vmatpush.msra.mxu2 %v755_v4  ;;  %v828_v15 = vld [vmem:[%s1203_s1 + $0x38] sm:$0xff]  ;;  %v838_v16 = vld [vmem:[%s1203_s1 + $0x30] sm:$0xff]  ;;  %v846_v17 = vld [vmem:[%s1203_s1 + $0x28] sm:$0xff] }
   0x7   :  { %249 = vmatpush.msra.mxu3 %v764_v5  ;;  %130 = vmatpush.msra.mxu1 %v764_v5  ;;  %v571_v18 = vld [vmem:[%s1204_s0 + $0x98] sm:$0xff]  ;;  %v859_v19 = vld [vmem:[%s1203_s1 + $0x20] sm:$0xff]  ;;  %v39_v20 = vld [vmem:[%s1204_s0 + $0x28] sm:$0xff] }
   0x8   :  { %581 = vmatmul.msk.f32.vlgmr.msra.gmra.mxu3 %vm51_vm1, %v567_v6  ;;  %80 = vmatpush.msra.mxu0 %v773_v7  ;;  %v871_v21 = vld [vmem:[%s1203_s1 + $0x18] sm:$0xff]  ;;  %v881_v22 = vld [vmem:[%s1203_s1 + $0x10] sm:$0xff]  ;;  %v889_v23 = vld [vmem:[%s1203_s1 + $0x8] sm:$0xff] }
   0x9   :  { %199 = vmatpush.msra.mxu2 %v773_v7  ;;  %559 = vmatmul.msk.f32.vlgmr.msra.gmra.mxu1 %vm51_vm1, %v35_v8  ;;  %v573_v24 = vld [vmem:[%s1204_s0 + $0xa8] sm:$0xff]  ;;  %v900_v25 = vld [vmem:[%s1203_s1] sm:$0xff]  ;;  %v566_v27 = vld [vmem:[%s1204_s0 + $0x70] sm:$0xff] }
   0xa   :  { %81 = vmatpush.msra.mxu0 %v785_v9  ;;  %602 = vmatpush.msk.msrb.mxu3 %vm73_vm0, %v736_v1  ;;  %v34_v26 = vld [vmem:[%s1204_s0] sm:$0xff]  ;;  %v41_v28 = vld [vmem:[%s1204_s0 + $0x38] sm:$0xff]  ;;  %v36_v30 = vld [vmem:[%s1204_s0 + $0x10] sm:$0xff] }
   0xb   :  { %200 = vmatpush.msra.mxu2 %v785_v9  ;;  %322 = vmatpush.msrb.mxu1 %v731_v0  ;;  %v575_v29 = vld [vmem:[%s1204_s0 + $0xb8] sm:$0xff]  ;;  %v568_v31 = vld [vmem:[%s1204_s0 + $0x80] sm:$0xff]  ;;  %v43_v32 = vld [vmem:[%s1204_s0 + $0x48] sm:$0xff] }
   0xc   :  { %82 = vmatpush.msra.mxu0 %v795_v10  ;;  %374 = vmatpush.msrb.mxu3 %v748_v3  ;;  %v577_v33 = vld [vmem:[%s1204_s0 + $0xc8] sm:$0xff]  ;;  %v38_v34 = vld [vmem:[%s1204_s0 + $0x20] sm:$0xff]  ;;  %v570_v35 = vld [vmem:[%s1204_s0 + $0x90] sm:$0xff] }
   0xd   :  { %201 = vmatpush.msra.mxu2 %v795_v10  ;;  %323 = vmatpush.msrb.mxu1 %v741_v2  ;;  %v45_v36 = vld [vmem:[%s1204_s0 + $0x58] sm:$0xff]  ;;  %v40_v38 = vld [vmem:[%s1204_s0 + $0x30] sm:$0xff]  ;;  %v572_v39 = vld [vmem:[%s1204_s0 + $0xa0] sm:$0xff] }
   0xe   :  { %83 = vmatpush.msra.mxu0 %v804_v11  ;;  %375 = vmatpush.msrb.mxu3 %v764_v5  ;;  %v579_v37 = vld [vmem:[%s1204_s0 + $0xd8] sm:$0x3]  ;;  %v47_v40 = vld [vmem:[%s1204_s0 + $0x68] sm:$0x3]  ;;  %v42_v42 = vld [vmem:[%s1204_s0 + $0x40] sm:$0xff] }
   0xf   :  { %202 = vmatpush.msra.mxu2 %v804_v11  ;;  %324 = vmatpush.msrb.mxu1 %v755_v4  ;;  %v589_v41 = vld [vmem:[%s1204_s0 + $0xe8] sm:$0xff]  ;;  %v574_v43 = vld [vmem:[%s1204_s0 + $0xb0] sm:$0xff]  ;;  %v588_v44 = vld [vmem:[%s1204_s0 + $0xe0] sm:$0xff] }
  0x10   :  { %582 = vmatmul.msk.f32.gmra.mxu3 %vm51_vm1, %v569_v12  ;;  %84 = vmatpush.msra.mxu0 %v816_v13  ;;  %v591_v45 = vld [vmem:[%s1204_s0 + $0xf8] sm:$0xff]  ;;  %v44_v46 = vld [vmem:[%s1204_s0 + $0x50] sm:$0xff]  ;;  %v576_v47 = vld [vmem:[%s1204_s0 + $0xc0] sm:$0xff] }
  0x11   :  { %203 = vmatpush.msra.mxu2 %v816_v13  ;;  %560 = vmatmul.msk.f32.gmra.mxu1 %vm51_vm1, %v37_v14  ;;  %v590_v48 = vld [vmem:[%s1204_s0 + $0xf0] sm:$0xff]  ;;  %v593_v49 = vld [vmem:[%s1204_s0 + $0x108] sm:$0xff]  ;;  %v46_v50 = vld [vmem:[%s1204_s0 + $0x60] sm:$0x3] }
  0x12   :  { %85 = vmatpush.msra.mxu0 %v828_v15  ;;  %325 = vmatpush.msrb.mxu1 %v773_v7  ;;  %v578_v51 = vld [vmem:[%s1204_s0 + $0xd0] sm:$0x3]  ;;  %v592_v52 = vld [vmem:[%s1204_s0 + $0x100] sm:$0xff]  ;;  %v595_v53 = vld [vmem:[%s1204_s0 + $0x118] sm:$0xff] }
  0x13   :  { %204 = vmatpush.msra.mxu2 %v828_v15  ;;  %648 = vmatpush.msk.msra.mxu3 %vm73_vm0, %v736_v1  ;;  %v610_v54 = vld [vmem:[%s1204_s0 + $0x150] sm:$0xff]  ;;  %v611_v55 = vld [vmem:[%s1204_s0 + $0x158] sm:$0xff]  ;;  %v597_v57 = vld [vmem:[%s1204_s0 + $0x128] sm:$0xff] }
  0x14   :  { %86 = vmatpush.msra.mxu0 %v838_v16  ;;  %326 = vmatpush.msrb.mxu1 %v785_v9  ;;  %v594_v56 = vld [vmem:[%s1204_s0 + $0x110] sm:$0xff]  ;;  %v612_v58 = vld [vmem:[%s1204_s0 + $0x160] sm:$0xff]  ;;  %v613_v59 = vld [vmem:[%s1204_s0 + $0x168] sm:$0xff] }
  0x15   :  { %205 = vmatpush.msra.mxu2 %v838_v16  ;;  %649 = vmatpush.msra.mxu3 %v748_v3  ;;  %v596_v60 = vld [vmem:[%s1204_s0 + $0x120] sm:$0xff]  ;;  %v599_v61 = vld [vmem:[%s1204_s0 + $0x138] sm:$0xff]  ;;  %v614_v62 = vld [vmem:[%s1204_s0 + $0x170] sm:$0xff] }
  0x16   :  { %87 = vmatpush.msra.mxu0 %v846_v17  ;;  %327 = vmatpush.msrb.mxu1 %v795_v10  ;;  %v615_v63 = vld [vmem:[%s1204_s0 + $0x178] sm:$0xff]  ;;  %v618_v6 = vld [vmem:[%s1204_s0 + $0x190] sm:$0xff] }
  0x17   :  { %206 = vmatpush.msra.mxu2 %v846_v17  ;;  %650 = vmatpush.msra.mxu3 %v764_v5  ;;  %v622_v8 = vld [vmem:[%s1204_s0 + $0x1b0] sm:$0x3] }
  0x18   :  { %583 = vmatmul.msk.f32.gmra.mxu3 %vm51_vm1, %v571_v18  ;;  %88 = vmatpush.msra.mxu0 %v859_v19 }
  0x19   :  { %207 = vmatpush.msra.mxu2 %v859_v19  ;;  %561 = vmatmul.msk.f32.gmra.mxu1 %vm51_vm1, %v39_v20 }
  0x1a   :  { %89 = vmatpush.msra.mxu0 %v871_v21  ;;  %328 = vmatpush.msrb.mxu1 %v804_v11 }
  0x1b   :  { %208 = vmatpush.msra.mxu2 %v871_v21 }
  0x1c   :  { %90 = vmatpush.msra.mxu0 %v881_v22  ;;  %329 = vmatpush.msrb.mxu1 %v816_v13 }
  0x1d   :  { %209 = vmatpush.msra.mxu2 %v881_v22 }
  0x1e   :  { %91 = vmatpush.msra.mxu0 %v889_v23  ;;  %330 = vmatpush.msrb.mxu1 %v828_v15 }
  0x1f   :  { %210 = vmatpush.msra.mxu2 %v889_v23 }
  0x20   :  { %584 = vmatmul.msk.f32.gmra.mxu3 %vm51_vm1, %v573_v24  ;;  %92 = vmatpush.msra.mxu0 %v900_v25 }
  0x21   :  { %211 = vmatpush.msra.mxu2 %v900_v25  ;;  %93 = vmatmul.f32.vlgmr.msra.gmra.mxu0 %v34_v26 }
  0x22   :  { %212 = vmatmul.f32.vlgmr.msra.gmra.mxu2 %v566_v27  ;;  %562 = vmatmul.msk.f32.gmra.mxu1 %vm51_vm1, %v41_v28 }
  0x23   :  { %624 = vmatpush.msk.msrb.mxu2 %vm73_vm0, %v736_v1  ;;  %448 = vmatpush.msrb.mxu0 %v731_v0  ;;  %v601_v1 = vld [vmem:[%s1204_s0 + $0x148] sm:$0x3] }
  0x24   :  { %331 = vmatpush.msrb.mxu1 %v838_v16 }
  0x25   :  { %449 = vmatpush.msrb.mxu0 %v741_v2  ;;  %500 = vmatpush.msrb.mxu2 %v748_v3  ;;  %v617_v3 = vld [vmem:[%s1204_s0 + $0x188] sm:$0xff] }
  0x26   :  { %332 = vmatpush.msrb.mxu1 %v846_v17 }
  0x27   :  { %450 = vmatpush.msrb.mxu0 %v755_v4  ;;  %501 = vmatpush.msrb.mxu2 %v764_v5  ;;  %v623_v5 = vld [vmem:[%s1204_s0 + $0x1b8] sm:$0x3] }
  0x28   :  { %585 = vmatmul.msk.f32.gmra.mxu3 %vm51_vm1, %v575_v29  ;;  %333 = vmatpush.msrb.mxu1 %v859_v19 }
  0x29   :  { %96 = vmatmul.f32.gmra.mxu0 %v36_v30 }
  0x2a   :  { %215 = vmatmul.f32.gmra.mxu2 %v568_v31  ;;  %563 = vmatmul.msk.f32.gmra.mxu1 %vm51_vm1, %v43_v32 }
  0x2b   :  { %451 = vmatpush.msrb.mxu0 %v773_v7  ;;  %334 = vmatpush.msrb.mxu1 %v871_v21 }
  0x2d   :  { %452 = vmatpush.msrb.mxu0 %v785_v9  ;;  %335 = vmatpush.msrb.mxu1 %v881_v22 }
  0x2f   :  { %453 = vmatpush.msrb.mxu0 %v795_v10  ;;  %336 = vmatpush.msrb.mxu1 %v889_v23 }
  0x30   :  { %586 = vmatmul.msk.f32.gmra.mxu3 %vm51_vm1, %v577_v33 }
  0x31   :  { %99 = vmatmul.f32.gmra.mxu0 %v38_v34  ;;  %337 = vmatpush.msrb.mxu1 %v900_v25 }
  0x32   :  { %218 = vmatmul.f32.gmra.mxu2 %v570_v35  ;;  %564 = vmatmul.msk.f32.gmra.mxu1 %vm51_vm1, %v45_v36 }
  0x33   :  { %454 = vmatpush.msrb.mxu0 %v804_v11  ;;  %632 = vmatpush.msra.mxu1 %v731_v0  ;;  %v598_v0 = vld [vmem:[%s1204_s0 + $0x130] sm:$0xff] }
  0x35   :  { %455 = vmatpush.msrb.mxu0 %v816_v13  ;;  %633 = vmatpush.msra.mxu1 %v741_v2  ;;  %v616_v2 = vld [vmem:[%s1204_s0 + $0x180] sm:$0xff] }
  0x37   :  { %456 = vmatpush.msrb.mxu0 %v828_v15  ;;  %634 = vmatpush.msra.mxu1 %v755_v4  ;;  %v600_v4 = vld [vmem:[%s1204_s0 + $0x140] sm:$0x3] }
  0x38   :  { %587 = vmatmul.msk.f32.gmra.mxu3 %vm51_vm1, %v579_v37 }
  0x39   :  { %102 = vmatmul.f32.gmra.mxu0 %v40_v38  ;;  %635 = vmatpush.msra.mxu1 %v773_v7  ;;  %v619_v7 = vld [vmem:[%s1204_s0 + $0x198] sm:$0xff] }
  0x3a   :  { %221 = vmatmul.f32.gmra.mxu2 %v572_v39  ;;  %565 = vmatmul.msk.f32.gmra.mxu1 %vm51_vm1, %v47_v40 }
  0x3b   :  { %457 = vmatpush.msrb.mxu0 %v838_v16  ;;  %636 = vmatpush.msra.mxu1 %v785_v9  ;;  %v620_v9 = vld [vmem:[%s1204_s0 + $0x1a0] sm:$0xff] }
  0x3d   :  { %458 = vmatpush.msrb.mxu0 %v846_v17  ;;  %637 = vmatpush.msra.mxu1 %v795_v10  ;;  %v621_v10 = vld [vmem:[%s1204_s0 + $0x1a8] sm:$0xff] }
  0x3f   :  { %459 = vmatpush.msrb.mxu0 %v859_v19  ;;  %638 = vmatpush.msra.mxu1 %v804_v11 }
  0x40   :  { %603 = vmatmul.msk.f32.vlgmr.msrb.gmra.mxu3 %vm51_vm1, %v589_v41 }
  0x41   :  { %105 = vmatmul.f32.gmra.mxu0 %v42_v42  ;;  %639 = vmatpush.msra.mxu1 %v816_v13 }
  0x42   :  { %224 = vmatmul.f32.gmra.mxu2 %v574_v43  ;;  %338 = vmatmul.f32.vlgmr.msrb.gmra.mxu1 %v588_v44 }
  0x43   :  { %460 = vmatpush.msrb.mxu0 %v871_v21  ;;  %640 = vmatpush.msra.mxu1 %v828_v15 }
  0x45   :  { %461 = vmatpush.msrb.mxu0 %v881_v22  ;;  %641 = vmatpush.msra.mxu1 %v838_v16 }
  0x47   :  { %462 = vmatpush.msrb.mxu0 %v889_v23  ;;  %642 = vmatpush.msra.mxu1 %v846_v17  ;;  %v1122_v17 = vld [vmem:[%s1205_s2] ss:$0 sm:$0xff] }
  0x48   :  { %604 = vmatmul.msk.f32.gmra.mxu3 %vm51_vm1, %v591_v45 }
  0x49   :  { %108 = vmatmul.f32.gmra.mxu0 %v44_v46  ;;  %643 = vmatpush.msra.mxu1 %v859_v19 }
  0x4a   :  { %227 = vmatmul.f32.gmra.mxu2 %v576_v47  ;;  %341 = vmatmul.f32.gmra.mxu1 %v590_v48 }
  0x4b   :  { %463 = vmatpush.msrb.mxu0 %v900_v25  ;;  %644 = vmatpush.msra.mxu1 %v871_v21 }
  0x4d   :  { %645 = vmatpush.msra.mxu1 %v881_v22 }
  0x4f   :  { %646 = vmatpush.msra.mxu1 %v889_v23 }
  0x50   :  { %605 = vmatmul.msk.f32.gmra.mxu3 %vm51_vm1, %v593_v49 }
  0x51   :  { %111 = vmatmul.f32.gmra.mxu0 %v46_v50  ;;  %647 = vmatpush.msra.mxu1 %v900_v25 }
  0x52   :  { %230 = vmatmul.f32.gmra.mxu2 %v578_v51  ;;  %344 = vmatmul.f32.gmra.mxu1 %v592_v52 }
  0x58   :  { %606 = vmatmul.msk.f32.gmra.mxu3 %vm51_vm1, %v595_v53 }
  0x59   :  { %464 = vmatmul.f32.vlgmr.msrb.gmra.mxu0 %v610_v54 }
  0x5a   :  { %625 = vmatmul.msk.f32.vlgmr.msrb.gmra.mxu2 %vm51_vm1, %v611_v55  ;;  %347 = vmatmul.f32.gmra.mxu1 %v594_v56 }
  0x60   :  { %607 = vmatmul.msk.f32.gmra.mxu3 %vm51_vm1, %v597_v57 }
  0x61   :  { %467 = vmatmul.f32.gmra.mxu0 %v612_v58 }
  0x62   :  { %626 = vmatmul.msk.f32.gmra.mxu2 %vm51_vm1, %v613_v59  ;;  %350 = vmatmul.f32.gmra.mxu1 %v596_v60 }
  0x68   :  { %608 = vmatmul.msk.f32.gmra.mxu3 %vm51_vm1, %v599_v61 }
  0x69   :  { %470 = vmatmul.f32.gmra.mxu0 %v614_v62 }
  0x6a   :  { %627 = vmatmul.msk.f32.gmra.mxu2 %vm51_vm1, %v615_v63  ;;  %353 = vmatmul.f32.gmra.mxu1 %v598_v0 }
  0x70   :  { %609 = vmatmul.msk.f32.gmra.mxu3 %vm51_vm1, %v601_v1 }
  0x71   :  { %473 = vmatmul.f32.gmra.mxu0 %v616_v2 }
  0x72   :  { %628 = vmatmul.msk.f32.gmra.mxu2 %vm51_vm1, %v617_v3  ;;  %356 = vmatmul.f32.gmra.mxu1 %v600_v4 }
  0x78   :  { %631 = vmatmul.msk.f32.vlgmr.msra.gmra.mxu3 %vm51_vm1, %v623_v5 }
  0x79   :  { %476 = vmatmul.f32.gmra.mxu0 %v618_v6 }
  0x7a   :  { %629 = vmatmul.msk.f32.gmra.mxu2 %vm51_vm1, %v619_v7  ;;  %482 = vmatmul.f32.vlgmr.msra.gmra.mxu1 %v622_v8 }
  0x81   :  { %479 = vmatmul.f32.gmra.mxu0 %v620_v9 }
  0x82   :  { %630 = vmatmul.msk.f32.gmra.mxu2 %vm51_vm1, %v621_v10 }
  0x86   :  { %v132_v11 = vpop.f32.mrf.mxu1 }
  0x8b   :  { %v251_v12 = vpop.f32.mrf.mxu3 }
  0x8e   :  { %v135_v13 = vpop.f32.mrf.mxu1 }
  0x93   :  { %v254_v14 = vpop.f32.mrf.mxu3 }
  0x96   :  { %v138_v15 = vpop.f32.mrf.mxu1 }
  0x9b   :  { %v257_v16 = vpop.f32.mrf.mxu3 }
  0x9e   :  { %v94_v18 = vpop.f32.mrf.mxu0 }
  0x9f   :  { %v141_v19 = vpop.f32.mrf.mxu1  ;;  %v95_v20 = vadd.f32 %v1122_v17, %v94_v18 }
  0xa1   :  { %v133_v22 = vadd.f32 %v132_v11, %v95_v20 }
  0xa3   :  { %v260_v21 = vpop.f32.mrf.mxu3  ;;  %652 = vtanh.f32 %v133_v22 }
  0xa5   :  { %v213_v23 = vpop.f32.mrf.mxu2 }
  0xa6   :  { %v214_v24 = vadd.f32 %v1122_v17, %v213_v23  ;;  %v97_v25 = vpop.f32.mrf.mxu0 }
  0xa7   :  { %v144_v26 = vpop.f32.mrf.mxu1  ;;  %v98_v28 = vadd.f32 %v1122_v17, %v97_v25 }
  0xa8   :  { %v252_v27 = vadd.f32 %v251_v12, %v214_v24 }
  0xa9   :  { %v136_v30 = vadd.f32 %v135_v13, %v98_v28  ;;  %v653_v34 = vpop.eup %652 }
  0xaa   :  { %654 = vtanh.f32 %v252_v27 }
  0xab   :  { %v263_v29 = vpop.f32.mrf.mxu3  ;;  %656 = vtanh.f32 %v136_v30 }
  0xad   :  { %v216_v31 = vpop.f32.mrf.mxu2 }
  0xae   :  { %v217_v32 = vadd.f32 %v1122_v17, %v216_v31  ;;  %v100_v33 = vpop.f32.mrf.mxu0 }
  0xaf   :  { %v147_v35 = vpop.f32.mrf.mxu1  ;;  %v101_v38 = vadd.f32 %v1122_v17, %v100_v33 }
  0xb0   :  { %v655_v36 = vpop.eup %654  ;;  %v255_v37 = vadd.f32 %v254_v14, %v217_v32 }
  0xb1   :  { %v1129_v39 = vadd.f32 %v655_v36, %v653_v34  ;;  %v139_v41 = vadd.f32 %v138_v15, %v101_v38  ;;  %v657_v45 = vpop.eup %656 }
  0xb2   :  { %658 = vtanh.f32 %v255_v37 }
  0xb3   :  { %v266_v40 = vpop.f32.mrf.mxu3  ;;  %660 = vtanh.f32 %v139_v41 }
  0xb5   :  { %v219_v42 = vpop.f32.mrf.mxu2 }
  0xb6   :  { %v220_v43 = vadd.f32 %v1122_v17, %v219_v42  ;;  %v103_v44 = vpop.f32.mrf.mxu0 }
  0xb7   :  { %v1132_v46 = vpop.f32.mrf.mxu1  ;;  %v104_v49 = vadd.f32 %v1122_v17, %v103_v44 }
  0xb8   :  { %v659_v47 = vpop.eup %658  ;;  %v258_v48 = vadd.f32 %v257_v16, %v220_v43 }
  0xb9   :  { %v1135_v50 = vadd.f32 %v659_v47, %v657_v45  ;;  %v142_v52 = vadd.f32 %v141_v19, %v104_v49  ;;  %v661_v56 = vpop.eup %660 }
  0xba   :  { %662 = vtanh.f32 %v258_v48 }
  0xbb   :  { %v1137_v51 = vpop.f32.mrf.mxu3  ;;  %664 = vtanh.f32 %v142_v52 }
  0xbd   :  { %v222_v53 = vpop.f32.mrf.mxu2 }
  0xbe   :  { %v223_v54 = vadd.f32 %v1122_v17, %v222_v53  ;;  %v106_v55 = vpop.f32.mrf.mxu0 }
  0xbf   :  { %v339_v57 = vpop.f32.mrf.mxu1  ;;  %v107_v60 = vadd.f32 %v1122_v17, %v106_v55 }
  0xc0   :  { %v663_v58 = vpop.eup %662  ;;  %v261_v59 = vadd.f32 %v260_v21, %v223_v54  ;;  %v340_v21 = vadd.f32 %v1122_v17, %v339_v57 }
  0xc1   :  { %v1141_v61 = vadd.f32 %v663_v58, %v661_v56  ;;  %v145_v63 = vadd.f32 %v144_v26, %v107_v60  ;;  %v665_v3 = vpop.eup %664 }
  0xc2   :  { %666 = vtanh.f32 %v261_v59 }
  0xc3   :  { %v377_v62 = vpop.f32.mrf.mxu3  ;;  %668 = vtanh.f32 %v145_v63 }
  0xc4   :  { %v378_v27 = vadd.f32 %v377_v62, %v340_v21 }
  0xc5   :  { %v225_v0 = vpop.f32.mrf.mxu2 }
  0xc6   :  { %v226_v1 = vadd.f32 %v1122_v17, %v225_v0  ;;  %v109_v2 = vpop.f32.mrf.mxu0 }
  0xc7   :  { %v342_v4 = vpop.f32.mrf.mxu1  ;;  %v110_v7 = vadd.f32 %v1122_v17, %v109_v2 }
  0xc8   :  { %v667_v5 = vpop.eup %666  ;;  %v264_v6 = vadd.f32 %v263_v29, %v226_v1  ;;  %v343_v31 = vadd.f32 %v1122_v17, %v342_v4 }
  0xc9   :  { %v1145_v8 = vadd.f32 %v667_v5, %v665_v3  ;;  %v148_v10 = vadd.f32 %v147_v35, %v110_v7  ;;  %v669_v14 = vpop.eup %668 }
  0xca   :  { %670 = vtanh.f32 %v264_v6 }
  0xcb   :  { %v380_v9 = vpop.f32.mrf.mxu3  ;;  %672 = vtanh.f32 %v148_v10 }
  0xcc   :  { %v381_v36 = vadd.f32 %v380_v9, %v343_v31 }
  0xcd   :  { %v228_v11 = vpop.f32.mrf.mxu2 }
  0xce   :  { %v229_v12 = vadd.f32 %v1122_v17, %v228_v11  ;;  %v112_v13 = vpop.f32.mrf.mxu0 }
  0xcf   :  { %v345_v15 = vpop.f32.mrf.mxu1  ;;  %v113_v3 = vadd.f32 %v1122_v17, %v112_v13 }
  0xd0   :  { %v671_v16 = vpop.eup %670  ;;  %v267_v18 = vadd.f32 %v266_v40, %v229_v12  ;;  %v346_v41 = vadd.f32 %v1122_v17, %v345_v15 }
  0xd1   :  { %v1148_v19 = vadd.f32 %v671_v16, %v669_v14  ;;  %v673_v24 = vpop.eup %672  ;;  %v151_v11 = vadd.f32 %v1132_v46, %v113_v3 }
  0xd2   :  { %674 = vtanh.f32 %v267_v18 }
  0xd3   :  { %v383_v20 = vpop.f32.mrf.mxu3  ;;  %676 = vtanh.f32 %v378_v27 }
  0xd4   :  { %v384_v52 = vadd.f32 %v383_v20, %v346_v41 }
  0xd5   :  { %v231_v22 = vpop.f32.mrf.mxu2 }
  0xd6   :  { %v465_v23 = vpop.f32.mrf.mxu0  ;;  %v232_v63 = vadd.f32 %v1122_v17, %v231_v22 }
  0xd7   :  { %v348_v25 = vpop.f32.mrf.mxu1  ;;  %v466_v29 = vadd.f32 %v1122_v17, %v465_v23 }
  0xd8   :  { %v675_v26 = vpop.eup %674 }
  0xd9   :  { %v1151_v28 = vadd.f32 %v675_v26, %v673_v24  ;;  %v677_v37 = vpop.eup %676 }
  0xda   :  { %v405_v42 = vadd.f32 %v677_v37, %v1129_v39  ;;  %v349_v39 = vadd.f32 %v1122_v17, %v348_v25 }
  0xdb   :  { %v386_v30 = vpop.f32.mrf.mxu3 }
  0xdc   :  { %v387_v2 = vadd.f32 %v386_v30, %v349_v39 }
  0xdd   :  { %v503_v32 = vpop.f32.mrf.mxu2 }
  0xde   :  { %v504_v33 = vadd.f32 %v503_v32, %v466_v29  ;;  %v468_v34 = vpop.f32.mrf.mxu0 }
  0xdf   :  { %v351_v35 = vpop.f32.mrf.mxu1  ;;  %v469_v38 = vadd.f32 %v1122_v17, %v468_v34 }
  0xe0   :  { %678 = vtanh.f32 %v504_v33  ;;  %v352_v10 = vadd.f32 %v1122_v17, %v351_v35 }
  0xe1   :  { %680 = vtanh.f32 %v381_v36 }
  0xe3   :  { %v389_v40 = vpop.f32.mrf.mxu3 }
  0xe4   :  { %v390_v21 = vadd.f32 %v389_v40, %v352_v10 }
  0xe5   :  { %v506_v43 = vpop.f32.mrf.mxu2 }
  0xe6   :  { %v679_v44 = vpop.eup %678  ;;  %v507_v45 = vadd.f32 %v506_v43, %v469_v38  ;;  %v471_v47 = vpop.f32.mrf.mxu0 }
  0xe7   :  { %v531_v48 = vadd.f32 %v679_v44, %v405_v42  ;;  %v354_v49 = vpop.f32.mrf.mxu1  ;;  %v681_v54 = vpop.eup %680  ;;  %v472_v55 = vadd.f32 %v1122_v17, %v471_v47 }
  0xe8   :  { %682 = vtanh.f32 %v507_v45  ;;  %v406_v57 = vadd.f32 %v681_v54, %v1135_v50  ;;  %v270_v50 = vadd.f32 %v1137_v51, %v232_v63  ;;  %v355_v25 = vadd.f32 %v1122_v17, %v354_v49 }
  0xe9   :  { %v538_v53 = vmul.f32 0.25, %v531_v48  ;;  %684 = vtanh.f32 %v384_v52 }
  0xeb   :  { %546 = vst.msk [vmem:[%s1206_s3] sm:$0xff] %vm545_vm2, %v538_v53  ;;  %v392_v56 = vpop.f32.mrf.mxu3 }
  0xec   :  { %v393_v37 = vadd.f32 %v392_v56, %v355_v25 }
  0xed   :  { %v509_v58 = vpop.f32.mrf.mxu2 }
  0xee   :  { %v683_v59 = vpop.eup %682  ;;  %v510_v60 = vadd.f32 %v509_v58, %v472_v55  ;;  %v474_v62 = vpop.f32.mrf.mxu0 }
  0xef   :  { %v532_v0 = vadd.f32 %v683_v59, %v406_v57  ;;  %v357_v1 = vpop.f32.mrf.mxu1  ;;  %v685_v5 = vpop.eup %684  ;;  %v475_v7 = vadd.f32 %v1122_v17, %v474_v62 }
  0xf0   :  { %686 = vtanh.f32 %v510_v60  ;;  %v358_v6 = vadd.f32 %v1122_v17, %v357_v1  ;;  %v407_v12 = vadd.f32 %v685_v5, %v1141_v61 }
  0xf1   :  { %v539_v4 = vmul.f32 0.25, %v532_v0  ;;  %688 = vtanh.f32 %v387_v2 }
  0xf2   :  { %690 = vtanh.f32 %v270_v50 }
  0xf3   :  { %547 = vst.msk [vmem:[%s1206_s3 + $0x8] sm:$0xff] %vm545_vm2, %v539_v4  ;;  %v395_v9 = vpop.f32.mrf.mxu3 }
  0xf4   :  { %v396_v15 = vadd.f32 %v395_v9, %v358_v6 }
  0xf5   :  { %v512_v13 = vpop.f32.mrf.mxu2 }
  0xf6   :  { %v687_v14 = vpop.eup %686  ;;  %v513_v16 = vadd.f32 %v512_v13, %v475_v7  ;;  %v477_v18 = vpop.f32.mrf.mxu0 }
  0xf7   :  { %v533_v51 = vadd.f32 %v687_v14, %v407_v12  ;;  %v483_v20 = vpop.f32.mrf.mxu1  ;;  %v689_v24 = vpop.eup %688  ;;  %v478_v46 = vadd.f32 %v1122_v17, %v477_v18 }
  0xf8   :  { %692 = vtanh.f32 %v513_v16  ;;  %v484_v22 = vadd.f32 %v1122_v17, %v483_v20  ;;  %v691_v27 = vpop.eup %690  ;;  %v408_v29 = vadd.f32 %v689_v24, %v1145_v8 }
  0xf9   :  { %694 = vtanh.f32 %v151_v11  ;;  %v540_v23 = vmul.f32 0.25, %v533_v51 }
  0xfa   :  { %696 = vtanh.f32 %v396_v15 }
  0xfb   :  { %548 = vst.msk [vmem:[%s1206_s3 + $0x10] sm:$0xff] %vm545_vm2, %v540_v23  ;;  %v521_v61 = vpop.f32.mrf.mxu3  ;;  %698 = vtanh.f32 %v390_v21 }
  0xfc   :  { %v522_v26 = vadd.f32 %v521_v61, %v484_v22 }
  0xfd   :  { %v515_v30 = vpop.f32.mrf.mxu2 }
  0xfe   :  { %v693_v31 = vpop.eup %692  ;;  %700 = vtanh.f32 %v522_v26  ;;  %v516_v32 = vadd.f32 %v515_v30, %v478_v46  ;;  %v480_v35 = vpop.f32.mrf.mxu0 }
  0xff   :  { %v695_v33 = vpop.eup %694  ;;  %v534_v34 = vadd.f32 %v693_v31, %v408_v29  ;;  %v481_v42 = vadd.f32 %v1122_v17, %v480_v35 }
 0x100   :  { %v697_v36 = vpop.eup %696  ;;  %702 = vtanh.f32 %v516_v32  ;;  %v285_v38 = vadd.f32 %v695_v33, %v691_v27 }
 0x101   :  { %v541_v40 = vmul.f32 0.25, %v534_v34  ;;  %v699_v41 = vpop.eup %698  ;;  %704 = vtanh.f32 %v393_v37 }
 0x102   :  { %v411_v43 = vadd.f32 %v697_v36, %v285_v38  ;;  %v409_v44 = vadd.f32 %v699_v41, %v1148_v19 }
 0x103   :  { %549 = vst.msk [vmem:[%s1206_s3 + $0x18] sm:$0xff] %vm545_vm2, %v541_v40 }
 0x104   :  { %v701_v8 = vpop.eup %700 }
 0x105   :  { %v537_v45 = vadd.f32 %v701_v8, %v411_v43  ;;  %v518_v47 = vpop.f32.mrf.mxu2 }
 0x106   :  { %v703_v48 = vpop.eup %702  ;;  %v519_v49 = vadd.f32 %v518_v47, %v481_v42 }
 0x107   :  { %v544_v52 = vmul.f32 0.25, %v537_v45  ;;  %v535_v53 = vadd.f32 %v703_v48, %v409_v44  ;;  %v705_v54 = vpop.eup %704 }
 0x108   :  { %706 = vtanh.f32 %v519_v49  ;;  %v410_v19 = vadd.f32 %v705_v54, %v1151_v28 }
 0x109   :  { %553 = vst.msk [vmem:[%s1206_s3 + $0x30] sm:$0x3] %vm552_vm3, %v544_v52  ;;  %v542_v17 = vmul.f32 0.25, %v535_v53 }
 0x10b   :  { %550 = vst.msk [vmem:[%s1206_s3 + $0x20] sm:$0xff] %vm545_vm2, %v542_v17 }
 0x10e   :  { %v707_v55 = vpop.eup %706 }
 0x10f   :  { %v536_v56 = vadd.f32 %v707_v55, %v410_v19 }
 0x111   :  { %v543_v39 = vmul.f32 0.25, %v536_v56 }
 0x113   :  { %551 = vst.msk [vmem:[%s1206_s3 + $0x28] sm:$0xff] %vm545_vm2, %v543_v39 }

// kernel: lenet5_forward.5
= control target key start
LH: loop header
LB: loop body
LE: loop exit
PB: predicated region body
PF: predicated region fallthrough
CT: control target
= control target key end

     0   :  { %s621_s0 = inlined_call_operand.vmem [shape: f32[2,400], index: 0, kind: input, shape index: {}]   ;;  %s622_s1 = inlined_call_operand.vmem [shape: f32[400,120], index: 1, kind: input, shape index: {}]   ;;  %s623_s2 = inlined_call_operand.vmem [shape: f32[1,120], index: 2, kind: input, shape index: {}]   ;;  %s624_s3 = inlined_call_operand.vmem [shape: f32[120,84], index: 3, kind: input, shape index: {}]   ;;  %s625_s4 = inlined_call_operand.vmem [shape: f32[1,84], index: 4, kind: input, shape index: {}]   ;;  %s626_s5 = inlined_call_operand.vmem [shape: f32[84,10], index: 5, kind: input, shape index: {}]   ;;  %s627_s6 = inlined_call_operand.vmem [shape: f32[1,10], index: 6, kind: input, shape index: {}]   ;;  %s628_s7 = inlined_call_operand.hbm [shape: f32[2,10], index: 7, kind: output, shape index: {}]  }
   0x1   :  { %v75_v0 = vld [vmem:[%s622_s1 + $0x178] sm:$0xff]  ;;  %v74_v2 = vld [vmem:[%s622_s1 + $0x170] sm:$0xff]  ;;  %v73_v5 = vld [vmem:[%s622_s1 + $0x168] sm:$0xff] }
   0x2   :  { %v43_v1 = vld [vmem:[%s622_s1 + $0x78] sm:$0xff]  ;;  %134 = vmatpush.msra.mxu2 %v75_v0  ;;  %v42_v3 = vld [vmem:[%s622_s1 + $0x70] sm:$0xff]  ;;  %v41_v6 = vld [vmem:[%s622_s1 + $0x68] sm:$0xff] }
   0x3   :  { %94 = vmatpush.msra.mxu0 %v43_v1  ;;  %v59_v4 = vld [vmem:[%s622_s1 + $0xf8] sm:$0xff]  ;;  %v58_v7 = vld [vmem:[%s622_s1 + $0xf0] sm:$0xff]  ;;  %v57_v8 = vld [vmem:[%s622_s1 + $0xe8] sm:$0xff] }
   0x4   :  { %114 = vmatpush.msra.mxu1 %v59_v4  ;;  %135 = vmatpush.msra.mxu2 %v74_v2  ;;  %v72_v9 = vld [vmem:[%s622_s1 + $0x160] sm:$0xff]  ;;  %v71_v12 = vld [vmem:[%s622_s1 + $0x158] sm:$0xff]  ;;  %v70_v15 = vld [vmem:[%s622_s1 + $0x150] sm:$0xff] }
   0x5   :  { %95 = vmatpush.msra.mxu0 %v42_v3  ;;  %v40_v10 = vld [vmem:[%s622_s1 + $0x60] sm:$0xff]  ;;  %v39_v13 = vld [vmem:[%s622_s1 + $0x58] sm:$0xff]  ;;  %v38_v16 = vld [vmem:[%s622_s1 + $0x50] sm:$0xff] }
   0x6   :  { %115 = vmatpush.msra.mxu1 %v58_v7  ;;  %136 = vmatpush.msra.mxu2 %v73_v5  ;;  %v56_v11 = vld [vmem:[%s622_s1 + $0xe0] sm:$0xff]  ;;  %v55_v14 = vld [vmem:[%s622_s1 + $0xd8] sm:$0xff]  ;;  %v54_v17 = vld [vmem:[%s622_s1 + $0xd0] sm:$0xff] }
   0x7   :  { %96 = vmatpush.msra.mxu0 %v41_v6  ;;  %v69_v18 = vld [vmem:[%s622_s1 + $0x148] sm:$0xff]  ;;  %v68_v21 = vld [vmem:[%s622_s1 + $0x140] sm:$0xff]  ;;  %v67_v24 = vld [vmem:[%s622_s1 + $0x138] sm:$0xff] }
   0x8   :  { %116 = vmatpush.msra.mxu1 %v57_v8  ;;  %137 = vmatpush.msra.mxu2 %v72_v9  ;;  %v37_v19 = vld [vmem:[%s622_s1 + $0x48] sm:$0xff]  ;;  %v36_v22 = vld [vmem:[%s622_s1 + $0x40] sm:$0xff]  ;;  %v35_v25 = vld [vmem:[%s622_s1 + $0x38] sm:$0xff] }
   0x9   :  { %97 = vmatpush.msra.mxu0 %v40_v10  ;;  %v53_v20 = vld [vmem:[%s622_s1 + $0xc8] sm:$0xff]  ;;  %v52_v23 = vld [vmem:[%s622_s1 + $0xc0] sm:$0xff]  ;;  %v51_v26 = vld [vmem:[%s622_s1 + $0xb8] sm:$0xff] }
   0xa   :  { %117 = vmatpush.msra.mxu1 %v56_v11  ;;  %138 = vmatpush.msra.mxu2 %v71_v12  ;;  %v77_v27 = vld [vmem:[%s622_s1 + $0x188] sm:$0xff]  ;;  %v27_v28 = vld [vmem:[%s621_s0] sm:$0xff]  ;;  %v66_v29 = vld [vmem:[%s622_s1 + $0x130] sm:$0xff] }
   0xb   :  { %98 = vmatpush.msra.mxu0 %v39_v13  ;;  %v34_v30 = vld [vmem:[%s622_s1 + $0x30] sm:$0xff]  ;;  %168 = vmatpush.msra.mxu3 %v77_v27  ;;  %83 = vst [vmem:[#allocation1] ss:$4 sm:$0xff] %v27_v28  ;;  %v76_v31 = vld [vmem:[%s622_s1 + $0x180] sm:$0xff]  ;;  %v65_v32 = vld [vmem:[%s622_s1 + $0x128] sm:$0xff] }
   0xc   :  { %118 = vmatpush.msra.mxu1 %v55_v14  ;;  %139 = vmatpush.msra.mxu2 %v70_v15  ;;  %v50_v33 = vld [vmem:[%s622_s1 + $0xb0] sm:$0xff]  ;;  %v33_v35 = vld [vmem:[%s622_s1 + $0x28] sm:$0xff]  ;;  %v64_v36 = vld [vmem:[%s622_s1 + $0x120] sm:$0xff] }
   0xd   :  { %99 = vmatpush.msra.mxu0 %v38_v16  ;;  %v189_v34 = vld [vmem:[%s624_s3 + $0x70] sm:$0xff]  ;;  %v32_v37 = vld [vmem:[%s622_s1 + $0x20] sm:$0xff]  ;;  %169 = vmatpush.msra.mxu3 %v76_v31  ;;  %v49_v38 = vld [vmem:[%s622_s1 + $0xa8] sm:$0xff] }
   0xe   :  { %119 = vmatpush.msra.mxu1 %v54_v17  ;;  %140 = vmatpush.msra.mxu2 %v69_v18  ;;  %v188_v39 = vld [vmem:[%s624_s3 + $0x68] sm:$0xff] }
   0xf   :  { %100 = vmatpush.msra.mxu0 %v37_v19  ;;  %199 = vmatpush.msrb.mxu3 %v189_v34 }
  0x10   :  { %120 = vmatpush.msra.mxu1 %v53_v20  ;;  %141 = vmatpush.msra.mxu2 %v68_v21 }
  0x11   :  { %101 = vmatpush.msra.mxu0 %v36_v22 }
  0x12   :  { %121 = vmatpush.msra.mxu1 %v52_v23  ;;  %142 = vmatpush.msra.mxu2 %v67_v24 }
  0x13   :  { %102 = vmatpush.msra.mxu0 %v35_v25 }
  0x14   :  { %122 = vmatpush.msra.mxu1 %v51_v26  ;;  %143 = vmatpush.msra.mxu2 %v66_v29 }
  0x15   :  { %103 = vmatpush.msra.mxu0 %v34_v30 }
  0x16   :  { %123 = vmatpush.msra.mxu1 %v50_v33 }
  0x17   :  { %12 = vsyncpa [#allocation3], 0  ;;  %144 = vmatpush.msra.mxu2 %v65_v32  ;;  %104 = vmatpush.msra.mxu0 %v33_v35  ;;  %v48_v40 = vld [vmem:[%s622_s1 + $0xa0] sm:$0xff]  ;;  %v63_v42 = vld [vmem:[%s622_s1 + $0x118] sm:$0xff]  ;;  %vm91_vm0 = vcmask 130048   ;;  %vm238_vm1 = vcmask 1043456  }
  0x18   :  { %v187_v41 = vld [vmem:[%s624_s3 + $0x60] sm:$0xff]  ;;  %124 = vmatpush.msra.mxu1 %v49_v38  ;;  %v31_v43 = vld [vmem:[%s622_s1 + $0x18] sm:$0xff]  ;;  %200 = vmatpush.msrb.mxu3 %v188_v39  ;;  %v62_v45 = vld [vmem:[%s622_s1 + $0x110] sm:$0xff]  ;;  %vm194_vm2 = vcmask 982016   ;;  %vm234_vm3 = vcmask 687104   ;;  %vm262_vm4 = vcmask 74752  }
  0x19   :  { %145 = vmatpush.msra.mxu2 %v64_v36  ;;  %105 = vmatpush.msra.mxu0 %v32_v37  ;;  %v47_v44 = vld [vmem:[%s622_s1 + $0x98] sm:$0xff]  ;;  %v30_v46 = vld [vmem:[%s622_s1 + $0x10] sm:$0xff]  ;;  %v61_v50 = vld [vmem:[%s622_s1 + $0x108] sm:$0xff]  ;;  %s283_s16 = sshll.u32 %s628_s7, 4  ;;  %s284_s16 = int_to_ptr.hbm [resolvable:$true] %s283_s16 }
  0x1a   :  { %125 = vmatpush.msra.mxu1 %v48_v40  ;;  %v87_v47 = vld.sshfl [vmem:[#allocation1 + $0x18] sm:$0xff pattern:$0x73625140]  ;;  %201 = vmatpush.msrb.mxu3 %v187_v41  ;;  %v46_v48 = vld [vmem:[%s622_s1 + $0x90] sm:$0xff]  ;;  %v29_v51 = vld [vmem:[%s622_s1 + $0x8] sm:$0xff] }
  0x1b   :  { %146 = vmatpush.msra.mxu2 %v63_v42  ;;  %106 = vmatpush.msra.mxu0 %v31_v43  ;;  %v186_v49 = vld [vmem:[%s624_s3 + $0x58] sm:$0xff]  ;;  %v45_v52 = vld [vmem:[%s622_s1 + $0x88] sm:$0xff]  ;;  %v185_v53 = vld [vmem:[%s624_s3 + $0x50] sm:$0xff] }
  0x1c   :  { %126 = vmatpush.msra.mxu1 %v47_v44  ;;  %292 = vmatmul.msk.f32.vlgmr.msra.gmra.mxu3 %vm91_vm0, %v87_v47  ;;  %v60_v54 = vld [vmem:[%s622_s1 + $0x100] sm:$0xff]  ;;  %v86_v56 = vld.sshfl [vmem:[#allocation1 + $0x10] sm:$0xff pattern:$0x73625140]  ;;  %v184_v59 = vld [vmem:[%s624_s3 + $0x48] sm:$0xff] }
  0x1d   :  { %147 = vmatpush.msra.mxu2 %v62_v45  ;;  %107 = vmatpush.msra.mxu0 %v30_v46  ;;  %v28_v55 = vld [vmem:[%s622_s1] sm:$0xff]  ;;  %v85_v60 = vld.sshfl [vmem:[#allocation1 + $0x8] sm:$0xff pattern:$0x73625140]  ;;  %v182_v62 = vld [vmem:[%s624_s3 + $0x38] sm:$0xff] }
  0x1e   :  { %127 = vmatpush.msra.mxu1 %v46_v48  ;;  %202 = vmatpush.msrb.mxu3 %v186_v49  ;;  %v84_v57 = vld.sshfl [vmem:[#allocation1] sm:$0xff pattern:$0x73625140]  ;;  %v181_v63 = vld [vmem:[%s624_s3 + $0x30] sm:$0xff]  ;;  %v180_v0 = vld [vmem:[%s624_s3 + $0x28] sm:$0xff] }
  0x1f   :  { %148 = vmatpush.msra.mxu2 %v61_v50  ;;  %108 = vmatpush.msra.mxu0 %v29_v51  ;;  %v44_v58 = vld [vmem:[%s622_s1 + $0x80] sm:$0xff]  ;;  %v178_v2 = vld [vmem:[%s624_s3 + $0x18] sm:$0xff]  ;;  %v177_v3 = vld [vmem:[%s624_s3 + $0x10] sm:$0xff] }
  0x20   :  { %128 = vmatpush.msra.mxu1 %v45_v52  ;;  %203 = vmatpush.msrb.mxu3 %v185_v53  ;;  %v183_v61 = vld [vmem:[%s624_s3 + $0x40] sm:$0xff]  ;;  %v176_v4 = vld [vmem:[%s624_s3 + $0x8] sm:$0xff]  ;;  %v229_v6 = vld [vmem:[%s626_s5 + $0x50] sm:$0xf] }
  0x21   :  { %149 = vmatpush.msra.mxu2 %v60_v54  ;;  %109 = vmatpush.msra.mxu0 %v28_v55  ;;  %v179_v1 = vld [vmem:[%s624_s3 + $0x20] sm:$0xff]  ;;  %v228_v7 = vld [vmem:[%s626_s5 + $0x48] sm:$0xff]  ;;  %v226_v9 = vld [vmem:[%s626_s5 + $0x38] sm:$0xff] }
  0x22   :  { %150 = vmatmul.f32.vlgmr.msra.gmra.mxu2 %v86_v56  ;;  %110 = vmatmul.f32.vlgmr.msra.gmra.mxu0 %v84_v57  ;;  %v175_v5 = vld [vmem:[%s624_s3] sm:$0xff]  ;;  %v225_v10 = vld [vmem:[%s626_s5 + $0x30] sm:$0xff]  ;;  %v224_v11 = vld [vmem:[%s626_s5 + $0x28] sm:$0xff] }
  0x23   :  { %129 = vmatpush.msra.mxu1 %v44_v58  ;;  %204 = vmatpush.msrb.mxu3 %v184_v59  ;;  %v227_v8 = vld [vmem:[%s626_s5 + $0x40] sm:$0xff]  ;;  %v222_v23 = vld [vmem:[%s626_s5 + $0x18] sm:$0xff]  ;;  %v221_v24 = vld [vmem:[%s626_s5 + $0x10] sm:$0xff] }
  0x24   :  { %130 = vmatmul.f32.vlgmr.msra.gmra.mxu1 %v85_v60  ;;  %294 = vmatpush.msk.msrb.mxu0 %vm238_vm1, %v229_v6  ;;  %v297_v12 = vld [vmem:[%s623_s2] ss:$0 sm:$0xff]  ;;  %v220_v25 = vld [vmem:[%s626_s5 + $0x8] sm:$0xff] }
  0x25   :  { %205 = vmatpush.msrb.mxu3 %v183_v61  ;;  %v223_v22 = vld [vmem:[%s626_s5 + $0x20] sm:$0xff] }
  0x26   :  { %248 = vmatpush.msrb.mxu0 %v228_v7  ;;  %v219_v26 = vld [vmem:[%s626_s5] sm:$0xff] }
  0x27   :  { %206 = vmatpush.msrb.mxu3 %v182_v62  ;;  %v298_v27 = vld [vmem:[%s625_s4] ss:$0 sm:$0xff]  ;;  %s334_s4 = smov [#allocation2]  }
  0x28   :  { %249 = vmatpush.msrb.mxu0 %v227_v8  ;;  %v299_v31 = vld [vmem:[%s627_s6] ss:$0 sm:$0xff]  ;;  %s281_s5 = sshll.u32 %s334_s4, 4  ;;  %s282_s5 = int_to_ptr.vmem [resolvable:$true] %s281_s5 }
  0x29   :  { %207 = vmatpush.msrb.mxu3 %v181_v63 }
  0x2a   :  { %250 = vmatpush.msrb.mxu0 %v226_v9 }
  0x2b   :  { %208 = vmatpush.msrb.mxu3 %v180_v0 }
  0x2c   :  { %251 = vmatpush.msrb.mxu0 %v225_v10 }
  0x2d   :  { %209 = vmatpush.msrb.mxu3 %v179_v1 }
  0x2e   :  { %252 = vmatpush.msrb.mxu0 %v224_v11 }
  0x2f   :  { %210 = vmatpush.msrb.mxu3 %v178_v2 }
  0x30   :  { %253 = vmatpush.msrb.mxu0 %v223_v22 }
  0x31   :  { %211 = vmatpush.msrb.mxu3 %v177_v3 }
  0x32   :  { %254 = vmatpush.msrb.mxu0 %v222_v23 }
  0x33   :  { %212 = vmatpush.msrb.mxu3 %v176_v4 }
  0x34   :  { %255 = vmatpush.msrb.mxu0 %v221_v24 }
  0x35   :  { %213 = vmatpush.msrb.mxu3 %v175_v5 }
  0x36   :  { %256 = vmatpush.msrb.mxu0 %v220_v25 }
  0x38   :  { %257 = vmatpush.msrb.mxu0 %v219_v26 }
  0x9f   :  { %v111_v13 = vpop.f32.mrf.mxu0  ;;  %v171_v18 = vpop.f32.mrf.mxu3 }
  0xa0   :  { %v112_v14 = vadd.f32 %v297_v12, %v111_v13 }
  0xa1   :  { %v131_v15 = vpop.f32.mrf.mxu1 }
  0xa2   :  { %v132_v16 = vadd.f32 %v131_v15, %v112_v14 }
  0xa5   :  { %v151_v17 = vpop.f32.mrf.mxu2 }
  0xa6   :  { %v152_v19 = vadd.f32 %v151_v17, %v132_v16 }
  0xa8   :  { %v172_v20 = vadd.f32 %v171_v18, %v152_v19 }
  0xaa   :  { %300 = vtanh.f32 %v172_v20 }
  0xb0   :  { %v301_v21 = vpop.eup %300 }
  0xb1   :  { %293 = vmatmul.msk.f32.vlgmr.msrb.gmra.mxu3 %vm194_vm2, %v301_v21 }
 0x134   :  { %v215_v28 = vpop.f32.mrf.mxu3 }
 0x135   :  { %v216_v29 = vadd.f32 %v298_v27, %v215_v28 }
 0x137   :  { %302 = vtanh.f32 %v216_v29 }
 0x13d   :  { %v303_v30 = vpop.eup %302 }
 0x13e   :  { %295 = vmatmul.msk.f32.vlgmr.msrb.gmra.mxu0 %vm234_vm3, %v303_v30 }
 0x1bb   :  { %v259_v32 = vpop.f32.mrf.mxu0 }
 0x1bc   :  { %v260_v33 = vadd.f32 %v299_v31, %v259_v32 }
 0x1be   :  { %v263_v34 = vsel %vm262_vm4, %v260_v33, -inf }
 0x1bf   :  { %264 = vmax.xlane.f32.xlu0 %v263_v34 }
 0x232   :  { %v265_v35 = vpop.xlane.xlu0 %264 }
 0x233   :  { %v266_v36 = vsub.f32 %v260_v33, %v265_v35 }
 0x235   :  { %v267_v37 = vmul.f32 1.442695, %v266_v36 }
 0x237   :  { %304 = vpow2.f32 %v267_v37 }
 0x23d   :  { %v305_v38 = vpop.eup %304 }
 0x23e   :  { %v269_v39 = vsel %vm262_vm4, %v305_v38, 0.0 }
 0x23f   :  { %270 = vadd.xlane.f32.xlu0 %v269_v39 }
 0x2b2   :  { %v271_v40 = vpop.xlane.xlu0 %270 }
 0x2b3   :  { %306 = vlog2.f32 %v271_v40 }
 0x2b9   :  { %v307_v41 = vpop.eup %306 }
 0x2ba   :  { %v273_v42 = vmul.f32 0.6931472, %v307_v41 }
 0x2bc   :  { %v274_v43 = vsub.f32 %v266_v36, %v273_v42 }
 0x2be   :  { %275 = vst.msk [vmem:[#allocation2] sm:$0x3] %vm262_vm4, %v274_v43 }
 0x2bf   :  { %286 = dma.vmem_to_hbm [thread:$0]  %s282_s5, 32, %s284_s16, [#allocation3]  }
 0x2c0   :  { %332 = dma.done.wait [#allocation3], 32  }
 0x2c1   :  { %333 = vsyncadd [#allocation3], 4294967264 }
 0x2c2   :  { %291 = vsyncpa [#allocation3], 1 }

</bundles_post_ra>
